<compile_context>
chip_gen: v6e
topology: v6e:2x2x1
jax: 0.10.0
libtpu: 0.0.40
codegen_flags: <defaults>
</compile_context>

<pallas_src>
import functools
import math

import jax
import jax.numpy as jnp
from jax import lax
from jax.experimental import pallas as pl
from jax.experimental.pallas import tpu as pltpu

EPS = 1e-5     # torch.nn.LayerNorm default
LANE = 128     # TPU lane width


def _round_up(n, m):
    return ((n + m - 1) // m) * m


def _layernorm(x, gamma, beta, mask, inv_d):
    # Padding-aware LayerNorm over the last dim: x is zero in padded lanes,
    # statistics use the true feature count (inv_d = 1/D_real), gamma/beta are
    # zero in padded lanes so the output stays exactly 0 there.
    mu = jnp.sum(x, axis=-1, keepdims=True) * inv_d
    diff = (x - mu) * mask
    var = jnp.sum(diff * diff, axis=-1, keepdims=True) * inv_d   # biased, like torch
    return diff * lax.rsqrt(var + EPS) * gamma + beta


def _gelu_exact(x):
    # torch.nn.GELU() default = exact erf formulation.
    return x * 0.5 * (1.0 + lax.erf(x * (1.0 / math.sqrt(2.0))))


def encoder_kernel(x_ref, ln_g_ref, ln_b_ref,
                   qkv_w_ref, qkv_b_ref,
                   proj_w_ref, proj_b_ref,
                   w1_ref, b1_ref, w2_ref, b2_ref,
                   o_ref, att_sc,
                   *, num_heads, head_slot, d_real, matmul_dtype):
    x = x_ref[0]                      # (T, Dp) f32, zero beyond d_real
    T, Dp = x.shape
    Ds = num_heads * head_slot        # lane-aligned head-slot width sum
    ln_g = ln_g_ref[...]              # (1, Dp), shared LayerNorm (used twice)
    ln_b = ln_b_ref[...]

    mask = (lax.broadcasted_iota(jnp.int32, (1, Dp), 1) < d_real).astype(x.dtype)
    inv_d = 1.0 / float(d_real)

    def mm(a, b):
        # MXU matmul with f32 accumulation; operands cast to matmul_dtype
        # (bf16 by default — weights already arrive in that dtype).
        return jnp.dot(a.astype(matmul_dtype), b.astype(matmul_dtype),
                       preferred_element_type=jnp.float32)

    def mm_nt(a, b):
        # a @ b.T contracting the last dims of both — no explicit transpose.
        return lax.dot_general(a.astype(matmul_dtype), b.astype(matmul_dtype),
                               dimension_numbers=(((1,), (1,)), ((), ())),
                               preferred_element_type=jnp.float32)

    # ---------------- MSA on layer_norm(x) ----------------
    ln1 = _layernorm(x, ln_g, ln_b, mask, inv_d)                  # (T, Dp)

    # One fused QKV matmul; 1/sqrt(head_dim) is pre-folded into the Q columns.
    qkv = mm(ln1, qkv_w_ref[...]) + qkv_b_ref[...]                # (T, 3*Ds) f32
    q = qkv[:, 0 * Ds:1 * Ds]
    k = qkv[:, 1 * Ds:2 * Ds]
    v = qkv[:, 2 * Ds:3 * Ds]

    # Per-head attention.  Head slots are 128-lane aligned, so every slice and
    # scratch store is unmasked / tile aligned.  The whole slab is rewritten
    # every step (padded slot columns get exact zeros because the V weight and
    # bias columns there are zero), so no zeroing pass is needed.
    for h in range(num_heads):                                    # static, small H
        sl = slice(h * head_slot, (h + 1) * head_slot)
        qh = q[:, sl]                                             # (T, head_slot)
        kh = k[:, sl]
        vh = v[:, sl]
        s = mm_nt(qh, kh)                                         # (T, T), pre-scaled
        s = s - jnp.max(s, axis=-1, keepdims=True)
        p = jnp.exp(s)
        p = p * pl.reciprocal(jnp.sum(p, axis=-1, keepdims=True), approx=True)
        att_sc[:, sl] = mm(p, vh).astype(att_sc.dtype)            # lane-aligned store

    # TODO(synk): for T >= ~512 tile the key axis here (flash-style online
    # softmax) so the (T, T) f32 scores never materialize (v7x VMEM).
    msa = mm(att_sc[...], proj_w_ref[...]) + proj_b_ref[...]      # (T, Dp)
    int_x = msa + x                                               # dropout p=0

    # ---------------- MLP on layer_norm(int_x) ----------------
    ln2 = _layernorm(int_x, ln_g, ln_b, mask, inv_d)
    hmid = _gelu_exact(mm(ln2, w1_ref[...]) + b1_ref[...])        # (T, Hm)
    mlp = mm(hmid, w2_ref[...]) + b2_ref[...]                     # (T, Dp)

    o_ref[0] = (mlp + int_x).astype(o_ref.dtype)                  # lane-dense store


# ---------------------------------------------------------------------------
# Wrapper-side weight preparation (run ONCE, outside the per-step forward).
# ---------------------------------------------------------------------------
def prepare_encoder_params(params, num_heads, *, matmul_dtype=jnp.bfloat16):
    f32 = jnp.float32
    D = params["proj_w"].shape[0]
    hidden = params["w1"].shape[1]
    hd = D // num_heads
    assert hd * num_heads == D

    Dp = _round_up(D, LANE)            # lane-dense embed width
    hdp = _round_up(hd, LANE)          # 128-lane-aligned per-head slot
    Ds = num_heads * hdp               # attention slab width
    Hm = _round_up(hidden, LANE)
    scale = 1.0 / math.sqrt(hd)

    qw = params["qkv_w"].astype(f32)   # (hd, 3hd) shared across heads
    qb = params["qkv_b"].astype(f32)   # (1, 3hd)

    def head_weight(w_head, s):
        # shared (hd, hd) per-head weight -> block layout (Dp, H*hdp), zeros
        # everywhere outside each head's (rows, slot-columns) block.
        W = jnp.zeros((Dp, Ds), f32)
        for h in range(num_heads):
            W = W.at[h * hd:(h + 1) * hd, h * hdp:h * hdp + hd].set(w_head * s)
        return W

    def head_bias(b_head, s):
        Bv = jnp.zeros((1, Ds), f32)
        for h in range(num_heads):
            Bv = Bv.at[:, h * hdp:h * hdp + hd].set(b_head * s)
        return Bv

    wq, wk, wv = qw[:, :hd], qw[:, hd:2 * hd], qw[:, 2 * hd:]
    bq, bk, bv = qb[:, :hd], qb[:, hd:2 * hd], qb[:, 2 * hd:]
    qkv_w = jnp.concatenate([head_weight(wq, scale), head_weight(wk, 1.0),
                             head_weight(wv, 1.0)], axis=1).astype(matmul_dtype)
    qkv_b = jnp.concatenate([head_bias(bq, scale), head_bias(bk, 1.0),
                             head_bias(bv, 1.0)], axis=1)         # f32 (1, 3*Ds)

    proj_w = jnp.zeros((Ds, Dp), f32)
    for h in range(num_heads):
        proj_w = proj_w.at[h * hdp:h * hdp + hd, :D].set(
            params["proj_w"][h * hd:(h + 1) * hd, :].astype(f32))
    proj_w = proj_w.astype(matmul_dtype)

    def pad2(a, r, c):
        a = a.astype(f32)
        return jnp.pad(a, ((0, r - a.shape[0]), (0, c - a.shape[1])))

    weights = dict(
        ln_g=pad2(params["ln_g"], 1, Dp),
        ln_b=pad2(params["ln_b"], 1, Dp),
        qkv_w=qkv_w, qkv_b=qkv_b,
        proj_w=proj_w, proj_b=pad2(params["proj_b"], 1, Dp),
        w1=pad2(params["w1"], Dp, Hm).astype(matmul_dtype),
        b1=pad2(params["b1"], 1, Hm),
        w2=pad2(params["w2"], Hm, Dp).astype(matmul_dtype),
        b2=pad2(params["b2"], 1, Dp),
    )
    meta = dict(num_heads=num_heads, head_slot=hdp, d_real=D,
                Dp=Dp, Ds=Ds, Hm=Hm, matmul_dtype=matmul_dtype)
    return dict(weights=weights, meta=meta)


_WEIGHT_ORDER = ("ln_g", "ln_b", "qkv_w", "qkv_b", "proj_w", "proj_b",
                 "w1", "b1", "w2", "b2")
_SINGLE_BUFFER_WEIGHTS_OK = True   # flipped off if Buffered(1) is rejected


def transformer_encoder(x, prep):
    global _SINGLE_BUFFER_WEIGHTS_OK
    meta, w = prep["meta"], prep["weights"]
    B, T, D = x.shape
    assert D == meta["d_real"]
    Dp, Ds, Hm = meta["Dp"], meta["Ds"], meta["Hm"]
    matmul_dtype = meta["matmul_dtype"]

    xp = x if Dp == D else jnp.pad(x, ((0, 0), (0, 0), (0, Dp - D)))
    weight_args = [w[k] for k in _WEIGHT_ORDER]

    kernel = functools.partial(
        encoder_kernel, num_heads=meta["num_heads"], head_slot=meta["head_slot"],
        d_real=D, matmul_dtype=matmul_dtype)

    # Generation-aware VMEM budget from the actual buffer sizes.
    itemsize = jnp.dtype(x.dtype).itemsize
    weight_bytes = sum(int(a.size) * jnp.dtype(a.dtype).itemsize for a in weight_args)
    io_bytes = 2 * 2 * T * Dp * itemsize                       # double-buffered x + out
    scratch_bytes = T * Ds * jnp.dtype(matmul_dtype).itemsize
    temp_bytes = 4 * (T * (5 * Ds + Hm + 8 * Dp) + 3 * T * T)  # f32 temporaries slack
    try:
        cap = int(getattr(pltpu.get_tpu_info(), "vmem_capacity_bytes", 64 << 20))
    except Exception:
        cap = 64 << 20                                          # v7x worst case

    def run(single_buffer_weights):
        wmul = 1 if single_buffer_weights else 2
        need = wmul * weight_bytes + io_bytes + scratch_bytes + temp_bytes + (4 << 20)
        vmem_limit = int(min(max(need, 32 << 20), cap * 7 // 8))

        def const_spec(arr):
            shape = arr.shape
            idx = lambda *_: (0,) * len(shape)     # constant block -> no re-DMA
            if single_buffer_weights:
                return pl.BlockSpec(shape, idx, pipeline_mode=pl.Buffered(1))
            return pl.BlockSpec(shape, idx)

        in_specs = [pl.BlockSpec((1, T, Dp), lambda b: (b, 0, 0))] + \
                   [const_spec(a) for a in weight_args]

        # TODO(synk): add a second "parallel" grid axis over token tiles so
        # v7x's 2 TensorCores are both busy when B is small / odd.
        return pl.pallas_call(
            kernel,
            out_shape=jax.ShapeDtypeStruct((B, T, Dp), x.dtype),
            grid_spec=pltpu.PrefetchScalarGridSpec(
                num_scalar_prefetch=0,
                grid=(B,),
                in_specs=in_specs,
                out_specs=pl.BlockSpec((1, T, Dp), lambda b: (b, 0, 0)),
                scratch_shapes=[pltpu.VMEM((T, Ds), matmul_dtype)],
            ),
            compiler_params=pltpu.CompilerParams(
                dimension_semantics=("parallel",),
                vmem_limit_bytes=vmem_limit),
        )(xp, *weight_args)

    if _SINGLE_BUFFER_WEIGHTS_OK:
        try:
            out = run(True)
        except Exception:
            _SINGLE_BUFFER_WEIGHTS_OK = False
            out = run(False)
    else:
        out = run(False)

    return out[:, :, :D] if Dp != D else out


# ---------------- pure-JAX reference (mirrors the PyTorch module) ----------------
def reference(x, params, num_heads):
    D = x.shape[-1]
    hd = D // num_heads

    def ln(v):
        mu = jnp.mean(v, axis=-1, keepdims=True)
        var = jnp.mean((v - mu) ** 2, axis=-1, keepdims=True)
        return (v - mu) / jnp.sqrt(var + EPS) * params["ln_g"][0] + params["ln_b"][0]

    B, T, _ = x.shape
    ln1 = ln(x)
    xh = ln1.reshape(B, T, num_heads, hd).transpose(0, 2, 1, 3)      # (B, H, T, hd)
    qkv = xh @ params["qkv_w"] + params["qkv_b"][0]                  # (B, H, T, 3hd)
    q, k, v = qkv[..., :hd], qkv[..., hd:2 * hd], qkv[..., 2 * hd:]
    att = jax.nn.softmax(q @ jnp.swapaxes(k, -2, -1) / math.sqrt(hd), axis=-1) @ v
    att = att.transpose(0, 2, 1, 3).reshape(B, T, D)
    msa = att @ params["proj_w"] + params["proj_b"][0]
    int_x = msa + x
    ln2 = ln(int_x)
    h = jax.nn.gelu(ln2 @ params["w1"] + params["b1"][0], approximate=False)
    return h @ params["w2"] + params["b2"][0] + int_x


if __name__ == "__main__":
    B, T, D = 2, 16, 32
    heads = 4
    hidden = 64
    hd = D // heads

    key = jax.random.PRNGKey(0)
    ks = jax.random.split(key, 12)
    f32 = jnp.float32

    params = {
        "ln_g": jnp.ones((1, D), f32),
        "ln_b": jnp.zeros((1, D), f32),
        "qkv_w": jax.random.normal(ks[0], (hd, 3 * hd), f32) * 0.1,
        "qkv_b": jax.random.normal(ks[1], (1, 3 * hd), f32) * 0.02,
        "proj_w": jax.random.normal(ks[2], (D, D), f32) * 0.1,
        "proj_b": jax.random.normal(ks[3], (1, D), f32) * 0.02,
        "w1": jax.random.normal(ks[4], (D, hidden), f32) * 0.1,
        "b1": jax.random.normal(ks[5], (1, hidden), f32) * 0.02,
        "w2": jax.random.normal(ks[6], (hidden, D), f32) * 0.1,
        "b2": jax.random.normal(ks[7], (1, D), f32) * 0.02,
    }

    x = jax.random.normal(ks[8], (B, T, D), f32)
    ref = reference(x, params, heads)

    # f32 matmul path: torch-parity check (only the softmax approx-reciprocal
    # deviates, covered by the tolerance).
    prep_f32 = prepare_encoder_params(params, heads, matmul_dtype=jnp.float32)
    out_f32 = jax.block_until_ready(transformer_encoder(x, prep_f32))
    assert out_f32.shape == (B, T, D)
    assert jnp.allclose(out_f32, ref, atol=2e-3, rtol=2e-3), (
        float(jnp.max(jnp.abs(out_f32 - ref))))

    # bf16 MXU path (default / production): looser tolerance for bf16 inputs
    # with f32 accumulation.
    prep_bf16 = prepare_encoder_params(params, heads)   # matmul_dtype=bfloat16
    out_bf16 = jax.block_until_ready(transformer_encoder(x, prep_bf16))
    assert out_bf16.shape == (B, T, D)
    assert jnp.allclose(out_bf16, ref, atol=5e-2, rtol=5e-2), (
        float(jnp.max(jnp.abs(out_bf16 - ref))))

    print("KERNEL_OK")
</pallas_src>

<mosaic_0001>
module attributes {stable_mosaic.version = 11 : i64} {
  func.func @encoder_kernel(%arg0: i32, %arg1: memref<1x16x128xf32, #tpu.memory_space<vmem>>, %arg2: memref<1x128xf32, #tpu.memory_space<vmem>>, %arg3: memref<1x128xf32, #tpu.memory_space<vmem>>, %arg4: memref<128x1536xf32, #tpu.memory_space<vmem>>, %arg5: memref<1x1536xf32, #tpu.memory_space<vmem>>, %arg6: memref<512x128xf32, #tpu.memory_space<vmem>>, %arg7: memref<1x128xf32, #tpu.memory_space<vmem>>, %arg8: memref<128x128xf32, #tpu.memory_space<vmem>>, %arg9: memref<1x128xf32, #tpu.memory_space<vmem>>, %arg10: memref<128x128xf32, #tpu.memory_space<vmem>>, %arg11: memref<1x128xf32, #tpu.memory_space<vmem>>, %arg12: memref<1x16x128xf32, #tpu.memory_space<vmem>>, %arg13: memref<16x512xf32, #tpu.memory_space<vmem>>) attributes {dimension_semantics = [#tpu.dimension_semantics<parallel>], iteration_bounds = array<i64: 2>, scalar_prefetch = 0 : i64, scratch_operands = 1 : i64, tpu.core_type = #tpu.core_type<tc>, window_params = [{transform_indices = @transform_0, window_bounds = array<i64: 1, 16, 128>}, {pipeline_mode = #tpu.pipeline_mode<synchronous>, transform_indices = @transform_1, window_bounds = array<i64: 1, 128>}, {pipeline_mode = #tpu.pipeline_mode<synchronous>, transform_indices = @transform_2, window_bounds = array<i64: 1, 128>}, {pipeline_mode = #tpu.pipeline_mode<synchronous>, transform_indices = @transform_3, window_bounds = array<i64: 128, 1536>}, {pipeline_mode = #tpu.pipeline_mode<synchronous>, transform_indices = @transform_4, window_bounds = array<i64: 1, 1536>}, {pipeline_mode = #tpu.pipeline_mode<synchronous>, transform_indices = @transform_5, window_bounds = array<i64: 512, 128>}, {pipeline_mode = #tpu.pipeline_mode<synchronous>, transform_indices = @transform_6, window_bounds = array<i64: 1, 128>}, {pipeline_mode = #tpu.pipeline_mode<synchronous>, transform_indices = @transform_7, window_bounds = array<i64: 128, 128>}, {pipeline_mode = #tpu.pipeline_mode<synchronous>, transform_indices = @transform_8, window_bounds = array<i64: 1, 128>}, {pipeline_mode = #tpu.pipeline_mode<synchronous>, transform_indices = @transform_9, window_bounds = array<i64: 128, 128>}, {pipeline_mode = #tpu.pipeline_mode<synchronous>, transform_indices = @transform_10, window_bounds = array<i64: 1, 128>}, {transform_indices = @transform_11, window_bounds = array<i64: 1, 16, 128>}]} {
    %c0 = arith.constant 0 : index
    %c0_0 = arith.constant 0 : index
    %c0_1 = arith.constant 0 : index
    %0 = vector.load %arg1[%c0, %c0_0, %c0_1] : memref<1x16x128xf32, #tpu.memory_space<vmem>>, vector<1x16x128xf32>
    %1 = vector.shape_cast %0 : vector<1x16x128xf32> to vector<16x128xf32>
    %c0_2 = arith.constant 0 : index
    %c0_3 = arith.constant 0 : index
    %2 = vector.load %arg2[%c0_2, %c0_3] : memref<1x128xf32, #tpu.memory_space<vmem>>, vector<1x128xf32>
    %c0_4 = arith.constant 0 : index
    %c0_5 = arith.constant 0 : index
    %3 = vector.load %arg3[%c0_4, %c0_5] : memref<1x128xf32, #tpu.memory_space<vmem>>, vector<1x128xf32>
    %4 = tpu.iota {dimensions = array<i32: 1>} : vector<1x128xi32>
    %c32_i32 = arith.constant 32 : i32
    %5 = vector.broadcast %c32_i32 : i32 to vector<1x128xi32>
    %6 = arith.cmpi slt, %4, %5 : vector<1x128xi32>
    %7 = arith.extui %6 : vector<1x128xi1> to vector<1x128xi32>
    %8 = arith.sitofp %7 : vector<1x128xi32> to vector<1x128xf32>
    %cst = arith.constant dense<0.000000e+00> : vector<16xf32>
    %9 = vector.multi_reduction <add>, %1, %cst [1] : vector<16x128xf32> to vector<16xf32>
    %10 = vector.shape_cast %9 : vector<16xf32> to vector<16x1xf32>
    %cst_6 = arith.constant 3.125000e-02 : f32
    %11 = vector.broadcast %cst_6 : f32 to vector<16x1xf32>
    %12 = arith.mulf %10, %11 : vector<16x1xf32>
    %13 = vector.broadcast %12 : vector<16x1xf32> to vector<16x128xf32>
    %14 = arith.subf %1, %13 : vector<16x128xf32>
    %15 = vector.broadcast %8 : vector<1x128xf32> to vector<16x128xf32>
    %16 = arith.mulf %14, %15 : vector<16x128xf32>
    %17 = arith.mulf %16, %16 : vector<16x128xf32>
    %cst_7 = arith.constant dense<0.000000e+00> : vector<16xf32>
    %18 = vector.multi_reduction <add>, %17, %cst_7 [1] : vector<16x128xf32> to vector<16xf32>
    %19 = vector.shape_cast %18 : vector<16xf32> to vector<16x1xf32>
    %cst_8 = arith.constant 3.125000e-02 : f32
    %20 = vector.broadcast %cst_8 : f32 to vector<16x1xf32>
    %21 = arith.mulf %19, %20 : vector<16x1xf32>
    %cst_9 = arith.constant 9.99999974E-6 : f32
    %22 = vector.broadcast %cst_9 : f32 to vector<16x1xf32>
    %23 = arith.addf %21, %22 : vector<16x1xf32>
    %24 = math.rsqrt %23 : vector<16x1xf32>
    %25 = vector.broadcast %24 : vector<16x1xf32> to vector<16x128xf32>
    %26 = arith.mulf %16, %25 : vector<16x128xf32>
    %27 = vector.broadcast %2 : vector<1x128xf32> to vector<16x128xf32>
    %28 = arith.mulf %26, %27 : vector<16x128xf32>
    %29 = vector.broadcast %3 : vector<1x128xf32> to vector<16x128xf32>
    %30 = arith.addf %28, %29 : vector<16x128xf32>
    %c0_10 = arith.constant 0 : index
    %c0_11 = arith.constant 0 : index
    %31 = vector.load %arg4[%c0_10, %c0_11] : memref<128x1536xf32, #tpu.memory_space<vmem>>, vector<128x1536xf32>
    %cst_12 = arith.constant dense<0.000000e+00> : vector<16x1536xf32>
    %32 = tpu.matmul %30, %31, %cst_12 {dimension_numbers = #tpu.dot_dimension_numbers<[1], [0], [0], [1], [0, 0, 1, 1], [], []>} : vector<16x128xf32>, vector<128x1536xf32>, vector<16x1536xf32> -> vector<16x1536xf32>
    %c0_13 = arith.constant 0 : index
    %c0_14 = arith.constant 0 : index
    %33 = vector.load %arg5[%c0_13, %c0_14] : memref<1x1536xf32, #tpu.memory_space<vmem>>, vector<1x1536xf32>
    %34 = vector.broadcast %33 : vector<1x1536xf32> to vector<16x1536xf32>
    %35 = arith.addf %32, %34 : vector<16x1536xf32>
    %36 = vector.extract_strided_slice %35 {offsets = [0, 0], sizes = [16, 512], strides = [1, 1]} : vector<16x1536xf32> to vector<16x512xf32>
    %37 = vector.extract_strided_slice %35 {offsets = [0, 512], sizes = [16, 512], strides = [1, 1]} : vector<16x1536xf32> to vector<16x512xf32>
    %38 = vector.extract_strided_slice %35 {offsets = [0, 1024], sizes = [16, 512], strides = [1, 1]} : vector<16x1536xf32> to vector<16x512xf32>
    %39 = vector.extract_strided_slice %36 {offsets = [0, 0], sizes = [16, 128], strides = [1, 1]} : vector<16x512xf32> to vector<16x128xf32>
    %40 = vector.extract_strided_slice %37 {offsets = [0, 0], sizes = [16, 128], strides = [1, 1]} : vector<16x512xf32> to vector<16x128xf32>
    %41 = vector.extract_strided_slice %38 {offsets = [0, 0], sizes = [16, 128], strides = [1, 1]} : vector<16x512xf32> to vector<16x128xf32>
    %cst_15 = arith.constant dense<0.000000e+00> : vector<16x16xf32>
    %42 = tpu.matmul %39, %40, %cst_15 {dimension_numbers = #tpu.dot_dimension_numbers<[1], [1], [0], [0], [0, 0, 1, 0], [], []>} : vector<16x128xf32>, vector<16x128xf32>, vector<16x16xf32> -> vector<16x16xf32>
    %cst_16 = arith.constant dense<0xFF800000> : vector<16xf32>
    %43 = vector.multi_reduction <maximumf>, %42, %cst_16 [1] : vector<16x16xf32> to vector<16xf32>
    %44 = vector.shape_cast %43 : vector<16xf32> to vector<16x1xf32>
    %45 = vector.broadcast %44 : vector<16x1xf32> to vector<16x16xf32>
    %46 = arith.subf %42, %45 : vector<16x16xf32>
    %47 = math.exp %46 : vector<16x16xf32>
    %cst_17 = arith.constant dense<0.000000e+00> : vector<16xf32>
    %48 = vector.multi_reduction <add>, %47, %cst_17 [1] : vector<16x16xf32> to vector<16xf32>
    %49 = vector.shape_cast %48 : vector<16xf32> to vector<16x1xf32>
    %50 = tpu.reciprocal %49 {approx = true} : vector<16x1xf32> -> vector<16x1xf32>
    %51 = vector.broadcast %50 : vector<16x1xf32> to vector<16x16xf32>
    %52 = arith.mulf %47, %51 : vector<16x16xf32>
    %cst_18 = arith.constant dense<0.000000e+00> : vector<16x128xf32>
    %53 = tpu.matmul %52, %41, %cst_18 {dimension_numbers = #tpu.dot_dimension_numbers<[1], [0], [0], [1], [0, 0, 1, 1], [], []>} : vector<16x16xf32>, vector<16x128xf32>, vector<16x128xf32> -> vector<16x128xf32>
    %c0_19 = arith.constant 0 : index
    %c0_20 = arith.constant 0 : index
    %54 = vector.load %arg13[%c0_19, %c0_20] : memref<16x512xf32, #tpu.memory_space<vmem>>, vector<16x128xf32>
    tpu.vector_store %arg13[%c0_19, %c0_20], %53 {strides = array<i32>} : memref<16x512xf32, #tpu.memory_space<vmem>>, vector<16x128xf32>,
    %55 = vector.extract_strided_slice %36 {offsets = [0, 128], sizes = [16, 128], strides = [1, 1]} : vector<16x512xf32> to vector<16x128xf32>
    %56 = vector.extract_strided_slice %37 {offsets = [0, 128], sizes = [16, 128], strides = [1, 1]} : vector<16x512xf32> to vector<16x128xf32>
    %57 = vector.extract_strided_slice %38 {offsets = [0, 128], sizes = [16, 128], strides = [1, 1]} : vector<16x512xf32> to vector<16x128xf32>
    %cst_21 = arith.constant dense<0.000000e+00> : vector<16x16xf32>
    %58 = tpu.matmul %55, %56, %cst_21 {dimension_numbers = #tpu.dot_dimension_numbers<[1], [1], [0], [0], [0, 0, 1, 0], [], []>} : vector<16x128xf32>, vector<16x128xf32>, vector<16x16xf32> -> vector<16x16xf32>
    %cst_22 = arith.constant dense<0xFF800000> : vector<16xf32>
    %59 = vector.multi_reduction <maximumf>, %58, %cst_22 [1] : vector<16x16xf32> to vector<16xf32>
    %60 = vector.shape_cast %59 : vector<16xf32> to vector<16x1xf32>
    %61 = vector.broadcast %60 : vector<16x1xf32> to vector<16x16xf32>
    %62 = arith.subf %58, %61 : vector<16x16xf32>
    %63 = math.exp %62 : vector<16x16xf32>
    %cst_23 = arith.constant dense<0.000000e+00> : vector<16xf32>
    %64 = vector.multi_reduction <add>, %63, %cst_23 [1] : vector<16x16xf32> to vector<16xf32>
    %65 = vector.shape_cast %64 : vector<16xf32> to vector<16x1xf32>
    %66 = tpu.reciprocal %65 {approx = true} : vector<16x1xf32> -> vector<16x1xf32>
    %67 = vector.broadcast %66 : vector<16x1xf32> to vector<16x16xf32>
    %68 = arith.mulf %63, %67 : vector<16x16xf32>
    %cst_24 = arith.constant dense<0.000000e+00> : vector<16x128xf32>
    %69 = tpu.matmul %68, %57, %cst_24 {dimension_numbers = #tpu.dot_dimension_numbers<[1], [0], [0], [1], [0, 0, 1, 1], [], []>} : vector<16x16xf32>, vector<16x128xf32>, vector<16x128xf32> -> vector<16x128xf32>
    %c0_25 = arith.constant 0 : index
    %c128 = arith.constant 128 : index
    %70 = vector.load %arg13[%c0_25, %c128] : memref<16x512xf32, #tpu.memory_space<vmem>>, vector<16x128xf32>
    tpu.vector_store %arg13[%c0_25, %c128], %69 {strides = array<i32>} : memref<16x512xf32, #tpu.memory_space<vmem>>, vector<16x128xf32>,
    %71 = vector.extract_strided_slice %36 {offsets = [0, 256], sizes = [16, 128], strides = [1, 1]} : vector<16x512xf32> to vector<16x128xf32>
    %72 = vector.extract_strided_slice %37 {offsets = [0, 256], sizes = [16, 128], strides = [1, 1]} : vector<16x512xf32> to vector<16x128xf32>
    %73 = vector.extract_strided_slice %38 {offsets = [0, 256], sizes = [16, 128], strides = [1, 1]} : vector<16x512xf32> to vector<16x128xf32>
    %cst_26 = arith.constant dense<0.000000e+00> : vector<16x16xf32>
    %74 = tpu.matmul %71, %72, %cst_26 {dimension_numbers = #tpu.dot_dimension_numbers<[1], [1], [0], [0], [0, 0, 1, 0], [], []>} : vector<16x128xf32>, vector<16x128xf32>, vector<16x16xf32> -> vector<16x16xf32>
    %cst_27 = arith.constant dense<0xFF800000> : vector<16xf32>
    %75 = vector.multi_reduction <maximumf>, %74, %cst_27 [1] : vector<16x16xf32> to vector<16xf32>
    %76 = vector.shape_cast %75 : vector<16xf32> to vector<16x1xf32>
    %77 = vector.broadcast %76 : vector<16x1xf32> to vector<16x16xf32>
    %78 = arith.subf %74, %77 : vector<16x16xf32>
    %79 = math.exp %78 : vector<16x16xf32>
    %cst_28 = arith.constant dense<0.000000e+00> : vector<16xf32>
    %80 = vector.multi_reduction <add>, %79, %cst_28 [1] : vector<16x16xf32> to vector<16xf32>
    %81 = vector.shape_cast %80 : vector<16xf32> to vector<16x1xf32>
    %82 = tpu.reciprocal %81 {approx = true} : vector<16x1xf32> -> vector<16x1xf32>
    %83 = vector.broadcast %82 : vector<16x1xf32> to vector<16x16xf32>
    %84 = arith.mulf %79, %83 : vector<16x16xf32>
    %cst_29 = arith.constant dense<0.000000e+00> : vector<16x128xf32>
    %85 = tpu.matmul %84, %73, %cst_29 {dimension_numbers = #tpu.dot_dimension_numbers<[1], [0], [0], [1], [0, 0, 1, 1], [], []>} : vector<16x16xf32>, vector<16x128xf32>, vector<16x128xf32> -> vector<16x128xf32>
    %c0_30 = arith.constant 0 : index
    %c256 = arith.constant 256 : index
    %86 = vector.load %arg13[%c0_30, %c256] : memref<16x512xf32, #tpu.memory_space<vmem>>, vector<16x128xf32>
    tpu.vector_store %arg13[%c0_30, %c256], %85 {strides = array<i32>} : memref<16x512xf32, #tpu.memory_space<vmem>>, vector<16x128xf32>,
    %87 = vector.extract_strided_slice %36 {offsets = [0, 384], sizes = [16, 128], strides = [1, 1]} : vector<16x512xf32> to vector<16x128xf32>
    %88 = vector.extract_strided_slice %37 {offsets = [0, 384], sizes = [16, 128], strides = [1, 1]} : vector<16x512xf32> to vector<16x128xf32>
    %89 = vector.extract_strided_slice %38 {offsets = [0, 384], sizes = [16, 128], strides = [1, 1]} : vector<16x512xf32> to vector<16x128xf32>
    %cst_31 = arith.constant dense<0.000000e+00> : vector<16x16xf32>
    %90 = tpu.matmul %87, %88, %cst_31 {dimension_numbers = #tpu.dot_dimension_numbers<[1], [1], [0], [0], [0, 0, 1, 0], [], []>} : vector<16x128xf32>, vector<16x128xf32>, vector<16x16xf32> -> vector<16x16xf32>
    %cst_32 = arith.constant dense<0xFF800000> : vector<16xf32>
    %91 = vector.multi_reduction <maximumf>, %90, %cst_32 [1] : vector<16x16xf32> to vector<16xf32>
    %92 = vector.shape_cast %91 : vector<16xf32> to vector<16x1xf32>
    %93 = vector.broadcast %92 : vector<16x1xf32> to vector<16x16xf32>
    %94 = arith.subf %90, %93 : vector<16x16xf32>
    %95 = math.exp %94 : vector<16x16xf32>
    %cst_33 = arith.constant dense<0.000000e+00> : vector<16xf32>
    %96 = vector.multi_reduction <add>, %95, %cst_33 [1] : vector<16x16xf32> to vector<16xf32>
    %97 = vector.shape_cast %96 : vector<16xf32> to vector<16x1xf32>
    %98 = tpu.reciprocal %97 {approx = true} : vector<16x1xf32> -> vector<16x1xf32>
    %99 = vector.broadcast %98 : vector<16x1xf32> to vector<16x16xf32>
    %100 = arith.mulf %95, %99 : vector<16x16xf32>
    %cst_34 = arith.constant dense<0.000000e+00> : vector<16x128xf32>
    %101 = tpu.matmul %100, %89, %cst_34 {dimension_numbers = #tpu.dot_dimension_numbers<[1], [0], [0], [1], [0, 0, 1, 1], [], []>} : vector<16x16xf32>, vector<16x128xf32>, vector<16x128xf32> -> vector<16x128xf32>
    %c0_35 = arith.constant 0 : index
    %c384 = arith.constant 384 : index
    %102 = vector.load %arg13[%c0_35, %c384] : memref<16x512xf32, #tpu.memory_space<vmem>>, vector<16x128xf32>
    tpu.vector_store %arg13[%c0_35, %c384], %101 {strides = array<i32>} : memref<16x512xf32, #tpu.memory_space<vmem>>, vector<16x128xf32>,
    %c0_36 = arith.constant 0 : index
    %c0_37 = arith.constant 0 : index
    %103 = vector.load %arg13[%c0_36, %c0_37] : memref<16x512xf32, #tpu.memory_space<vmem>>, vector<16x512xf32>
    %c0_38 = arith.constant 0 : index
    %c0_39 = arith.constant 0 : index
    %104 = vector.load %arg6[%c0_38, %c0_39] : memref<512x128xf32, #tpu.memory_space<vmem>>, vector<512x128xf32>
    %cst_40 = arith.constant dense<0.000000e+00> : vector<16x128xf32>
    %105 = tpu.matmul %103, %104, %cst_40 {dimension_numbers = #tpu.dot_dimension_numbers<[1], [0], [0], [1], [0, 0, 1, 1], [], []>} : vector<16x512xf32>, vector<512x128xf32>, vector<16x128xf32> -> vector<16x128xf32>
    %c0_41 = arith.constant 0 : index
    %c0_42 = arith.constant 0 : index
    %106 = vector.load %arg7[%c0_41, %c0_42] : memref<1x128xf32, #tpu.memory_space<vmem>>, vector<1x128xf32>
    %107 = vector.broadcast %106 : vector<1x128xf32> to vector<16x128xf32>
    %108 = arith.addf %105, %107 : vector<16x128xf32>
    %109 = arith.addf %108, %1 : vector<16x128xf32>
    %cst_43 = arith.constant dense<0.000000e+00> : vector<16xf32>
    %110 = vector.multi_reduction <add>, %109, %cst_43 [1] : vector<16x128xf32> to vector<16xf32>
    %111 = vector.shape_cast %110 : vector<16xf32> to vector<16x1xf32>
    %cst_44 = arith.constant 3.125000e-02 : f32
    %112 = vector.broadcast %cst_44 : f32 to vector<16x1xf32>
    %113 = arith.mulf %111, %112 : vector<16x1xf32>
    %114 = vector.broadcast %113 : vector<16x1xf32> to vector<16x128xf32>
    %115 = arith.subf %109, %114 : vector<16x128xf32>
    %116 = vector.broadcast %8 : vector<1x128xf32> to vector<16x128xf32>
    %117 = arith.mulf %115, %116 : vector<16x128xf32>
    %118 = arith.mulf %117, %117 : vector<16x128xf32>
    %cst_45 = arith.constant dense<0.000000e+00> : vector<16xf32>
    %119 = vector.multi_reduction <add>, %118, %cst_45 [1] : vector<16x128xf32> to vector<16xf32>
    %120 = vector.shape_cast %119 : vector<16xf32> to vector<16x1xf32>
    %cst_46 = arith.constant 3.125000e-02 : f32
    %121 = vector.broadcast %cst_46 : f32 to vector<16x1xf32>
    %122 = arith.mulf %120, %121 : vector<16x1xf32>
    %cst_47 = arith.constant 9.99999974E-6 : f32
    %123 = vector.broadcast %cst_47 : f32 to vector<16x1xf32>
    %124 = arith.addf %122, %123 : vector<16x1xf32>
    %125 = math.rsqrt %124 : vector<16x1xf32>
    %126 = vector.broadcast %125 : vector<16x1xf32> to vector<16x128xf32>
    %127 = arith.mulf %117, %126 : vector<16x128xf32>
    %128 = vector.broadcast %2 : vector<1x128xf32> to vector<16x128xf32>
    %129 = arith.mulf %127, %128 : vector<16x128xf32>
    %130 = vector.broadcast %3 : vector<1x128xf32> to vector<16x128xf32>
    %131 = arith.addf %129, %130 : vector<16x128xf32>
    %c0_48 = arith.constant 0 : index
    %c0_49 = arith.constant 0 : index
    %132 = vector.load %arg8[%c0_48, %c0_49] : memref<128x128xf32, #tpu.memory_space<vmem>>, vector<128x128xf32>
    %cst_50 = arith.constant dense<0.000000e+00> : vector<16x128xf32>
    %133 = tpu.matmul %131, %132, %cst_50 {dimension_numbers = #tpu.dot_dimension_numbers<[1], [0], [0], [1], [0, 0, 1, 1], [], []>} : vector<16x128xf32>, vector<128x128xf32>, vector<16x128xf32> -> vector<16x128xf32>
    %c0_51 = arith.constant 0 : index
    %c0_52 = arith.constant 0 : index
    %134 = vector.load %arg9[%c0_51, %c0_52] : memref<1x128xf32, #tpu.memory_space<vmem>>, vector<1x128xf32>
    %135 = vector.broadcast %134 : vector<1x128xf32> to vector<16x128xf32>
    %136 = arith.addf %133, %135 : vector<16x128xf32>
    %cst_53 = arith.constant 5.000000e-01 : f32
    %137 = vector.broadcast %cst_53 : f32 to vector<16x128xf32>
    %138 = arith.mulf %136, %137 : vector<16x128xf32>
    %cst_54 = arith.constant 0.707106769 : f32
    %139 = vector.broadcast %cst_54 : f32 to vector<16x128xf32>
    %140 = arith.mulf %136, %139 : vector<16x128xf32>
    %141 = math.erf %140 : vector<16x128xf32>
    %cst_55 = arith.constant 1.000000e+00 : f32
    %142 = vector.broadcast %cst_55 : f32 to vector<16x128xf32>
    %143 = arith.addf %142, %141 : vector<16x128xf32>
    %144 = arith.mulf %138, %143 : vector<16x128xf32>
    %c0_56 = arith.constant 0 : index
    %c0_57 = arith.constant 0 : index
    %145 = vector.load %arg10[%c0_56, %c0_57] : memref<128x128xf32, #tpu.memory_space<vmem>>, vector<128x128xf32>
    %cst_58 = arith.constant dense<0.000000e+00> : vector<16x128xf32>
    %146 = tpu.matmul %144, %145, %cst_58 {dimension_numbers = #tpu.dot_dimension_numbers<[1], [0], [0], [1], [0, 0, 1, 1], [], []>} : vector<16x128xf32>, vector<128x128xf32>, vector<16x128xf32> -> vector<16x128xf32>
    %c0_59 = arith.constant 0 : index
    %c0_60 = arith.constant 0 : index
    %147 = vector.load %arg11[%c0_59, %c0_60] : memref<1x128xf32, #tpu.memory_space<vmem>>, vector<1x128xf32>
    %148 = vector.broadcast %147 : vector<1x128xf32> to vector<16x128xf32>
    %149 = arith.addf %146, %148 : vector<16x128xf32>
    %150 = arith.addf %149, %109 : vector<16x128xf32>
    %c0_61 = arith.constant 0 : index
    %c0_62 = arith.constant 0 : index
    %c0_63 = arith.constant 0 : index
    %151 = vector.load %arg12[%c0_61, %c0_62, %c0_63] : memref<1x16x128xf32, #tpu.memory_space<vmem>>, vector<1x16x128xf32>
    %152 = vector.shape_cast %151 : vector<1x16x128xf32> to vector<16x128xf32>
    %153 = vector.shape_cast %150 : vector<16x128xf32> to vector<1x16x128xf32>
    tpu.vector_store %arg12[%c0_61, %c0_62, %c0_63], %153 {strides = array<i32>} : memref<1x16x128xf32, #tpu.memory_space<vmem>>, vector<1x16x128xf32>,
    return
  }
  func.func @transform_0(%arg0: i32) -> (i32, i32, i32) {
    %c0_i32 = arith.constant 0 : i32
    %c0_i32_0 = arith.constant 0 : i32
    %c0_i32_1 = arith.constant 0 : i32
    return %arg0, %c0_i32, %c0_i32_0 : i32, i32, i32
  }
  func.func @transform_1(%arg0: i32) -> (i32, i32) {
    %c0_i32 = arith.constant 0 : i32
    %c0_i32_0 = arith.constant 0 : i32
    %c0_i32_1 = arith.constant 0 : i32
    return %c0_i32, %c0_i32_0 : i32, i32
  }
  func.func @transform_2(%arg0: i32) -> (i32, i32) {
    %c0_i32 = arith.constant 0 : i32
    %c0_i32_0 = arith.constant 0 : i32
    %c0_i32_1 = arith.constant 0 : i32
    return %c0_i32, %c0_i32_0 : i32, i32
  }
  func.func @transform_3(%arg0: i32) -> (i32, i32) {
    %c0_i32 = arith.constant 0 : i32
    %c0_i32_0 = arith.constant 0 : i32
    %c0_i32_1 = arith.constant 0 : i32
    return %c0_i32, %c0_i32_0 : i32, i32
  }
  func.func @transform_4(%arg0: i32) -> (i32, i32) {
    %c0_i32 = arith.constant 0 : i32
    %c0_i32_0 = arith.constant 0 : i32
    %c0_i32_1 = arith.constant 0 : i32
    return %c0_i32, %c0_i32_0 : i32, i32
  }
  func.func @transform_5(%arg0: i32) -> (i32, i32) {
    %c0_i32 = arith.constant 0 : i32
    %c0_i32_0 = arith.constant 0 : i32
    %c0_i32_1 = arith.constant 0 : i32
    return %c0_i32, %c0_i32_0 : i32, i32
  }
  func.func @transform_6(%arg0: i32) -> (i32, i32) {
    %c0_i32 = arith.constant 0 : i32
    %c0_i32_0 = arith.constant 0 : i32
    %c0_i32_1 = arith.constant 0 : i32
    return %c0_i32, %c0_i32_0 : i32, i32
  }
  func.func @transform_7(%arg0: i32) -> (i32, i32) {
    %c0_i32 = arith.constant 0 : i32
    %c0_i32_0 = arith.constant 0 : i32
    %c0_i32_1 = arith.constant 0 : i32
    return %c0_i32, %c0_i32_0 : i32, i32
  }
  func.func @transform_8(%arg0: i32) -> (i32, i32) {
    %c0_i32 = arith.constant 0 : i32
    %c0_i32_0 = arith.constant 0 : i32
    %c0_i32_1 = arith.constant 0 : i32
    return %c0_i32, %c0_i32_0 : i32, i32
  }
  func.func @transform_9(%arg0: i32) -> (i32, i32) {
    %c0_i32 = arith.constant 0 : i32
    %c0_i32_0 = arith.constant 0 : i32
    %c0_i32_1 = arith.constant 0 : i32
    return %c0_i32, %c0_i32_0 : i32, i32
  }
  func.func @transform_10(%arg0: i32) -> (i32, i32) {
    %c0_i32 = arith.constant 0 : i32
    %c0_i32_0 = arith.constant 0 : i32
    %c0_i32_1 = arith.constant 0 : i32
    return %c0_i32, %c0_i32_0 : i32, i32
  }
  func.func @transform_11(%arg0: i32) -> (i32, i32, i32) {
    %c0_i32 = arith.constant 0 : i32
    %c0_i32_0 = arith.constant 0 : i32
    %c0_i32_1 = arith.constant 0 : i32
    return %arg0, %c0_i32, %c0_i32_0 : i32, i32, i32
  }
}

module attributes {stable_mosaic.version = 11 : i64} {
  func.func @encoder_kernel(%arg0: i32, %arg1: memref<1x16x128xf32, #tpu.memory_space<vmem>>, %arg2: memref<1x128xf32, #tpu.memory_space<vmem>>, %arg3: memref<1x128xf32, #tpu.memory_space<vmem>>, %arg4: memref<128x1536xf32, #tpu.memory_space<vmem>>, %arg5: memref<1x1536xf32, #tpu.memory_space<vmem>>, %arg6: memref<512x128xf32, #tpu.memory_space<vmem>>, %arg7: memref<1x128xf32, #tpu.memory_space<vmem>>, %arg8: memref<128x128xf32, #tpu.memory_space<vmem>>, %arg9: memref<1x128xf32, #tpu.memory_space<vmem>>, %arg10: memref<128x128xf32, #tpu.memory_space<vmem>>, %arg11: memref<1x128xf32, #tpu.memory_space<vmem>>, %arg12: memref<1x16x128xf32, #tpu.memory_space<vmem>>, %arg13: memref<16x512xf32, #tpu.memory_space<vmem>>) attributes {dimension_semantics = [#tpu.dimension_semantics<parallel>], iteration_bounds = array<i64: 2>, scalar_prefetch = 0 : i64, scratch_operands = 1 : i64, tpu.core_type = #tpu.core_type<tc>, window_params = [{transform_indices = @transform_0, window_bounds = array<i64: 1, 16, 128>}, {pipeline_mode = #tpu.pipeline_mode<synchronous>, transform_indices = @transform_1, window_bounds = array<i64: 1, 128>}, {pipeline_mode = #tpu.pipeline_mode<synchronous>, transform_indices = @transform_2, window_bounds = array<i64: 1, 128>}, {pipeline_mode = #tpu.pipeline_mode<synchronous>, transform_indices = @transform_3, window_bounds = array<i64: 128, 1536>}, {pipeline_mode = #tpu.pipeline_mode<synchronous>, transform_indices = @transform_4, window_bounds = array<i64: 1, 1536>}, {pipeline_mode = #tpu.pipeline_mode<synchronous>, transform_indices = @transform_5, window_bounds = array<i64: 512, 128>}, {pipeline_mode = #tpu.pipeline_mode<synchronous>, transform_indices = @transform_6, window_bounds = array<i64: 1, 128>}, {pipeline_mode = #tpu.pipeline_mode<synchronous>, transform_indices = @transform_7, window_bounds = array<i64: 128, 128>}, {pipeline_mode = #tpu.pipeline_mode<synchronous>, transform_indices = @transform_8, window_bounds = array<i64: 1, 128>}, {pipeline_mode = #tpu.pipeline_mode<synchronous>, transform_indices = @transform_9, window_bounds = array<i64: 128, 128>}, {pipeline_mode = #tpu.pipeline_mode<synchronous>, transform_indices = @transform_10, window_bounds = array<i64: 1, 128>}, {transform_indices = @transform_11, window_bounds = array<i64: 1, 16, 128>}]} {
    %c0 = arith.constant 0 : index
    %c0_0 = arith.constant 0 : index
    %c0_1 = arith.constant 0 : index
    %0 = vector.load %arg1[%c0, %c0_0, %c0_1] : memref<1x16x128xf32, #tpu.memory_space<vmem>>, vector<1x16x128xf32>
    %1 = vector.shape_cast %0 : vector<1x16x128xf32> to vector<16x128xf32>
    %c0_2 = arith.constant 0 : index
    %c0_3 = arith.constant 0 : index
    %2 = vector.load %arg2[%c0_2, %c0_3] : memref<1x128xf32, #tpu.memory_space<vmem>>, vector<1x128xf32>
    %c0_4 = arith.constant 0 : index
    %c0_5 = arith.constant 0 : index
    %3 = vector.load %arg3[%c0_4, %c0_5] : memref<1x128xf32, #tpu.memory_space<vmem>>, vector<1x128xf32>
    %4 = tpu.iota {dimensions = array<i32: 1>} : vector<1x128xi32>
    %c32_i32 = arith.constant 32 : i32
    %5 = vector.broadcast %c32_i32 : i32 to vector<1x128xi32>
    %6 = arith.cmpi slt, %4, %5 : vector<1x128xi32>
    %7 = arith.extui %6 : vector<1x128xi1> to vector<1x128xi32>
    %8 = arith.sitofp %7 : vector<1x128xi32> to vector<1x128xf32>
    %cst = arith.constant dense<0.000000e+00> : vector<16xf32>
    %9 = vector.multi_reduction <add>, %1, %cst [1] : vector<16x128xf32> to vector<16xf32>
    %10 = vector.shape_cast %9 : vector<16xf32> to vector<16x1xf32>
    %cst_6 = arith.constant 3.125000e-02 : f32
    %11 = vector.broadcast %cst_6 : f32 to vector<16x1xf32>
    %12 = arith.mulf %10, %11 : vector<16x1xf32>
    %13 = vector.broadcast %12 : vector<16x1xf32> to vector<16x128xf32>
    %14 = arith.subf %1, %13 : vector<16x128xf32>
    %15 = vector.broadcast %8 : vector<1x128xf32> to vector<16x128xf32>
    %16 = arith.mulf %14, %15 : vector<16x128xf32>
    %17 = arith.mulf %16, %16 : vector<16x128xf32>
    %cst_7 = arith.constant dense<0.000000e+00> : vector<16xf32>
    %18 = vector.multi_reduction <add>, %17, %cst_7 [1] : vector<16x128xf32> to vector<16xf32>
    %19 = vector.shape_cast %18 : vector<16xf32> to vector<16x1xf32>
    %cst_8 = arith.constant 3.125000e-02 : f32
    %20 = vector.broadcast %cst_8 : f32 to vector<16x1xf32>
    %21 = arith.mulf %19, %20 : vector<16x1xf32>
    %cst_9 = arith.constant 9.99999974E-6 : f32
    %22 = vector.broadcast %cst_9 : f32 to vector<16x1xf32>
    %23 = arith.addf %21, %22 : vector<16x1xf32>
    %24 = math.rsqrt %23 : vector<16x1xf32>
    %25 = vector.broadcast %24 : vector<16x1xf32> to vector<16x128xf32>
    %26 = arith.mulf %16, %25 : vector<16x128xf32>
    %27 = vector.broadcast %2 : vector<1x128xf32> to vector<16x128xf32>
    %28 = arith.mulf %26, %27 : vector<16x128xf32>
    %29 = vector.broadcast %3 : vector<1x128xf32> to vector<16x128xf32>
    %30 = arith.addf %28, %29 : vector<16x128xf32>
    %c0_10 = arith.constant 0 : index
    %c0_11 = arith.constant 0 : index
    %31 = vector.load %arg4[%c0_10, %c0_11] : memref<128x1536xf32, #tpu.memory_space<vmem>>, vector<128x1536xf32>
    %cst_12 = arith.constant dense<0.000000e+00> : vector<16x1536xf32>
    %32 = tpu.matmul %30, %31, %cst_12 {dimension_numbers = #tpu.dot_dimension_numbers<[1], [0], [0], [1], [0, 0, 1, 1], [], []>} : vector<16x128xf32>, vector<128x1536xf32>, vector<16x1536xf32> -> vector<16x1536xf32>
    %c0_13 = arith.constant 0 : index
    %c0_14 = arith.constant 0 : index
    %33 = vector.load %arg5[%c0_13, %c0_14] : memref<1x1536xf32, #tpu.memory_space<vmem>>, vector<1x1536xf32>
    %34 = vector.broadcast %33 : vector<1x1536xf32> to vector<16x1536xf32>
    %35 = arith.addf %32, %34 : vector<16x1536xf32>
    %36 = vector.extract_strided_slice %35 {offsets = [0, 0], sizes = [16, 512], strides = [1, 1]} : vector<16x1536xf32> to vector<16x512xf32>
    %37 = vector.extract_strided_slice %35 {offsets = [0, 512], sizes = [16, 512], strides = [1, 1]} : vector<16x1536xf32> to vector<16x512xf32>
    %38 = vector.extract_strided_slice %35 {offsets = [0, 1024], sizes = [16, 512], strides = [1, 1]} : vector<16x1536xf32> to vector<16x512xf32>
    %39 = vector.extract_strided_slice %36 {offsets = [0, 0], sizes = [16, 128], strides = [1, 1]} : vector<16x512xf32> to vector<16x128xf32>
    %40 = vector.extract_strided_slice %37 {offsets = [0, 0], sizes = [16, 128], strides = [1, 1]} : vector<16x512xf32> to vector<16x128xf32>
    %41 = vector.extract_strided_slice %38 {offsets = [0, 0], sizes = [16, 128], strides = [1, 1]} : vector<16x512xf32> to vector<16x128xf32>
    %cst_15 = arith.constant dense<0.000000e+00> : vector<16x16xf32>
    %42 = tpu.matmul %39, %40, %cst_15 {dimension_numbers = #tpu.dot_dimension_numbers<[1], [1], [0], [0], [0, 0, 1, 0], [], []>} : vector<16x128xf32>, vector<16x128xf32>, vector<16x16xf32> -> vector<16x16xf32>
    %cst_16 = arith.constant dense<0xFF800000> : vector<16xf32>
    %43 = vector.multi_reduction <maximumf>, %42, %cst_16 [1] : vector<16x16xf32> to vector<16xf32>
    %44 = vector.shape_cast %43 : vector<16xf32> to vector<16x1xf32>
    %45 = vector.broadcast %44 : vector<16x1xf32> to vector<16x16xf32>
    %46 = arith.subf %42, %45 : vector<16x16xf32>
    %47 = math.exp %46 : vector<16x16xf32>
    %cst_17 = arith.constant dense<0.000000e+00> : vector<16xf32>
    %48 = vector.multi_reduction <add>, %47, %cst_17 [1] : vector<16x16xf32> to vector<16xf32>
    %49 = vector.shape_cast %48 : vector<16xf32> to vector<16x1xf32>
    %50 = tpu.reciprocal %49 {approx = true} : vector<16x1xf32> -> vector<16x1xf32>
    %51 = vector.broadcast %50 : vector<16x1xf32> to vector<16x16xf32>
    %52 = arith.mulf %47, %51 : vector<16x16xf32>
    %cst_18 = arith.constant dense<0.000000e+00> : vector<16x128xf32>
    %53 = tpu.matmul %52, %41, %cst_18 {dimension_numbers = #tpu.dot_dimension_numbers<[1], [0], [0], [1], [0, 0, 1, 1], [], []>} : vector<16x16xf32>, vector<16x128xf32>, vector<16x128xf32> -> vector<16x128xf32>
    %c0_19 = arith.constant 0 : index
    %c0_20 = arith.constant 0 : index
    %54 = vector.load %arg13[%c0_19, %c0_20] : memref<16x512xf32, #tpu.memory_space<vmem>>, vector<16x128xf32>
    tpu.vector_store %arg13[%c0_19, %c0_20], %53 {strides = array<i32>} : memref<16x512xf32, #tpu.memory_space<vmem>>, vector<16x128xf32>,
    %55 = vector.extract_strided_slice %36 {offsets = [0, 128], sizes = [16, 128], strides = [1, 1]} : vector<16x512xf32> to vector<16x128xf32>
    %56 = vector.extract_strided_slice %37 {offsets = [0, 128], sizes = [16, 128], strides = [1, 1]} : vector<16x512xf32> to vector<16x128xf32>
    %57 = vector.extract_strided_slice %38 {offsets = [0, 128], sizes = [16, 128], strides = [1, 1]} : vector<16x512xf32> to vector<16x128xf32>
    %cst_21 = arith.constant dense<0.000000e+00> : vector<16x16xf32>
    %58 = tpu.matmul %55, %56, %cst_21 {dimension_numbers = #tpu.dot_dimension_numbers<[1], [1], [0], [0], [0, 0, 1, 0], [], []>} : vector<16x128xf32>, vector<16x128xf32>, vector<16x16xf32> -> vector<16x16xf32>
    %cst_22 = arith.constant dense<0xFF800000> : vector<16xf32>
    %59 = vector.multi_reduction <maximumf>, %58, %cst_22 [1] : vector<16x16xf32> to vector<16xf32>
    %60 = vector.shape_cast %59 : vector<16xf32> to vector<16x1xf32>
    %61 = vector.broadcast %60 : vector<16x1xf32> to vector<16x16xf32>
    %62 = arith.subf %58, %61 : vector<16x16xf32>
    %63 = math.exp %62 : vector<16x16xf32>
    %cst_23 = arith.constant dense<0.000000e+00> : vector<16xf32>
    %64 = vector.multi_reduction <add>, %63, %cst_23 [1] : vector<16x16xf32> to vector<16xf32>
    %65 = vector.shape_cast %64 : vector<16xf32> to vector<16x1xf32>
    %66 = tpu.reciprocal %65 {approx = true} : vector<16x1xf32> -> vector<16x1xf32>
    %67 = vector.broadcast %66 : vector<16x1xf32> to vector<16x16xf32>
    %68 = arith.mulf %63, %67 : vector<16x16xf32>
    %cst_24 = arith.constant dense<0.000000e+00> : vector<16x128xf32>
    %69 = tpu.matmul %68, %57, %cst_24 {dimension_numbers = #tpu.dot_dimension_numbers<[1], [0], [0], [1], [0, 0, 1, 1], [], []>} : vector<16x16xf32>, vector<16x128xf32>, vector<16x128xf32> -> vector<16x128xf32>
    %c0_25 = arith.constant 0 : index
    %c128 = arith.constant 128 : index
    %70 = vector.load %arg13[%c0_25, %c128] : memref<16x512xf32, #tpu.memory_space<vmem>>, vector<16x128xf32>
    tpu.vector_store %arg13[%c0_25, %c128], %69 {strides = array<i32>} : memref<16x512xf32, #tpu.memory_space<vmem>>, vector<16x128xf32>,
    %71 = vector.extract_strided_slice %36 {offsets = [0, 256], sizes = [16, 128], strides = [1, 1]} : vector<16x512xf32> to vector<16x128xf32>
    %72 = vector.extract_strided_slice %37 {offsets = [0, 256], sizes = [16, 128], strides = [1, 1]} : vector<16x512xf32> to vector<16x128xf32>
    %73 = vector.extract_strided_slice %38 {offsets = [0, 256], sizes = [16, 128], strides = [1, 1]} : vector<16x512xf32> to vector<16x128xf32>
    %cst_26 = arith.constant dense<0.000000e+00> : vector<16x16xf32>
    %74 = tpu.matmul %71, %72, %cst_26 {dimension_numbers = #tpu.dot_dimension_numbers<[1], [1], [0], [0], [0, 0, 1, 0], [], []>} : vector<16x128xf32>, vector<16x128xf32>, vector<16x16xf32> -> vector<16x16xf32>
    %cst_27 = arith.constant dense<0xFF800000> : vector<16xf32>
    %75 = vector.multi_reduction <maximumf>, %74, %cst_27 [1] : vector<16x16xf32> to vector<16xf32>
    %76 = vector.shape_cast %75 : vector<16xf32> to vector<16x1xf32>
    %77 = vector.broadcast %76 : vector<16x1xf32> to vector<16x16xf32>
    %78 = arith.subf %74, %77 : vector<16x16xf32>
    %79 = math.exp %78 : vector<16x16xf32>
    %cst_28 = arith.constant dense<0.000000e+00> : vector<16xf32>
    %80 = vector.multi_reduction <add>, %79, %cst_28 [1] : vector<16x16xf32> to vector<16xf32>
    %81 = vector.shape_cast %80 : vector<16xf32> to vector<16x1xf32>
    %82 = tpu.reciprocal %81 {approx = true} : vector<16x1xf32> -> vector<16x1xf32>
    %83 = vector.broadcast %82 : vector<16x1xf32> to vector<16x16xf32>
    %84 = arith.mulf %79, %83 : vector<16x16xf32>
    %cst_29 = arith.constant dense<0.000000e+00> : vector<16x128xf32>
    %85 = tpu.matmul %84, %73, %cst_29 {dimension_numbers = #tpu.dot_dimension_numbers<[1], [0], [0], [1], [0, 0, 1, 1], [], []>} : vector<16x16xf32>, vector<16x128xf32>, vector<16x128xf32> -> vector<16x128xf32>
    %c0_30 = arith.constant 0 : index
    %c256 = arith.constant 256 : index
    %86 = vector.load %arg13[%c0_30, %c256] : memref<16x512xf32, #tpu.memory_space<vmem>>, vector<16x128xf32>
    tpu.vector_store %arg13[%c0_30, %c256], %85 {strides = array<i32>} : memref<16x512xf32, #tpu.memory_space<vmem>>, vector<16x128xf32>,
    %87 = vector.extract_strided_slice %36 {offsets = [0, 384], sizes = [16, 128], strides = [1, 1]} : vector<16x512xf32> to vector<16x128xf32>
    %88 = vector.extract_strided_slice %37 {offsets = [0, 384], sizes = [16, 128], strides = [1, 1]} : vector<16x512xf32> to vector<16x128xf32>
    %89 = vector.extract_strided_slice %38 {offsets = [0, 384], sizes = [16, 128], strides = [1, 1]} : vector<16x512xf32> to vector<16x128xf32>
    %cst_31 = arith.constant dense<0.000000e+00> : vector<16x16xf32>
    %90 = tpu.matmul %87, %88, %cst_31 {dimension_numbers = #tpu.dot_dimension_numbers<[1], [1], [0], [0], [0, 0, 1, 0], [], []>} : vector<16x128xf32>, vector<16x128xf32>, vector<16x16xf32> -> vector<16x16xf32>
    %cst_32 = arith.constant dense<0xFF800000> : vector<16xf32>
    %91 = vector.multi_reduction <maximumf>, %90, %cst_32 [1] : vector<16x16xf32> to vector<16xf32>
    %92 = vector.shape_cast %91 : vector<16xf32> to vector<16x1xf32>
    %93 = vector.broadcast %92 : vector<16x1xf32> to vector<16x16xf32>
    %94 = arith.subf %90, %93 : vector<16x16xf32>
    %95 = math.exp %94 : vector<16x16xf32>
    %cst_33 = arith.constant dense<0.000000e+00> : vector<16xf32>
    %96 = vector.multi_reduction <add>, %95, %cst_33 [1] : vector<16x16xf32> to vector<16xf32>
    %97 = vector.shape_cast %96 : vector<16xf32> to vector<16x1xf32>
    %98 = tpu.reciprocal %97 {approx = true} : vector<16x1xf32> -> vector<16x1xf32>
    %99 = vector.broadcast %98 : vector<16x1xf32> to vector<16x16xf32>
    %100 = arith.mulf %95, %99 : vector<16x16xf32>
    %cst_34 = arith.constant dense<0.000000e+00> : vector<16x128xf32>
    %101 = tpu.matmul %100, %89, %cst_34 {dimension_numbers = #tpu.dot_dimension_numbers<[1], [0], [0], [1], [0, 0, 1, 1], [], []>} : vector<16x16xf32>, vector<16x128xf32>, vector<16x128xf32> -> vector<16x128xf32>
    %c0_35 = arith.constant 0 : index
    %c384 = arith.constant 384 : index
    %102 = vector.load %arg13[%c0_35, %c384] : memref<16x512xf32, #tpu.memory_space<vmem>>, vector<16x128xf32>
    tpu.vector_store %arg13[%c0_35, %c384], %101 {strides = array<i32>} : memref<16x512xf32, #tpu.memory_space<vmem>>, vector<16x128xf32>,
    %c0_36 = arith.constant 0 : index
    %c0_37 = arith.constant 0 : index
    %103 = vector.load %arg13[%c0_36, %c0_37] : memref<16x512xf32, #tpu.memory_space<vmem>>, vector<16x512xf32>
    %c0_38 = arith.constant 0 : index
    %c0_39 = arith.constant 0 : index
    %104 = vector.load %arg6[%c0_38, %c0_39] : memref<512x128xf32, #tpu.memory_space<vmem>>, vector<512x128xf32>
    %cst_40 = arith.constant dense<0.000000e+00> : vector<16x128xf32>
    %105 = tpu.matmul %103, %104, %cst_40 {dimension_numbers = #tpu.dot_dimension_numbers<[1], [0], [0], [1], [0, 0, 1, 1], [], []>} : vector<16x512xf32>, vector<512x128xf32>, vector<16x128xf32> -> vector<16x128xf32>
    %c0_41 = arith.constant 0 : index
    %c0_42 = arith.constant 0 : index
    %106 = vector.load %arg7[%c0_41, %c0_42] : memref<1x128xf32, #tpu.memory_space<vmem>>, vector<1x128xf32>
    %107 = vector.broadcast %106 : vector<1x128xf32> to vector<16x128xf32>
    %108 = arith.addf %105, %107 : vector<16x128xf32>
    %109 = arith.addf %108, %1 : vector<16x128xf32>
    %cst_43 = arith.constant dense<0.000000e+00> : vector<16xf32>
    %110 = vector.multi_reduction <add>, %109, %cst_43 [1] : vector<16x128xf32> to vector<16xf32>
    %111 = vector.shape_cast %110 : vector<16xf32> to vector<16x1xf32>
    %cst_44 = arith.constant 3.125000e-02 : f32
    %112 = vector.broadcast %cst_44 : f32 to vector<16x1xf32>
    %113 = arith.mulf %111, %112 : vector<16x1xf32>
    %114 = vector.broadcast %113 : vector<16x1xf32> to vector<16x128xf32>
    %115 = arith.subf %109, %114 : vector<16x128xf32>
    %116 = vector.broadcast %8 : vector<1x128xf32> to vector<16x128xf32>
    %117 = arith.mulf %115, %116 : vector<16x128xf32>
    %118 = arith.mulf %117, %117 : vector<16x128xf32>
    %cst_45 = arith.constant dense<0.000000e+00> : vector<16xf32>
    %119 = vector.multi_reduction <add>, %118, %cst_45 [1] : vector<16x128xf32> to vector<16xf32>
    %120 = vector.shape_cast %119 : vector<16xf32> to vector<16x1xf32>
    %cst_46 = arith.constant 3.125000e-02 : f32
    %121 = vector.broadcast %cst_46 : f32 to vector<16x1xf32>
    %122 = arith.mulf %120, %121 : vector<16x1xf32>
    %cst_47 = arith.constant 9.99999974E-6 : f32
    %123 = vector.broadcast %cst_47 : f32 to vector<16x1xf32>
    %124 = arith.addf %122, %123 : vector<16x1xf32>
    %125 = math.rsqrt %124 : vector<16x1xf32>
    %126 = vector.broadcast %125 : vector<16x1xf32> to vector<16x128xf32>
    %127 = arith.mulf %117, %126 : vector<16x128xf32>
    %128 = vector.broadcast %2 : vector<1x128xf32> to vector<16x128xf32>
    %129 = arith.mulf %127, %128 : vector<16x128xf32>
    %130 = vector.broadcast %3 : vector<1x128xf32> to vector<16x128xf32>
    %131 = arith.addf %129, %130 : vector<16x128xf32>
    %c0_48 = arith.constant 0 : index
    %c0_49 = arith.constant 0 : index
    %132 = vector.load %arg8[%c0_48, %c0_49] : memref<128x128xf32, #tpu.memory_space<vmem>>, vector<128x128xf32>
    %cst_50 = arith.constant dense<0.000000e+00> : vector<16x128xf32>
    %133 = tpu.matmul %131, %132, %cst_50 {dimension_numbers = #tpu.dot_dimension_numbers<[1], [0], [0], [1], [0, 0, 1, 1], [], []>} : vector<16x128xf32>, vector<128x128xf32>, vector<16x128xf32> -> vector<16x128xf32>
    %c0_51 = arith.constant 0 : index
    %c0_52 = arith.constant 0 : index
    %134 = vector.load %arg9[%c0_51, %c0_52] : memref<1x128xf32, #tpu.memory_space<vmem>>, vector<1x128xf32>
    %135 = vector.broadcast %134 : vector<1x128xf32> to vector<16x128xf32>
    %136 = arith.addf %133, %135 : vector<16x128xf32>
    %cst_53 = arith.constant 5.000000e-01 : f32
    %137 = vector.broadcast %cst_53 : f32 to vector<16x128xf32>
    %138 = arith.mulf %136, %137 : vector<16x128xf32>
    %cst_54 = arith.constant 0.707106769 : f32
    %139 = vector.broadcast %cst_54 : f32 to vector<16x128xf32>
    %140 = arith.mulf %136, %139 : vector<16x128xf32>
    %141 = math.erf %140 : vector<16x128xf32>
    %cst_55 = arith.constant 1.000000e+00 : f32
    %142 = vector.broadcast %cst_55 : f32 to vector<16x128xf32>
    %143 = arith.addf %142, %141 : vector<16x128xf32>
    %144 = arith.mulf %138, %143 : vector<16x128xf32>
    %c0_56 = arith.constant 0 : index
    %c0_57 = arith.constant 0 : index
    %145 = vector.load %arg10[%c0_56, %c0_57] : memref<128x128xf32, #tpu.memory_space<vmem>>, vector<128x128xf32>
    %cst_58 = arith.constant dense<0.000000e+00> : vector<16x128xf32>
    %146 = tpu.matmul %144, %145, %cst_58 {dimension_numbers = #tpu.dot_dimension_numbers<[1], [0], [0], [1], [0, 0, 1, 1], [], []>} : vector<16x128xf32>, vector<128x128xf32>, vector<16x128xf32> -> vector<16x128xf32>
    %c0_59 = arith.constant 0 : index
    %c0_60 = arith.constant 0 : index
    %147 = vector.load %arg11[%c0_59, %c0_60] : memref<1x128xf32, #tpu.memory_space<vmem>>, vector<1x128xf32>
    %148 = vector.broadcast %147 : vector<1x128xf32> to vector<16x128xf32>
    %149 = arith.addf %146, %148 : vector<16x128xf32>
    %150 = arith.addf %149, %109 : vector<16x128xf32>
    %c0_61 = arith.constant 0 : index
    %c0_62 = arith.constant 0 : index
    %c0_63 = arith.constant 0 : index
    %151 = vector.load %arg12[%c0_61, %c0_62, %c0_63] : memref<1x16x128xf32, #tpu.memory_space<vmem>>, vector<1x16x128xf32>
    %152 = vector.shape_cast %151 : vector<1x16x128xf32> to vector<16x128xf32>
    %153 = vector.shape_cast %150 : vector<16x128xf32> to vector<1x16x128xf32>
    tpu.vector_store %arg12[%c0_61, %c0_62, %c0_63], %153 {strides = array<i32>} : memref<1x16x128xf32, #tpu.memory_space<vmem>>, vector<1x16x128xf32>,
    return
  }
  func.func @transform_0(%arg0: i32) -> (i32, i32, i32) {
    %c0_i32 = arith.constant 0 : i32
    %c0_i32_0 = arith.constant 0 : i32
    %c0_i32_1 = arith.constant 0 : i32
    return %arg0, %c0_i32, %c0_i32_0 : i32, i32, i32
  }
  func.func @transform_1(%arg0: i32) -> (i32, i32) {
    %c0_i32 = arith.constant 0 : i32
    %c0_i32_0 = arith.constant 0 : i32
    %c0_i32_1 = arith.constant 0 : i32
    return %c0_i32, %c0_i32_0 : i32, i32
  }
  func.func @transform_2(%arg0: i32) -> (i32, i32) {
    %c0_i32 = arith.constant 0 : i32
    %c0_i32_0 = arith.constant 0 : i32
    %c0_i32_1 = arith.constant 0 : i32
    return %c0_i32, %c0_i32_0 : i32, i32
  }
  func.func @transform_3(%arg0: i32) -> (i32, i32) {
    %c0_i32 = arith.constant 0 : i32
    %c0_i32_0 = arith.constant 0 : i32
    %c0_i32_1 = arith.constant 0 : i32
    return %c0_i32, %c0_i32_0 : i32, i32
  }
  func.func @transform_4(%arg0: i32) -> (i32, i32) {
    %c0_i32 = arith.constant 0 : i32
    %c0_i32_0 = arith.constant 0 : i32
    %c0_i32_1 = arith.constant 0 : i32
    return %c0_i32, %c0_i32_0 : i32, i32
  }
  func.func @transform_5(%arg0: i32) -> (i32, i32) {
    %c0_i32 = arith.constant 0 : i32
    %c0_i32_0 = arith.constant 0 : i32
    %c0_i32_1 = arith.constant 0 : i32
    return %c0_i32, %c0_i32_0 : i32, i32
  }
  func.func @transform_6(%arg0: i32) -> (i32, i32) {
    %c0_i32 = arith.constant 0 : i32
    %c0_i32_0 = arith.constant 0 : i32
    %c0_i32_1 = arith.constant 0 : i32
    return %c0_i32, %c0_i32_0 : i32, i32
  }
  func.func @transform_7(%arg0: i32) -> (i32, i32) {
    %c0_i32 = arith.constant 0 : i32
    %c0_i32_0 = arith.constant 0 : i32
    %c0_i32_1 = arith.constant 0 : i32
    return %c0_i32, %c0_i32_0 : i32, i32
  }
  func.func @transform_8(%arg0: i32) -> (i32, i32) {
    %c0_i32 = arith.constant 0 : i32
    %c0_i32_0 = arith.constant 0 : i32
    %c0_i32_1 = arith.constant 0 : i32
    return %c0_i32, %c0_i32_0 : i32, i32
  }
  func.func @transform_9(%arg0: i32) -> (i32, i32) {
    %c0_i32 = arith.constant 0 : i32
    %c0_i32_0 = arith.constant 0 : i32
    %c0_i32_1 = arith.constant 0 : i32
    return %c0_i32, %c0_i32_0 : i32, i32
  }
  func.func @transform_10(%arg0: i32) -> (i32, i32) {
    %c0_i32 = arith.constant 0 : i32
    %c0_i32_0 = arith.constant 0 : i32
    %c0_i32_1 = arith.constant 0 : i32
    return %c0_i32, %c0_i32_0 : i32, i32
  }
  func.func @transform_11(%arg0: i32) -> (i32, i32, i32) {
    %c0_i32 = arith.constant 0 : i32
    %c0_i32_0 = arith.constant 0 : i32
    %c0_i32_1 = arith.constant 0 : i32
    return %arg0, %c0_i32, %c0_i32_0 : i32, i32, i32
  }
}

</mosaic_0001>

<bundles_post_ra>
// kernel: tpu_custom_call.1
= control target key start
LH: loop header
LB: loop body
LE: loop exit
PB: predicated region body
PF: predicated region fallthrough
CT: control target
= control target key end

     0   :  { %s3797_s0 = inlined_call_operand.hbm [shape: f32[2,16,128], index: 0, kind: input, shape index: {}]   ;;  %s3798_s1 = inlined_call_operand.vmem [shape: f32[1,128], index: 1, kind: input, shape index: {}]   ;;  %s3799_s2 = inlined_call_operand.vmem [shape: f32[1,128], index: 2, kind: input, shape index: {}]   ;;  %s3800_s3 = inlined_call_operand.hbm [shape: f32[128,1536], index: 3, kind: input, shape index: {}]   ;;  %s3801_s4 = inlined_call_operand.hbm [shape: f32[1,1536], index: 4, kind: input, shape index: {}]   ;;  %s3802_s5 = inlined_call_operand.hbm [shape: f32[512,128], index: 5, kind: input, shape index: {}]   ;;  %s3803_s6 = inlined_call_operand.vmem [shape: f32[1,128], index: 6, kind: input, shape index: {}]   ;;  %s3804_s7 = inlined_call_operand.hbm [shape: f32[128,128], index: 7, kind: input, shape index: {}]   ;;  %s3805_s8 = inlined_call_operand.vmem [shape: f32[1,128], index: 8, kind: input, shape index: {}]   ;;  %s3806_s9 = inlined_call_operand.hbm [shape: f32[128,128], index: 9, kind: input, shape index: {}]   ;;  %s3807_s10 = inlined_call_operand.vmem [shape: f32[1,128], index: 10, kind: input, shape index: {}]   ;;  %s3808_s11 = inlined_call_operand.hbm [shape: f32[2,16,128], index: 11, kind: output, shape index: {}]  }
   0x1   :  { %3815 = sst [smem:[#allocation20_spill]] %s3800_s3 }
   0x2   :  { %3816 = sst [smem:[#allocation21_spill]] %s3801_s4 }
   0x3   :  { %3817 = sst [smem:[#allocation22_spill]] %s3802_s5 }
   0x4   :  { %3818 = sst [smem:[#allocation23_spill]] %s3804_s7 }
   0x5   :  { %3819 = sst [smem:[#allocation24_spill]] %s3806_s9 }
   0x6   :  { %16 = vsyncpa [#allocation4], 0 }
   0x7   :  { %18 = vsyncpa [#allocation4 + $0x1], 0 }
   0x8   :  { %19 = vsyncpa [#allocation7], 0 }
   0x9   :  { %20 = vsyncpa [#allocation10], 0 }
   0xa   :  { %21 = vsyncpa [#allocation13], 0 }
   0xb   :  { %22 = vsyncpa [#allocation5], 0 }
   0xc   :  { %24 = vsyncpa [#allocation5 + $0x1], 0  ;;  %s3340_s17 = smov 0   ;;  %s3342_s18 = smov 0  }
   0xd   :  { %s3344_s19 = smov 0   ;;  %s3346_s20 = smov 0  }
   0xe LB: > { %s3266_s21 = smov [#allocation6]   ;;  %s3361_s23 = sadd.s32 4294967295, %s3264_s20   ;;  %s3264_s20 = sphi %s3346_s20, %s3848_s20   ;;  %s3260_s19 = sphi %s3344_s19, %s3847_s19   ;;  %s3256_s18 = sphi %s3342_s18, %s3846_s18   ;;  %s3252_s17 = sphi %s3340_s17, %s3845_s17  }
   0xf   : > { %s315_s22 = sshll.u32 %s3266_s21, 4  ;;  %p2569_p0 = scmp.ge.s32.totalorder %s3264_s20, 1  ;;  %s316_s22 = int_to_ptr.vmem [resolvable:$true] %s315_s22 }
  0x10   : > { %p3811_p1 = scmp.eq.s32.totalorder %s3361_s23, 0  ;;  %p297_p2 = scmp.lt.s32.totalorder %s3264_s20, 3 }
  0x11   : > { %s3267_s25 = smov [#allocation9]   ;;  %s3268_s28 = smov [#allocation8]  }
  0x12   : > { %p3366_p3 = pnand %p2569_p0, %p297_p2  ;;  %s339_s26 = sshll.u32 %s3267_s25, 4  ;;  %s3379_s26 = int_to_ptr.vmem [resolvable:$true] %s339_s26 }
  0x13   : > { %s3381_s29 = sshll.u32 %s3268_s28, 4  ;;  %s3041_s12 = scalar_lea.vmem %s316_s22, 24576  ;;  %s330_s29 = int_to_ptr.vmem [resolvable:$true] %s3381_s29 }
  0x14   : > { %s3820_s24 = scalar_select %p3366_p3, 1, 0 }
  0x15   : > { %p2902_p5 = pneg %p3366_p3  ;;  %p3042_p8 = scmp.ne.s32.totalorder %s316_s22, %s3041_s12 }
  0x16   : > { %p3049_p11 = scmp.lt.s32.totalorder %s316_s22, %s316_s22  ;;  %p3050_p12 = scmp.lt.s32.totalorder %s3041_s12, %s3041_s12 }
  0x17   : > { %p3375_p6 = pnand %p2902_p5, %p3811_p1 }
  0x18   : > { %p3051_p13 = por %p3050_p12, %p3049_p11 }
  0x19   : > { %p3385_p7 = pneg %p3375_p6 }
  0x1b   : > { %p3044_p9 = pnand %p3042_p8, %p3385_p7 }
  0x1d   : > { %p3045_p10 = pneg %p3044_p9 }
  0x1f   : > { %p3052_p0 = pnand %p3051_p13, %p3045_p10 }
  0x21   : > { %3055 = shalt.err (!%p3052_p0)
}
  0x22   : > { %s3269_s13 = smov 1536   ;;  %s3270_s14 = smov 96  }
  0x23   : > { %s3823_s3 = sld [smem:[#allocation20_spill]]  ;;  %s3067_s21 = scalar_lea.vmem %s3379_s26, 8192 }
  0x24   : > { %p3068_p2 = scmp.ne.s32.totalorder %s3379_s26, %s3067_s21  ;;  %p3075_p9 = scmp.lt.s32.totalorder %s3379_s26, %s3379_s26 }
  0x25   : > { %p3076_p10 = scmp.lt.s32.totalorder %s3067_s21, %s3067_s21 }
  0x26   : > { %p3070_p5 = pnand %p3068_p2, %p3385_p7 }
  0x27   : > { %p3077_p11 = por %p3076_p10, %p3075_p9 }
  0x28   : > { %p3071_p8 = pneg %p3070_p5 }
  0x29   : > { %2905 = dma.hbm_to_vmem [thread:$0]  (!%p3375_p6), %s3823_s3, 24576, %s316_s22, [#allocation7], %s3269_s13, %s3269_s13, %s3270_s14  }
  0x2a   : > { %p3078_p12 = pnand %p3077_p11, %p3071_p8 }
  0x2c   : > { %3081 = shalt.err (!%p3078_p12)
}
  0x2d   : > { %s3809_s25 = smov 128   ;;  %s3810_s28 = smov 8  }
  0x2e   : > { %s3824_s5 = sld [smem:[#allocation22_spill]]  ;;  %s3093_s13 = scalar_lea.vmem %s330_s29, 192 }
  0x2f   : > { %p3094_p13 = scmp.ne.s32.totalorder %s330_s29, %s3093_s13  ;;  %p3101_p5 = scmp.lt.s32.totalorder %s330_s29, %s330_s29 }
  0x30   : > { %p3102_p8 = scmp.lt.s32.totalorder %s3093_s13, %s3093_s13 }
  0x31   : > { %p3096_p0 = pnand %p3094_p13, %p3385_p7 }
  0x32   : > { %p3103_p9 = por %p3102_p8, %p3101_p5 }
  0x33   : > { %p3097_p2 = pneg %p3096_p0 }
  0x34   : > { %2911 = dma.hbm_to_vmem [thread:$0]  (!%p3375_p6), %s3824_s5, 8192, %s3379_s26, [#allocation10], %s3809_s25, %s3809_s25, %s3810_s28  }
  0x35   : > { %p3104_p10 = pnand %p3103_p9, %p3097_p2 }
  0x37   : > { %3107 = shalt.err (!%p3104_p10)
}
  0x38   : > { %s3825_s4 = sld [smem:[#allocation21_spill]]  ;;  %s3273_s16 = smov [#allocation11]  }
  0x39   : > { %s355_s26 = sshll.u32 %s3273_s16, 4  ;;  %s3274_s21 = smov [#allocation12]   ;;  %s356_s26 = int_to_ptr.vmem [resolvable:$true] %s355_s26 }
  0x3a   : > { %s371_s22 = sshll.u32 %s3274_s21, 4  ;;  %s3119_s12 = scalar_lea.vmem %s356_s26, 2048  ;;  %s372_s22 = int_to_ptr.vmem [resolvable:$true] %s371_s22 }
  0x3b   : > { %p3120_p11 = scmp.ne.s32.totalorder %s356_s26, %s3119_s12  ;;  %p3127_p0 = scmp.lt.s32.totalorder %s356_s26, %s356_s26 }
  0x3c   : > { %p3128_p2 = scmp.lt.s32.totalorder %s3119_s12, %s3119_s12 }
  0x3d   : > { %p3122_p12 = pnand %p3120_p11, %p3385_p7 }
  0x3e   : > { %2908 = dma.hbm_to_vmem [thread:$0]  (!%p3375_p6), %s3825_s4, 192, %s330_s29, [#allocation7]  }
  0x3f   : > { %p3123_p13 = pneg %p3122_p12  ;;  %p3129_p5 = por %p3128_p2, %p3127_p0 }
  0x41   : > { %p3130_p8 = pnand %p3129_p5, %p3123_p13 }
  0x43   : > { %3133 = shalt.err (!%p3130_p8)
}
  0x44   : > { %s3826_s7 = sld [smem:[#allocation23_spill]]  ;;  %s3145_s14 = scalar_lea.vmem %s372_s22, 2048 }
  0x45   : > { %p3146_p9 = scmp.ne.s32.totalorder %s372_s22, %s3145_s14  ;;  %p3153_p12 = scmp.lt.s32.totalorder %s372_s22, %s372_s22 }
  0x46   : > { %p3154_p0 = scmp.lt.s32.totalorder %s3145_s14, %s3145_s14 }
  0x47   : > { %p3148_p10 = pnand %p3146_p9, %p3385_p7 }
  0x48   : > { %p3155_p13 = por %p3154_p0, %p3153_p12 }
  0x49   : > { %p3149_p11 = pneg %p3148_p10 }
  0x4a   : > { %2914 = dma.hbm_to_vmem [thread:$0]  (!%p3375_p6), %s3826_s7, 2048, %s356_s26, [#allocation10], %s3809_s25, %s3809_s25, %s3810_s28  }
  0x4b   : > { %p3156_p2 = pnand %p3155_p13, %p3149_p11 }
  0x4d   : > { %3159 = shalt.err (!%p3156_p2)
}
  0x4e   : > { %s3827_s9 = sld [smem:[#allocation24_spill]]  ;;  %s2568_s27 = sadd.s32 4294967294, %s3264_s20  }
  0x4f   : > { %s3441_s30 = sadd.s32 1, %s3264_s20   ;;  %s37_s26 = sadd.s32 1, %s3260_s19 }
  0x50   : > { %s34_s21 = ssub.s32 %s3264_s20, %s3441_s30  ;;  %p44_p7 = scmp.ne.s32.totalorder %s3260_s19, %s3256_s18 }
  0x51   : > { %p35_p5 = scmp.eq.s32.totalorder %s34_s21, 0  ;;  %p45_p8 = scmp.eq.s32.totalorder %s3264_s20, 0 }
  0x52   : > { %p50_p9 = scmp.ne.s32.totalorder %s3256_s18, %s3252_s17  ;;  %p284_p10 = scmp.eq.s32.totalorder %s3361_s23, 1 }
  0x53   : > { %s3453_s12 = scalar_select %p35_p5, %s3260_s19, %s37_s26  }
  0x54   : > { %2917 = dma.hbm_to_vmem [thread:$0]  (!%p3375_p6), %s3827_s9, 2048, %s372_s22, [#allocation13], %s3809_s25, %s3809_s25, %s3810_s28  }
  0x55   : > { %p46_p11 = por %p45_p8, %p44_p7  ;;  %p3457_p12 = por %p3811_p1, %p50_p9 }
  0x56   : > { %p3461_p6 = por %p284_p10, %p44_p7  ;;  %p290_p0 = scmp.eq.s32.totalorder %s2568_s27, 1 }
  0x57   : > { %s3828_s29 = scalar_select %p3457_p12, 1, 0 }
  0x58   : > { %s3829_s22 = scalar_select %p3461_p6, 1, 0 }
  0x59   : > { %p2931_p13 = scmp.lt.s32.totalorder %s3264_s20, 2  ;;  %s388_s13 = sand.u32 1, %s3260_s19  }
  0x5a   : > { %p3467_p2 = por %p290_p0, %p50_p9  ;;  %s2576_s15 = sshll.u32 %s388_s13, 4 }
  0x5b   : > { %s2606_s16 = sshll.u32 %s3264_s20, 8  ;;  %s392_s28 = scalar_lea.vmem [#allocation3], %s2576_s15 }
  0x5c   : > { %s3830_s14 = scalar_select %p3467_p2, 1, 0 }
  0x5d   : > { %s3475_s25 = scalar_lea.hbm %s3797_s0, %s2606_s16  ;;  %s399_s3 = sshll.u32 %s392_s28, 4  ;;  %s3481_s3 = int_to_ptr.vmem [resolvable:$true] %s399_s3 }
  0x5e   : > { %p3477_p7 = pnand %p2931_p13, %p46_p11  ;;  %s3483_s4 = scalar_lea.sflag [#allocation4], %s388_s13 }
  0x5f   : > { %s3160_s5 = scalar_lea.hbm %s3475_s25, 256  ;;  %s3165_s15 = scalar_lea.hbm %s3797_s0, 512 }
  0x60   : > { %p3161_p5 = scmp.ne.s32.totalorder %s3475_s25, %s3160_s5  ;;  %p3162_p8 = pneg %p3477_p7 }
  0x61   : > { %p3166_p11 = scmp.lt.s32.totalorder %s3475_s25, %s3797_s0  ;;  %p3167_p0 = scmp.lt.s32.totalorder %s3165_s15, %s3160_s5 }
  0x62   : > { %p3163_p9 = pnand %p3162_p8, %p3161_p5 }
  0x63   : > { %p3168_p13 = por %p3167_p0, %p3166_p11 }
  0x64   : > { %p3164_p10 = pneg %p3163_p9 }
  0x66   : > { %p3169_p4 = pnand %p3168_p13, %p3164_p10 }
  0x68   : > { %3172 = shalt.err (!%p3169_p4)
}
  0x69   : > { %s3173_s13 = scalar_lea.vmem %s3481_s3, 256  ;;  %s3275_s7 = smov [#allocation3]  }
  0x6a   : > { %p3174_p1 = scmp.ne.s32.totalorder %s3481_s3, %s3173_s13  ;;  %s3178_s9 = sshll.u32 %s3275_s7, 4  ;;  %s3179_s9 = int_to_ptr.vmem [resolvable:$false] %s3178_s9 }
  0x6b   : > { %s3180_s16 = scalar_lea.vmem %s3179_s9, 512  ;;  %p3181_p9 = scmp.lt.s32.totalorder %s3481_s3, %s3179_s9 }
  0x6c   : > { %p3176_p2 = pnand %p3174_p1, %p3162_p8  ;;  %p3182_p6 = scmp.lt.s32.totalorder %s3180_s16, %s3173_s13 }
  0x6e   : > { %p3177_p5 = pneg %p3176_p2  ;;  %p3183_p12 = por %p3182_p6, %p3181_p9 }
  0x70   : > { %p3184_p3 = pnand %p3183_p12, %p3177_p5 }
  0x72   : > { %3187 = shalt.err (!%p3184_p3)
}
  0x73   : > { %s3832_s5 = smov 8   ;;  %s3833_s26 = smov 128  }
  0x74   : > { %2921 = dma.hbm_to_vmem [thread:$0]  (!%p3477_p7), %s3475_s25, 256, %s3481_s3, %s3483_s4, %s3833_s26, %s3833_s26, %s3832_s5  }
  0x75   : > { %p3834_p1 = scmp.ne.s32.totalorder %s3820_s24, 0 }
  0x76   : > { %s3510_s7 = sand.u32 (!%p3834_p1), 1, %s3256_s18   ;;  %p3835_p3 = scmp.ne.s32.totalorder (!%p3834_p1), %s3828_s29, 0 }
  0x77   : > { %411 = sbr.rel (%p3834_p1) target bundleno = 3376 (0xd30), region = 64  ;;  %s2580_s9 = sshll.u32 (!%p3834_p1), %s3510_s7, 4 }
  0x78   : > { %s414_s15 = scalar_lea.sflag (!%p3834_p1), [#allocation4], %s3510_s7  ;;  %s3516_s27 = scalar_lea.vmem (!%p3834_p1), [#allocation3], %s2580_s9 }
  0x7c   : > { %3231 = dma.done.wait (%p3835_p3), %s414_s15, 256  }
  0x7d   : > { %3233 = vsyncadd (%p3835_p3), %s414_s15, 4294967040  ;;  %p3836_p4 = scmp.eq.s32.totalorder %s3361_s23, 0 }
  0x7f   : > { %3235 = dma.done.wait (%p3836_p4), [#allocation7], 24768   ;;  %p3837_p12 = pmov %p3836_p4 }
  0x80   : > { %p3838_p6 = pmov %p3836_p4 }
  0x81   : > { %3237 = vsyncadd (%p3837_p12), [#allocation7], 4294942528 }
  0x82   : > { %3239 = dma.done.wait (%p3838_p6), [#allocation10], 10240   ;;  %p3839_p2 = pmov %p3836_p4 }
  0x84   : > { %3241 = vsyncadd (%p3839_p2), [#allocation10], 4294957056  ;;  %p3840_p7 = pmov %p3839_p2 }
  0x85   : > { %p3841_p8 = pmov %p3839_p2 }
  0x86   : > { %3243 = dma.done.wait (%p3840_p7), [#allocation13], 2048  }
  0x87   : > { %3245 = vsyncadd (%p3841_p8), [#allocation13], 4294965248  ;;  %v476_v0 = vld [vmem:[%s3516_s27] sm:$0xff]  ;;  %v477_v1 = vld [vmem:[%s3516_s27 + $0x8] sm:$0xff]  ;;  %v3276_v2 = vmov 0.0   ;;  %v480_v21 = vlaneseq  ;;  %vm1318_vm1 = vcmask 130048  }
  0x88   : > { %485 = vadd.xlane.f32.xlu0 %v476_v0  ;;  %845 = vmatprep.mubr.f32.mxu0 %v3276_v2  ;;  %v706_v3 = vld [vmem:[#allocation6 + $0x5a8] sm:$0xff]  ;;  %v708_v4 = vld [vmem:[#allocation6 + $0x5b8] sm:$0xff]  ;;  %v705_v5 = vld [vmem:[#allocation6 + $0x5a0] sm:$0xff]  ;;  %s475_s4 = scalar_lea.vmem [#allocation14], %s2580_s9  ;;  %s2607_s25 = sshll.u32 %s3361_s23, 8 }
  0x89   : > { %922 = vmatprep.mubr.f32.mxu1 %v3276_v2  ;;  %781 = vmatprep.subr.mxu0 %v706_v3  ;;  %v707_v6 = vld [vmem:[#allocation6 + $0x5b0] sm:$0xff]  ;;  %v694_v7 = vld [vmem:[#allocation6 + $0x548] sm:$0xff]  ;;  %v696_v8 = vld [vmem:[#allocation6 + $0x558] sm:$0xff]  ;;  %v481_v22 = vand.u32 127, %v480_v21  ;;  %s2447_s24 = sshll.u32 %s475_s4, 4  ;;  %s3753_s21 = scalar_lea.hbm %s3808_s11, %s2607_s25  ;;  %s3748_s24 = int_to_ptr.vmem [resolvable:$true] %s2447_s24 }
  0x8a   : > { %858 = vmatprep.subr.mxu1 %v708_v4  ;;  %782 = vmatpush1.msra.mxu0 %v705_v5  ;;  %v693_v9 = vld [vmem:[#allocation6 + $0x540] sm:$0xff]  ;;  %v695_v10 = vld [vmem:[#allocation6 + $0x550] sm:$0xff]  ;;  %v682_v11 = vld [vmem:[#allocation6 + $0x4e8] sm:$0xff]  ;;  %s2434_s9 = scalar_lea.sflag [#allocation5], %s3510_s7  ;;  %s3188_s23 = scalar_lea.vmem %s3748_s24, 256 }
  0x8b   : > { %859 = vmatpush1.msra.mxu1 %v707_v6  ;;  %783 = vmatprep.subr.mxu0 %v694_v7  ;;  %v684_v12 = vld [vmem:[#allocation6 + $0x4f8] sm:$0xff]  ;;  %v681_v13 = vld [vmem:[#allocation6 + $0x4e0] sm:$0xff]  ;;  %v683_v14 = vld [vmem:[#allocation6 + $0x4f0] sm:$0xff]  ;;  %vm482_vm0 = vcmp.lt.s32.totalorder %v481_v22, 32  ;;  %p3189_p10 = scmp.ne.s32.totalorder %s3748_s24, %s3188_s23  ;;  %p3842_p11 = scmp.ne.s32.totalorder %s3829_s22, 0 }
  0x8c   : > { %487 = vadd.xlane.f32.xlu0 %v477_v1  ;;  %860 = vmatprep.subr.mxu1 %v696_v8  ;;  %v670_v15 = vld [vmem:[#allocation6 + $0x488] sm:$0xff]  ;;  %v672_v16 = vld [vmem:[#allocation6 + $0x498] sm:$0xff]  ;;  %v669_v17 = vld [vmem:[#allocation6 + $0x480] sm:$0xff]  ;;  %v3540_v25 = vsel %vm482_vm0, 1.0, %v3276_v2  ;;  %s3277_s13 = smov [#allocation14]  }
  0x8d   : > { %784 = vmatpush1.msra.mxu0 %v693_v9  ;;  %861 = vmatpush1.msra.mxu1 %v695_v10  ;;  %v671_v18 = vld [vmem:[#allocation6 + $0x490] sm:$0xff]  ;;  %v658_v19 = vld [vmem:[#allocation6 + $0x428] sm:$0xff]  ;;  %v660_v20 = vld [vmem:[#allocation6 + $0x438] sm:$0xff]  ;;  %p3190_p0 = pnand %p3189_p10, %p3842_p11  ;;  %s3192_s16 = sshll.u32 %s3277_s13, 4  ;;  %s3193_s16 = int_to_ptr.vmem [resolvable:$false] %s3192_s16 }
  0x8e   : > { %785 = vmatprep.subr.mxu0 %v682_v11  ;;  %862 = vmatprep.subr.mxu1 %v684_v12  ;;  %v657_v34 = vld [vmem:[#allocation6 + $0x420] sm:$0xff]  ;;  %v659_v35 = vld [vmem:[#allocation6 + $0x430] sm:$0xff]  ;;  %v646_v36 = vld [vmem:[#allocation6 + $0x3c8] sm:$0xff]  ;;  %s3194_s5 = scalar_lea.vmem %s3193_s16, 512  ;;  %p3195_p5 = scmp.lt.s32.totalorder %s3748_s24, %s3193_s16 }
  0x8f   : > { %786 = vmatpush1.msra.mxu0 %v681_v13  ;;  %863 = vmatpush1.msra.mxu1 %v683_v14  ;;  %v648_v37 = vld [vmem:[#allocation6 + $0x3d8] sm:$0xff]  ;;  %v645_v38 = vld [vmem:[#allocation6 + $0x3c0] sm:$0xff]  ;;  %v647_v39 = vld [vmem:[#allocation6 + $0x3d0] sm:$0xff]  ;;  %p3191_p13 = pneg %p3190_p0  ;;  %p3196_p9 = scmp.lt.s32.totalorder %s3194_s5, %s3188_s23 }
  0x90   : > { %787 = vmatprep.subr.mxu0 %v670_v15  ;;  %864 = vmatprep.subr.mxu1 %v672_v16  ;;  %v634_v40 = vld [vmem:[#allocation6 + $0x368] sm:$0xff]  ;;  %v636_v41 = vld [vmem:[#allocation6 + $0x378] sm:$0xff]  ;;  %v633_v42 = vld [vmem:[#allocation6 + $0x360] sm:$0xff] }
  0x91   : > { %788 = vmatpush1.msra.mxu0 %v669_v17  ;;  %865 = vmatpush1.msra.mxu1 %v671_v18  ;;  %v635_v43 = vld [vmem:[#allocation6 + $0x370] sm:$0xff]  ;;  %v622_v44 = vld [vmem:[#allocation6 + $0x308] sm:$0xff]  ;;  %v624_v45 = vld [vmem:[#allocation6 + $0x318] sm:$0xff]  ;;  %p3197_p1 = por %p3196_p9, %p3195_p5 }
  0x92   : > { %789 = vmatprep.subr.mxu0 %v658_v19  ;;  %866 = vmatprep.subr.mxu1 %v660_v20  ;;  %v621_v46 = vld [vmem:[#allocation6 + $0x300] sm:$0xff]  ;;  %v623_v47 = vld [vmem:[#allocation6 + $0x310] sm:$0xff]  ;;  %v610_v48 = vld [vmem:[#allocation6 + $0x2a8] sm:$0xff] }
  0x93   : > { %790 = vmatpush1.msra.mxu0 %v657_v34  ;;  %867 = vmatpush1.msra.mxu1 %v659_v35  ;;  %v612_v49 = vld [vmem:[#allocation6 + $0x2b8] sm:$0xff]  ;;  %v609_v50 = vld [vmem:[#allocation6 + $0x2a0] sm:$0xff]  ;;  %v611_v51 = vld [vmem:[#allocation6 + $0x2b0] sm:$0xff]  ;;  %p3198_p3 = pnand %p3197_p1, %p3191_p13 }
  0x94   : > { %791 = vmatprep.subr.mxu0 %v646_v36  ;;  %868 = vmatprep.subr.mxu1 %v648_v37  ;;  %v598_v52 = vld [vmem:[#allocation6 + $0x248] sm:$0xff]  ;;  %v600_v53 = vld [vmem:[#allocation6 + $0x258] sm:$0xff]  ;;  %v597_v54 = vld [vmem:[#allocation6 + $0x240] sm:$0xff] }
  0x95   : > { %792 = vmatpush1.msra.mxu0 %v645_v38  ;;  %869 = vmatpush1.msra.mxu1 %v647_v39  ;;  %v599_v55 = vld [vmem:[#allocation6 + $0x250] sm:$0xff]  ;;  %v586_v56 = vld [vmem:[#allocation6 + $0x1e8] sm:$0xff]  ;;  %v588_v57 = vld [vmem:[#allocation6 + $0x1f8] sm:$0xff] }
  0x96   : > { %793 = vmatprep.subr.mxu0 %v634_v40  ;;  %870 = vmatprep.subr.mxu1 %v636_v41  ;;  %v585_v58 = vld [vmem:[#allocation6 + $0x1e0] sm:$0xff]  ;;  %v587_v59 = vld [vmem:[#allocation6 + $0x1f0] sm:$0xff]  ;;  %v574_v60 = vld [vmem:[#allocation6 + $0x188] sm:$0xff] }
  0x97   : > { %794 = vmatpush1.msra.mxu0 %v633_v42  ;;  %871 = vmatpush1.msra.mxu1 %v635_v43  ;;  %v576_v61 = vld [vmem:[#allocation6 + $0x198] sm:$0xff]  ;;  %v573_v62 = vld [vmem:[#allocation6 + $0x180] sm:$0xff]  ;;  %v575_v63 = vld [vmem:[#allocation6 + $0x190] sm:$0xff] }
  0x98   : > { %795 = vmatprep.subr.mxu0 %v622_v44  ;;  %872 = vmatprep.subr.mxu1 %v624_v45  ;;  %v561_v3 = vld [vmem:[#allocation6 + $0x120] sm:$0xff]  ;;  %v563_v4 = vld [vmem:[#allocation6 + $0x130] sm:$0xff]  ;;  %v550_v5 = vld [vmem:[#allocation6 + $0xc8] sm:$0xff] }
  0x99   : > { %796 = vmatpush1.msra.mxu0 %v621_v46  ;;  %873 = vmatpush1.msra.mxu1 %v623_v47  ;;  %v552_v6 = vld [vmem:[#allocation6 + $0xd8] sm:$0xff]  ;;  %v549_v7 = vld [vmem:[#allocation6 + $0xc0] sm:$0xff]  ;;  %v551_v8 = vld [vmem:[#allocation6 + $0xd0] sm:$0xff] }
  0x9a   : > { %797 = vmatprep.subr.mxu0 %v610_v48  ;;  %874 = vmatprep.subr.mxu1 %v612_v49  ;;  %v538_v9 = vld [vmem:[#allocation6 + $0x68] sm:$0xff]  ;;  %v540_v10 = vld [vmem:[#allocation6 + $0x78] sm:$0xff]  ;;  %v537_v11 = vld [vmem:[#allocation6 + $0x60] sm:$0xff] }
  0x9b   : > { %798 = vmatpush1.msra.mxu0 %v609_v50  ;;  %875 = vmatpush1.msra.mxu1 %v611_v51  ;;  %v539_v12 = vld [vmem:[#allocation6 + $0x70] sm:$0xff]  ;;  %v526_v13 = vld [vmem:[#allocation6 + $0x8] sm:$0xff]  ;;  %v528_v14 = vld [vmem:[#allocation6 + $0x18] sm:$0xff] }
  0x9c   : > { %799 = vmatprep.subr.mxu0 %v598_v52  ;;  %876 = vmatprep.subr.mxu1 %v600_v53  ;;  %v525_v15 = vld [vmem:[#allocation6] sm:$0xff]  ;;  %v527_v16 = vld [vmem:[#allocation6 + $0x10] sm:$0xff]  ;;  %v710_v17 = vld [vmem:[#allocation6 + $0x5c8] sm:$0xff] }
  0x9d   : > { %800 = vmatpush1.msra.mxu0 %v597_v54  ;;  %877 = vmatpush1.msra.mxu1 %v599_v55  ;;  %v712_v18 = vld [vmem:[#allocation6 + $0x5d8] sm:$0xff]  ;;  %v709_v37 = vld [vmem:[#allocation6 + $0x5c0] sm:$0xff]  ;;  %v711_v38 = vld [vmem:[#allocation6 + $0x5d0] sm:$0xff] }
  0x9e   : > { %801 = vmatprep.subr.mxu0 %v586_v56  ;;  %878 = vmatprep.subr.mxu1 %v588_v57  ;;  %v698_v39 = vld [vmem:[#allocation6 + $0x568] sm:$0xff]  ;;  %v700_v40 = vld [vmem:[#allocation6 + $0x578] sm:$0xff]  ;;  %v699_v42 = vld [vmem:[#allocation6 + $0x570] sm:$0xff] }
  0x9f   : > { %802 = vmatpush1.msra.mxu0 %v585_v58  ;;  %879 = vmatpush1.msra.mxu1 %v587_v59  ;;  %v686_v43 = vld [vmem:[#allocation6 + $0x508] sm:$0xff]  ;;  %v688_v44 = vld [vmem:[#allocation6 + $0x518] sm:$0xff]  ;;  %v685_v45 = vld [vmem:[#allocation6 + $0x500] sm:$0xff] }
  0xa0   : > { %803 = vmatprep.subr.mxu0 %v574_v60  ;;  %880 = vmatprep.subr.mxu1 %v576_v61  ;;  %v687_v46 = vld [vmem:[#allocation6 + $0x510] sm:$0xff]  ;;  %v674_v47 = vld [vmem:[#allocation6 + $0x4a8] sm:$0xff]  ;;  %v676_v48 = vld [vmem:[#allocation6 + $0x4b8] sm:$0xff] }
  0xa1   : > { %804 = vmatpush1.msra.mxu0 %v573_v62  ;;  %881 = vmatpush1.msra.mxu1 %v575_v63  ;;  %v673_v49 = vld [vmem:[#allocation6 + $0x4a0] sm:$0xff]  ;;  %v675_v50 = vld [vmem:[#allocation6 + $0x4b0] sm:$0xff]  ;;  %v662_v51 = vld [vmem:[#allocation6 + $0x448] sm:$0xff] }
  0xa2   : > { %v664_v52 = vld [vmem:[#allocation6 + $0x458] sm:$0xff]  ;;  %v661_v53 = vld [vmem:[#allocation6 + $0x440] sm:$0xff]  ;;  %v663_v54 = vld [vmem:[#allocation6 + $0x450] sm:$0xff] }
  0xa3   : > { %v650_v55 = vld [vmem:[#allocation6 + $0x3e8] sm:$0xff]  ;;  %v652_v56 = vld [vmem:[#allocation6 + $0x3f8] sm:$0xff]  ;;  %v649_v57 = vld [vmem:[#allocation6 + $0x3e0] sm:$0xff] }
  0xa4   : > { %v651_v58 = vld [vmem:[#allocation6 + $0x3f0] sm:$0xff]  ;;  %v638_v59 = vld [vmem:[#allocation6 + $0x388] sm:$0xff]  ;;  %v640_v60 = vld [vmem:[#allocation6 + $0x398] sm:$0xff] }
  0xa5   : > { %v637_v61 = vld [vmem:[#allocation6 + $0x380] sm:$0xff]  ;;  %v639_v62 = vld [vmem:[#allocation6 + $0x390] sm:$0xff]  ;;  %v626_v63 = vld [vmem:[#allocation6 + $0x328] sm:$0xff] }
 0x111   : > { %v486_v23 = vpop.xlane.xlu0 %485 }
 0x112   : > { %v489_v24 = vmul.f32 0.03125, %v486_v23 }
 0x114   : > { %v491_v26 = vsub.f32 %v476_v0, %v489_v24  ;;  %v562_v0 = vld [vmem:[#allocation6 + $0x128] sm:$0xff] }
 0x115   : > { %v488_v27 = vpop.xlane.xlu0 %487  ;;  %805 = vmatprep.subr.mxu0 %v562_v0  ;;  %v628_v0 = vld [vmem:[#allocation6 + $0x338] sm:$0xff] }
 0x116   : > { %v490_v28 = vmul.f32 0.03125, %v488_v27  ;;  %v3543_v29 = vmul.f32 %v3540_v25, %v491_v26  ;;  %806 = vmatpush1.msra.mxu0 %v561_v3  ;;  %v627_v3 = vld [vmem:[#allocation6 + $0x330] sm:$0xff] }
 0x117   : > { %807 = vmatprep.subr.mxu0 %v550_v5  ;;  %v616_v5 = vld [vmem:[#allocation6 + $0x2d8] sm:$0xff] }
 0x118   : > { %v492_v30 = vsub.f32 %v477_v1, %v490_v28  ;;  %v495_v31 = vmul.f32 %v3543_v29, %v3543_v29  ;;  %v564_v1 = vld [vmem:[#allocation6 + $0x138] sm:$0xff]  ;;  %808 = vmatpush1.msra.mxu0 %v549_v7  ;;  %v2588_v28 = vld [vmem:[%s3798_s1] ss:$0 sm:$0xff]  ;;  %v615_v7 = vld [vmem:[#allocation6 + $0x2d0] sm:$0xff] }
 0x119   : > { %882 = vmatprep.subr.mxu1 %v564_v1  ;;  %809 = vmatprep.subr.mxu0 %v538_v9  ;;  %v625_v1 = vld [vmem:[#allocation6 + $0x320] sm:$0xff]  ;;  %v604_v9 = vld [vmem:[#allocation6 + $0x278] sm:$0xff] }
 0x11a   : > { %497 = vadd.xlane.f32.xlu1 %v495_v31  ;;  %v3548_v32 = vmul.f32 %v3540_v25, %v492_v30  ;;  %883 = vmatpush1.msra.mxu1 %v563_v4  ;;  %v2589_v31 = vld [vmem:[%s3799_s2] ss:$0 sm:$0xff]  ;;  %v614_v4 = vld [vmem:[#allocation6 + $0x2c8] sm:$0xff] }
 0x11b   : > { %884 = vmatprep.subr.mxu1 %v552_v6  ;;  %810 = vmatpush1.msra.mxu0 %v537_v11  ;;  %v613_v6 = vld [vmem:[#allocation6 + $0x2c0] sm:$0xff]  ;;  %v603_v11 = vld [vmem:[#allocation6 + $0x270] sm:$0xff] }
 0x11c   : > { %v496_v33 = vmul.f32 %v3548_v32, %v3548_v32  ;;  %885 = vmatpush1.msra.mxu1 %v551_v8  ;;  %811 = vmatprep.subr.mxu0 %v526_v13  ;;  %v602_v8 = vld [vmem:[#allocation6 + $0x268] sm:$0xff]  ;;  %v592_v13 = vld [vmem:[#allocation6 + $0x218] sm:$0xff] }
 0x11d   : > { %886 = vmatprep.subr.mxu1 %v540_v10  ;;  %812 = vmatpush1.msra.mxu0 %v525_v15  ;;  %v601_v10 = vld [vmem:[#allocation6 + $0x260] sm:$0xff]  ;;  %v591_v15 = vld [vmem:[#allocation6 + $0x210] sm:$0xff] }
 0x11e   : > { %499 = vadd.xlane.f32.xlu1 %v496_v33  ;;  %887 = vmatpush1.msra.mxu1 %v539_v12  ;;  %v590_v12 = vld [vmem:[#allocation6 + $0x208] sm:$0xff] }
 0x11f   : > { %888 = vmatprep.subr.mxu1 %v528_v14  ;;  %935 = vmatprep.subr.mxu0 %v710_v17  ;;  %v589_v14 = vld [vmem:[#allocation6 + $0x200] sm:$0xff]  ;;  %v580_v17 = vld [vmem:[#allocation6 + $0x1b8] sm:$0xff] }
 0x120   : > { %889 = vmatpush1.msra.mxu1 %v527_v16  ;;  %v578_v16 = vld [vmem:[#allocation6 + $0x1a8] sm:$0xff] }
 0x121   : > { %1012 = vmatprep.subr.mxu1 %v712_v18  ;;  %v577_v18 = vld [vmem:[#allocation6 + $0x1a0] sm:$0xff] }
 0x1a3   : > { %v498_v19 = vpop.xlane.xlu1 %497 }
 0x1a4   : > { %v501_v20 = vmul.f32 0.03125, %v498_v19  ;;  %v579_v19 = vld [vmem:[#allocation6 + $0x1b0] sm:$0xff] }
 0x1a6   : > { %v503_v22 = vadd.f32 1e-05, %v501_v20  ;;  %v566_v20 = vld [vmem:[#allocation6 + $0x148] sm:$0xff] }
 0x1a7   : > { %v500_v23 = vpop.xlane.xlu1 %499 }
 0x1a8   : > { %2982 = vrsqrt.f32 %v503_v22  ;;  %v502_v24 = vmul.f32 0.03125, %v500_v23  ;;  %v568_v22 = vld [vmem:[#allocation6 + $0x158] sm:$0xff]  ;;  %v565_v23 = vld [vmem:[#allocation6 + $0x140] sm:$0xff] }
 0x1aa   : > { %v504_v26 = vadd.f32 1e-05, %v502_v24  ;;  %v567_v24 = vld [vmem:[#allocation6 + $0x150] sm:$0xff] }
 0x1ac   : > { %2984 = vrsqrt.f32 %v504_v26  ;;  %v554_v26 = vld [vmem:[#allocation6 + $0xe8] sm:$0xff] }
 0x1b5   : > { %v2983_v27 = vpop.eup %2982 }
 0x1b6   : > { %v507_v30 = vmul.f32 %v2983_v27, %v3543_v29  ;;  %v697_v29 = vld [vmem:[#allocation6 + $0x560] sm:$0xff]  ;;  %v556_v27 = vld [vmem:[#allocation6 + $0xf8] sm:$0xff] }
 0x1b8   : > { %v515_v33 = vmul.f32 %v2588_v28, %v507_v30  ;;  %v555_v30 = vld [vmem:[#allocation6 + $0xf0] sm:$0xff] }
 0x1b9   : > { %v2985_v34 = vpop.eup %2984 }
 0x1ba   : > { %v508_v35 = vmul.f32 %v2985_v34, %v3548_v32  ;;  %v3560_v36 = vadd.f32 %v2589_v31, %v515_v33  ;;  %v544_v33 = vld [vmem:[#allocation6 + $0x98] sm:$0xff]  ;;  %v541_v34 = vld [vmem:[#allocation6 + $0x80] sm:$0xff] }
 0x1bc   : > { %v516_v41 = vmul.f32 %v2588_v28, %v508_v35  ;;  %846 = vmatmul.mubr.f32.vlgmr.msra.gmra.mxu0 %v3560_v36  ;;  %923 = vmatmul.mubr.f32.vlgmr.msra.gmra.mxu1 %v3560_v36  ;;  %v553_v28 = vld [vmem:[#allocation6 + $0xe0] sm:$0xff]  ;;  %v543_v35 = vld [vmem:[#allocation6 + $0x90] sm:$0xff] }
 0x1bd   : > { %936 = vmatpush1.msra.mxu0 %v709_v37  ;;  %1013 = vmatpush1.msra.mxu1 %v711_v38  ;;  %v530_v37 = vld [vmem:[#allocation6 + $0x28] sm:$0xff]  ;;  %v532_v38 = vld [vmem:[#allocation6 + $0x38] sm:$0xff] }
 0x1be   : > { %937 = vmatprep.subr.mxu0 %v698_v39  ;;  %1014 = vmatprep.subr.mxu1 %v700_v40  ;;  %v3564_v32 = vadd.f32 %v2589_v31, %v516_v41  ;;  %v542_v31 = vld [vmem:[#allocation6 + $0x88] sm:$0xff]  ;;  %v529_v39 = vld [vmem:[#allocation6 + $0x20] sm:$0xff]  ;;  %v531_v40 = vld [vmem:[#allocation6 + $0x30] sm:$0xff] }
 0x1bf   : > { %938 = vmatpush1.msra.mxu0 %v697_v29  ;;  %1015 = vmatpush1.msra.mxu1 %v699_v42  ;;  %v714_v41 = vld [vmem:[#allocation6 + $0x5e8] sm:$0xff]  ;;  %v716_v29 = vld [vmem:[#allocation6 + $0x5f8] sm:$0xff]  ;;  %v713_v42 = vld [vmem:[#allocation6 + $0x5e0] sm:$0xff] }
 0x1c0   : > { %851 = vmatprep.mubr.f32.mxu0 %v3276_v2  ;;  %928 = vmatprep.mubr.f32.mxu1 %v3276_v2 }
 0x1c1   : > { %939 = vmatprep.subr.mxu0 %v686_v43  ;;  %1016 = vmatprep.subr.mxu1 %v688_v44  ;;  %v715_v43 = vld [vmem:[#allocation6 + $0x5f0] sm:$0xff]  ;;  %v702_v44 = vld [vmem:[#allocation6 + $0x588] sm:$0xff] }
 0x1c2   : > { %852 = vmatmul.mubr.f32.gmra.mxu0 %v3564_v32  ;;  %929 = vmatmul.mubr.f32.gmra.mxu1 %v3564_v32 }
 0x1c3   : > { %940 = vmatpush1.msra.mxu0 %v685_v45  ;;  %1017 = vmatpush1.msra.mxu1 %v687_v46  ;;  %v704_v45 = vld [vmem:[#allocation6 + $0x598] sm:$0xff]  ;;  %v701_v46 = vld [vmem:[#allocation6 + $0x580] sm:$0xff] }
 0x1c4   : > { %941 = vmatprep.subr.mxu0 %v674_v47  ;;  %1018 = vmatprep.subr.mxu1 %v676_v48  ;;  %v703_v47 = vld [vmem:[#allocation6 + $0x590] sm:$0xff]  ;;  %v690_v48 = vld [vmem:[#allocation6 + $0x528] sm:$0xff] }
 0x1c5   : > { %942 = vmatpush1.msra.mxu0 %v673_v49  ;;  %1019 = vmatpush1.msra.mxu1 %v675_v50  ;;  %v692_v49 = vld [vmem:[#allocation6 + $0x538] sm:$0xff]  ;;  %v689_v50 = vld [vmem:[#allocation6 + $0x520] sm:$0xff] }
 0x1c6   : > { %943 = vmatprep.subr.mxu0 %v662_v51  ;;  %1020 = vmatprep.subr.mxu1 %v664_v52  ;;  %v691_v51 = vld [vmem:[#allocation6 + $0x530] sm:$0xff]  ;;  %v678_v52 = vld [vmem:[#allocation6 + $0x4c8] sm:$0xff] }
 0x1c7   : > { %944 = vmatpush1.msra.mxu0 %v661_v53  ;;  %1021 = vmatpush1.msra.mxu1 %v663_v54  ;;  %v680_v53 = vld [vmem:[#allocation6 + $0x4d8] sm:$0xff]  ;;  %v677_v54 = vld [vmem:[#allocation6 + $0x4c0] sm:$0xff] }
 0x1c8   : > { %945 = vmatprep.subr.mxu0 %v650_v55  ;;  %1022 = vmatprep.subr.mxu1 %v652_v56  ;;  %v679_v55 = vld [vmem:[#allocation6 + $0x4d0] sm:$0xff]  ;;  %v666_v56 = vld [vmem:[#allocation6 + $0x468] sm:$0xff] }
 0x1c9   : > { %946 = vmatpush1.msra.mxu0 %v649_v57  ;;  %1023 = vmatpush1.msra.mxu1 %v651_v58  ;;  %v668_v57 = vld [vmem:[#allocation6 + $0x478] sm:$0xff]  ;;  %v665_v58 = vld [vmem:[#allocation6 + $0x460] sm:$0xff] }
 0x1ca   : > { %947 = vmatprep.subr.mxu0 %v638_v59  ;;  %1024 = vmatprep.subr.mxu1 %v640_v60  ;;  %v667_v59 = vld [vmem:[#allocation6 + $0x470] sm:$0xff]  ;;  %v654_v60 = vld [vmem:[#allocation6 + $0x408] sm:$0xff] }
 0x1cb   : > { %948 = vmatpush1.msra.mxu0 %v637_v61  ;;  %1025 = vmatpush1.msra.mxu1 %v639_v62  ;;  %v656_v61 = vld [vmem:[#allocation6 + $0x418] sm:$0xff]  ;;  %v653_v62 = vld [vmem:[#allocation6 + $0x400] sm:$0xff] }
 0x1cc   : > { %949 = vmatprep.subr.mxu0 %v626_v63  ;;  %1026 = vmatprep.subr.mxu1 %v628_v0  ;;  %v655_v63 = vld [vmem:[#allocation6 + $0x410] sm:$0xff]  ;;  %v642_v0 = vld [vmem:[#allocation6 + $0x3a8] sm:$0xff] }
 0x1cd   : > { %950 = vmatpush1.msra.mxu0 %v625_v1  ;;  %1027 = vmatpush1.msra.mxu1 %v627_v3  ;;  %v644_v1 = vld [vmem:[#allocation6 + $0x3b8] sm:$0xff]  ;;  %v641_v3 = vld [vmem:[#allocation6 + $0x3a0] sm:$0xff] }
 0x1ce   : > { %951 = vmatprep.subr.mxu0 %v614_v4  ;;  %1028 = vmatprep.subr.mxu1 %v616_v5  ;;  %v643_v4 = vld [vmem:[#allocation6 + $0x3b0] sm:$0xff]  ;;  %v630_v5 = vld [vmem:[#allocation6 + $0x348] sm:$0xff] }
 0x1cf   : > { %952 = vmatpush1.msra.mxu0 %v613_v6  ;;  %1029 = vmatpush1.msra.mxu1 %v615_v7  ;;  %v632_v6 = vld [vmem:[#allocation6 + $0x358] sm:$0xff]  ;;  %v629_v7 = vld [vmem:[#allocation6 + $0x340] sm:$0xff] }
 0x1d0   : > { %953 = vmatprep.subr.mxu0 %v602_v8  ;;  %1030 = vmatprep.subr.mxu1 %v604_v9  ;;  %v631_v8 = vld [vmem:[#allocation6 + $0x350] sm:$0xff]  ;;  %v618_v9 = vld [vmem:[#allocation6 + $0x2e8] sm:$0xff] }
 0x1d1   : > { %954 = vmatpush1.msra.mxu0 %v601_v10  ;;  %1031 = vmatpush1.msra.mxu1 %v603_v11  ;;  %v620_v10 = vld [vmem:[#allocation6 + $0x2f8] sm:$0xff]  ;;  %v617_v11 = vld [vmem:[#allocation6 + $0x2e0] sm:$0xff] }
 0x1d2   : > { %955 = vmatprep.subr.mxu0 %v590_v12  ;;  %1032 = vmatprep.subr.mxu1 %v592_v13  ;;  %v619_v12 = vld [vmem:[#allocation6 + $0x2f0] sm:$0xff]  ;;  %v606_v13 = vld [vmem:[#allocation6 + $0x288] sm:$0xff] }
 0x1d3   : > { %956 = vmatpush1.msra.mxu0 %v589_v14  ;;  %1033 = vmatpush1.msra.mxu1 %v591_v15  ;;  %v608_v14 = vld [vmem:[#allocation6 + $0x298] sm:$0xff]  ;;  %v605_v15 = vld [vmem:[#allocation6 + $0x280] sm:$0xff] }
 0x1d4   : > { %957 = vmatprep.subr.mxu0 %v578_v16  ;;  %1034 = vmatprep.subr.mxu1 %v580_v17  ;;  %v607_v16 = vld [vmem:[#allocation6 + $0x290] sm:$0xff]  ;;  %v594_v17 = vld [vmem:[#allocation6 + $0x228] sm:$0xff] }
 0x1d5   : > { %958 = vmatpush1.msra.mxu0 %v577_v18  ;;  %1035 = vmatpush1.msra.mxu1 %v579_v19  ;;  %v596_v18 = vld [vmem:[#allocation6 + $0x238] sm:$0xff]  ;;  %v593_v19 = vld [vmem:[#allocation6 + $0x220] sm:$0xff] }
 0x1d6   : > { %959 = vmatprep.subr.mxu0 %v566_v20  ;;  %1036 = vmatprep.subr.mxu1 %v568_v22  ;;  %v595_v20 = vld [vmem:[#allocation6 + $0x230] sm:$0xff]  ;;  %v582_v22 = vld [vmem:[#allocation6 + $0x1c8] sm:$0xff] }
 0x1d7   : > { %960 = vmatpush1.msra.mxu0 %v565_v23  ;;  %1037 = vmatpush1.msra.mxu1 %v567_v24  ;;  %v584_v23 = vld [vmem:[#allocation6 + $0x1d8] sm:$0xff]  ;;  %v581_v24 = vld [vmem:[#allocation6 + $0x1c0] sm:$0xff] }
 0x1d8   : > { %961 = vmatprep.subr.mxu0 %v554_v26  ;;  %1038 = vmatprep.subr.mxu1 %v556_v27  ;;  %v583_v26 = vld [vmem:[#allocation6 + $0x1d0] sm:$0xff]  ;;  %v570_v27 = vld [vmem:[#allocation6 + $0x168] sm:$0xff] }
 0x1d9   : > { %962 = vmatpush1.msra.mxu0 %v553_v28  ;;  %1039 = vmatpush1.msra.mxu1 %v555_v30  ;;  %v572_v28 = vld [vmem:[#allocation6 + $0x178] sm:$0xff]  ;;  %v569_v30 = vld [vmem:[#allocation6 + $0x160] sm:$0xff] }
 0x1da   : > { %963 = vmatprep.subr.mxu0 %v542_v31  ;;  %1040 = vmatprep.subr.mxu1 %v544_v33  ;;  %v571_v31 = vld [vmem:[#allocation6 + $0x170] sm:$0xff]  ;;  %v558_v33 = vld [vmem:[#allocation6 + $0x108] sm:$0xff] }
 0x1db   : > { %964 = vmatpush1.msra.mxu0 %v541_v34  ;;  %1041 = vmatpush1.msra.mxu1 %v543_v35  ;;  %v560_v34 = vld [vmem:[#allocation6 + $0x118] sm:$0xff]  ;;  %v557_v35 = vld [vmem:[#allocation6 + $0x100] sm:$0xff] }
 0x1dc   : > { %965 = vmatprep.subr.mxu0 %v530_v37  ;;  %1042 = vmatprep.subr.mxu1 %v532_v38  ;;  %v559_v37 = vld [vmem:[#allocation6 + $0x110] sm:$0xff]  ;;  %v546_v38 = vld [vmem:[#allocation6 + $0xa8] sm:$0xff] }
 0x1dd   : > { %966 = vmatpush1.msra.mxu0 %v529_v39  ;;  %999 = vmatprep.mubr.f32.mxu0 %v3276_v2  ;;  %v548_v39 = vld [vmem:[#allocation6 + $0xb8] sm:$0xff] }
 0x1de   : > { %1043 = vmatpush1.msra.mxu1 %v531_v40  ;;  %1076 = vmatprep.mubr.f32.mxu1 %v3276_v2  ;;  %v545_v40 = vld [vmem:[#allocation6 + $0xa0] sm:$0xff] }
 0x1df   : > { %1000 = vmatmul.mubr.f32.vlgmr.msra.gmra.mxu0 %v3560_v36  ;;  %1077 = vmatmul.mubr.f32.vlgmr.msra.gmra.mxu1 %v3560_v36 }
 0x1e0   : > { %1089 = vmatprep.subr.mxu0 %v714_v41  ;;  %1166 = vmatprep.subr.mxu1 %v716_v29  ;;  %v547_v41 = vld [vmem:[#allocation6 + $0xb0] sm:$0xff]  ;;  %v534_v29 = vld [vmem:[#allocation6 + $0x48] sm:$0xff] }
 0x1e1   : > { %1090 = vmatpush1.msra.mxu0 %v713_v42  ;;  %1167 = vmatpush1.msra.mxu1 %v715_v43  ;;  %v536_v42 = vld [vmem:[#allocation6 + $0x58] sm:$0xff]  ;;  %v533_v43 = vld [vmem:[#allocation6 + $0x40] sm:$0xff] }
 0x1e2   : > { %1091 = vmatprep.subr.mxu0 %v702_v44  ;;  %1168 = vmatprep.subr.mxu1 %v704_v45  ;;  %v535_v44 = vld [vmem:[#allocation6 + $0x50] sm:$0xff]  ;;  %v3587_v45 = vshrl.u32 %v480_v21, 7 }
 0x1e3   : > { %1005 = vmatprep.mubr.f32.mxu0 %v3276_v2  ;;  %1082 = vmatprep.mubr.f32.mxu1 %v3276_v2 }
 0x1e4   : > { %1092 = vmatpush1.msra.mxu0 %v701_v46  ;;  %1169 = vmatpush1.msra.mxu1 %v703_v47  ;;  %v723_v46 = vsub.s32 0, %v3587_v45  ;;  %v3590_v47 = vld [vmem:[#allocation8] sm:$0xff]  ;;  %v751_v21 = vsub.s32 7, %v3587_v45 }
 0x1e5   : > { %1006 = vmatmul.mubr.f32.gmra.mxu0 %v3564_v32  ;;  %1083 = vmatmul.mubr.f32.gmra.mxu1 %v3564_v32 }
 0x1e6   : > { %1093 = vmatprep.subr.mxu0 %v690_v48  ;;  %1170 = vmatprep.subr.mxu1 %v692_v49  ;;  %v724_v48 = vrot.slane %v3590_v47, %v723_v46 }
 0x1e7   : > { %1094 = vmatpush1.msra.mxu0 %v689_v50  ;;  %1171 = vmatpush1.msra.mxu1 %v691_v51 }
 0x1e8   : > { %1095 = vmatprep.subr.mxu0 %v678_v52  ;;  %1172 = vmatprep.subr.mxu1 %v680_v53 }
 0x1e9   : > { %1096 = vmatpush1.msra.mxu0 %v677_v54  ;;  %1173 = vmatpush1.msra.mxu1 %v679_v55  ;;  %v752_v55 = vrot.slane %v3590_v47, %v751_v21 }
 0x1ea   : > { %1097 = vmatprep.subr.mxu0 %v666_v56  ;;  %1174 = vmatprep.subr.mxu1 %v668_v57 }
 0x1eb   : > { %1098 = vmatpush1.msra.mxu0 %v665_v58  ;;  %1175 = vmatpush1.msra.mxu1 %v667_v59  ;;  %v739_v58 = vsub.s32 4, %v3587_v45 }
 0x1ec   : > { %1099 = vmatprep.subr.mxu0 %v654_v60  ;;  %1176 = vmatprep.subr.mxu1 %v656_v61 }
 0x1ed   : > { %1100 = vmatpush1.msra.mxu0 %v653_v62  ;;  %1177 = vmatpush1.msra.mxu1 %v655_v63  ;;  %v740_v62 = vrot.slane %v3590_v47, %v739_v58 }
 0x1ee   : > { %1101 = vmatprep.subr.mxu0 %v642_v0  ;;  %1178 = vmatprep.subr.mxu1 %v644_v1  ;;  %v743_v0 = vsub.s32 5, %v3587_v45 }
 0x1ef   : > { %1102 = vmatpush1.msra.mxu0 %v641_v3  ;;  %1179 = vmatpush1.msra.mxu1 %v643_v4  ;;  %v727_v3 = vsub.s32 1, %v3587_v45 }
 0x1f0   : > { %1103 = vmatprep.subr.mxu0 %v630_v5  ;;  %1180 = vmatprep.subr.mxu1 %v632_v6  ;;  %v744_v6 = vrot.slane %v3590_v47, %v743_v0 }
 0x1f1   : > { %1104 = vmatpush1.msra.mxu0 %v629_v7  ;;  %1181 = vmatpush1.msra.mxu1 %v631_v8  ;;  %v728_v7 = vrot.slane %v3590_v47, %v727_v3 }
 0x1f2   : > { %1105 = vmatprep.subr.mxu0 %v618_v9  ;;  %1182 = vmatprep.subr.mxu1 %v620_v10 }
 0x1f3   : > { %1106 = vmatpush1.msra.mxu0 %v617_v11  ;;  %1183 = vmatpush1.msra.mxu1 %v619_v12 }
 0x1f4   : > { %1107 = vmatprep.subr.mxu0 %v606_v13  ;;  %1184 = vmatprep.subr.mxu1 %v608_v14  ;;  %v735_v14 = vsub.s32 3, %v3587_v45 }
 0x1f5   : > { %1108 = vmatpush1.msra.mxu0 %v605_v15  ;;  %1185 = vmatpush1.msra.mxu1 %v607_v16  ;;  %v718_v16 = vld [vmem:[#allocation8 + $0x8] sm:$0xf] }
 0x1f6   : > { %1109 = vmatprep.subr.mxu0 %v594_v17  ;;  %1186 = vmatprep.subr.mxu1 %v596_v18  ;;  %v760_v17 = vrot.slane %v718_v16, %v727_v3  ;;  %v3618_v18 = vrot.slane %v718_v16, %v735_v14 }
 0x1f7   : > { %1110 = vmatpush1.msra.mxu0 %v593_v19  ;;  %1187 = vmatpush1.msra.mxu1 %v595_v20 }
 0x1f8   : > { %1111 = vmatprep.subr.mxu0 %v582_v22  ;;  %1188 = vmatprep.subr.mxu1 %v584_v23  ;;  %v731_v22 = vsub.s32 2, %v3587_v45 }
 0x1f9   : > { %1112 = vmatpush1.msra.mxu0 %v581_v24  ;;  %1189 = vmatpush1.msra.mxu1 %v583_v26  ;;  %v756_v26 = vrot.slane %v718_v16, %v723_v46 }
 0x1fa   : > { %1113 = vmatprep.subr.mxu0 %v570_v27  ;;  %1190 = vmatprep.subr.mxu1 %v572_v28  ;;  %v764_v27 = vrot.slane %v718_v16, %v731_v22 }
 0x1fb   : > { %1114 = vmatpush1.msra.mxu0 %v569_v30  ;;  %1191 = vmatpush1.msra.mxu1 %v571_v31 }
 0x1fc   : > { %1115 = vmatprep.subr.mxu0 %v558_v33  ;;  %1192 = vmatprep.subr.mxu1 %v560_v34 }
 0x1fd   : > { %1116 = vmatpush1.msra.mxu0 %v557_v35  ;;  %1193 = vmatpush1.msra.mxu1 %v559_v37 }
 0x1fe   : > { %1117 = vmatprep.subr.mxu0 %v546_v38  ;;  %1194 = vmatprep.subr.mxu1 %v548_v39 }
 0x1ff   : > { %1118 = vmatpush1.msra.mxu0 %v545_v40  ;;  %1195 = vmatpush1.msra.mxu1 %v547_v41 }
 0x200   : > { %1119 = vmatprep.subr.mxu0 %v534_v29  ;;  %1196 = vmatprep.subr.mxu1 %v536_v42 }
 0x201   : > { %1120 = vmatpush1.msra.mxu0 %v533_v43  ;;  %1153 = vmatprep.mubr.f32.mxu0 %v3276_v2 }
 0x202   : > { %1197 = vmatpush1.msra.mxu1 %v535_v44  ;;  %1230 = vmatprep.mubr.f32.mxu1 %v3276_v2 }
 0x203   : > { %1154 = vmatmul.mubr.f32.vlgmr.msra.gmra.mxu0 %v3560_v36  ;;  %1231 = vmatmul.mubr.f32.vlgmr.msra.gmra.mxu1 %v3560_v36 }
 0x204   : > { %1159 = vmatprep.mubr.f32.mxu0 %v3276_v2  ;;  %1236 = vmatprep.mubr.f32.mxu1 %v3276_v2 }
 0x207   : > { %1160 = vmatmul.mubr.f32.gmra.mxu0 %v3564_v32  ;;  %1237 = vmatmul.mubr.f32.gmra.mxu1 %v3564_v32 }
 0x27c   : > { %v847_v49 = vpop.f32.mrf.mxu0  ;;  %v3593_v36 = vpop.f32.mrf.mxu1 }
 0x27d   : > { %v848_v50 = vadd.f32 %v847_v49, %v724_v48 }
 0x27e   : > { %v849_v51 = vpop.f32.mrf.mxu0  ;;  %v3595_v2 = vpop.f32.mrf.mxu1 }
 0x27f   : > { %2756 = vmatprep.mubr.f32.mxu0 %v848_v50  ;;  %v850_v10 = vadd.f32 %v849_v51, %v728_v7 }
 0x282   : > { %v853_v52 = vpop.f32.mrf.mxu0  ;;  %v3597_v53 = vpop.f32.mrf.mxu1 }
 0x283   : > { %v854_v9 = vadd.f32 %v853_v52, %v724_v48 }
 0x284   : > { %v855_v32 = vpop.f32.mrf.mxu0  ;;  %v3600_v54 = vpop.f32.mrf.mxu1 }
 0x285   : > { %v856_v12 = vadd.f32 %v855_v32, %v728_v7 }
 0x29f   : > { %v1001_v56 = vpop.f32.mrf.mxu0  ;;  %v3603_v57 = vpop.f32.mrf.mxu1 }
 0x2a0   : > { %v1002_v4 = vadd.f32 %v1001_v56, %v740_v62 }
 0x2a1   : > { %v1003_v59 = vpop.f32.mrf.mxu0  ;;  %v1080_v60 = vpop.f32.mrf.mxu1 }
 0x2a2   : > { %v3606_v61 = vadd.f32 %v1080_v60, %v752_v55  ;;  %v1004_v11 = vadd.f32 %v1003_v59, %v744_v6 }
 0x2a5   : > { %v1007_v63 = vpop.f32.mrf.mxu0  ;;  %v3613_v13 = vpop.f32.mrf.mxu1 }
 0x2a6   : > { %v1008_v1 = vadd.f32 %v1007_v63, %v740_v62 }
 0x2a7   : > { %v1009_v5 = vpop.f32.mrf.mxu0  ;;  %v1086_v15 = vpop.f32.mrf.mxu1 }
 0x2a8   : > { %2752 = vmatprep.subr.mxu0 %v1008_v1  ;;  %v1010_v8 = vadd.f32 %v1009_v5, %v744_v6  ;;  %v3628_v40 = vadd.f32 %v1086_v15, %v752_v55 }
 0x2a9   : > { %2753 = vmatpush3.xpose.msra.mxu0 %v1008_v1 }
 0x2aa   : > { %2754 = vmatprep.subr.mxu0 %v1002_v4 }
 0x2ad   : > { %2755 = vmatpush3.xpose.msra.mxu0 %v1002_v4 }
 0x2ae   : > { %2766 = vmatprep.subr.mxu0 %v1010_v8 }
 0x2b0   : > { %2757 = vmatmul.mubr.f32.vlgmr.msra.gmra.mxu0 %v854_v9 }
 0x2b1   : > { %2767 = vmatpush3.xpose.msra.mxu0 %v1010_v8  ;;  %2770 = vmatprep.mubr.f32.mxu0 %v850_v10 }
 0x2b2   : > { %2768 = vmatprep.subr.mxu0 %v1004_v11 }
 0x2b5   : > { %2769 = vmatpush3.xpose.msra.mxu0 %v1004_v11 }
 0x2b8   : > { %2771 = vmatmul.mubr.f32.vlgmr.msra.gmra.mxu0 %v856_v12 }
 0x2c3   : > { %v1155_v19 = vpop.f32.mrf.mxu0  ;;  %v1232_v20 = vpop.f32.mrf.mxu1 }
 0x2c4   : > { %v1156_v38 = vadd.f32 %v1155_v19, %v756_v26  ;;  %v1233_v39 = vadd.f32 %v1232_v20, %v764_v27  ;;  %v747_v19 = vsub.s32 6, %v3587_v45 }
 0x2c5   : > { %v1157_v23 = vpop.f32.mrf.mxu0  ;;  %v1234_v24 = vpop.f32.mrf.mxu1 }
 0x2c6   : > { %v3623_v28 = vadd.f32 %v1157_v23, %v760_v17  ;;  %v3626_v30 = vadd.f32 %v1234_v24, %v3618_v18  ;;  %v748_v24 = vrot.slane %v3590_v47, %v747_v19  ;;  %v2033_v19 = vld [vmem:[#allocation9 + $0x1e8] sm:$0xff] }
 0x2c7   : > { %v1161_v31 = vpop.f32.mrf.mxu0  ;;  %v1238_v33 = vpop.f32.mrf.mxu1 }
 0x2c8   : > { %v1162_v34 = vadd.f32 %v1161_v31, %v756_v26  ;;  %v1239_v35 = vadd.f32 %v1238_v33, %v764_v27  ;;  %v1085_v26 = vadd.f32 %v3613_v13, %v748_v24  ;;  %v732_v31 = vrot.slane %v3590_v47, %v731_v22 }
 0x2c9   : > { %v1163_v37 = vpop.f32.mrf.mxu0  ;;  %v1240_v13 = vpop.f32.mrf.mxu1 }
 0x2ca   : > { %2759 = vmatprep.subr.mxu1 %v1162_v34  ;;  %2787 = vmatprep.subr.mxu0 %v1239_v35  ;;  %v3630_v41 = vadd.f32 %v1163_v37, %v760_v17  ;;  %v925_v37 = vadd.f32 %v3593_v36, %v732_v31  ;;  %v1241_v22 = vadd.f32 %v1240_v13, %v3618_v18  ;;  %v2027_v13 = vld [vmem:[#allocation9 + $0x1b8] sm:$0xff] }
 0x2cb   : > { %2760 = vmatpush3.msra.mxu1 %v1162_v34  ;;  %2788 = vmatpush3.msra.mxu0 %v1239_v35 }
 0x2cc   : > { %2761 = vmatprep.subr.mxu1 %v1156_v38  ;;  %2789 = vmatprep.subr.mxu0 %v1233_v39 }
 0x2cd   : > { %2762 = vmatpush3.msra.mxu1 %v1156_v38  ;;  %2790 = vmatpush3.msra.mxu0 %v1233_v39  ;;  %v1079_v38 = vadd.f32 %v3603_v57, %v748_v24  ;;  %v2016_v24 = vld [vmem:[#allocation9 + $0x160] sm:$0xff] }
 0x2ce   : > { %2773 = vmatprep.subr.mxu1 %v3630_v41  ;;  %2794 = vmatprep.subr.mxu0 %v3628_v40 }
 0x370   : > { %v2758_v29 = vpop.f32.mrf.mxu0 }
 0x371   : > { %v1322_v42 = vsel %vm1318_vm1, %v2758_v29, -inf }
 0x372   : > { %1323 = vmax.xlane.f32.xlu1 %v1322_v42  ;;  %v1309_v43 = vpop.f32.mrf.mxu0 }
 0x373   : > { %v1319_v44 = vsel %vm1318_vm1, %v1309_v43, -inf }
 0x374   : > { %1320 = vmax.xlane.f32.xlu0 %v1319_v44 }
 0x378   : > { %v2772_v46 = vpop.f32.mrf.mxu0 }
 0x379   : > { %v1502_v48 = vsel %vm1318_vm1, %v2772_v46, -inf }
 0x37a   : > { %1503 = vmax.xlane.f32.xlu1 %v1502_v48  ;;  %v1490_v49 = vpop.f32.mrf.mxu0 }
 0x37b   : > { %v1499_v50 = vsel %vm1318_vm1, %v1490_v49, -inf }
 0x37c   : > { %1500 = vmax.xlane.f32.xlu0 %v1499_v50 }
 0x3fb   : > { %v1324_v51 = vpop.xlane.xlu1 %1323 }
 0x3fc   : > { %v1326_v52 = vsub.f32 %v2758_v29, %v1324_v51 }
 0x3fd   : > { %v1321_v21 = vpop.xlane.xlu0 %1320 }
 0x3fe   : > { %v1329_v32 = vmul.f32 1.442695, %v1326_v52  ;;  %v1325_v55 = vsub.f32 %v1309_v43, %v1321_v21 }
 0x400   : > { %2986 = vpow2.f32 %v1329_v32  ;;  %v1327_v56 = vmul.f32 1.442695, %v1325_v55 }
 0x402   : > { %2988 = vpow2.f32 %v1327_v56 }
 0x403   : > { %v1504_v58 = vpop.xlane.xlu1 %1503 }
 0x404   : > { %v1506_v59 = vsub.f32 %v2772_v46, %v1504_v58  ;;  %v736_v58 = vrot.slane %v3590_v47, %v735_v14 }
 0x405   : > { %v1501_v60 = vpop.xlane.xlu0 %1500 }
 0x406   : > { %v1509_v62 = vmul.f32 1.442695, %v1506_v59  ;;  %v1505_v63 = vsub.f32 %v1490_v49, %v1501_v60  ;;  %v933_v45 = vadd.f32 %v3600_v54, %v736_v58 }
 0x408   : > { %2990 = vpow2.f32 %v1509_v62  ;;  %v1507_v0 = vmul.f32 1.442695, %v1505_v63  ;;  %v927_v63 = vadd.f32 %v3595_v2, %v736_v58  ;;  %v1986_v58 = vld [vmem:[#allocation9 + $0x70] sm:$0xff] }
 0x40a   : > { %2992 = vpow2.f32 %v1507_v0 }
 0x40d   : > { %v2987_v1 = vpop.eup %2986 }
 0x40e   : > { %v1334_v3 = vsel %vm1318_vm1, %v2987_v1, 0.0 }
 0x40f   : > { %v2989_v4 = vpop.eup %2988  ;;  %1335 = vadd.xlane.f32.xlu1 %v1334_v3 }
 0x410   : > { %v1331_v5 = vsel %vm1318_vm1, %v2989_v4, 0.0 }
 0x411   : > { %1332 = vadd.xlane.f32.xlu0 %v1331_v5 }
 0x415   : > { %v2991_v6 = vpop.eup %2990 }
 0x416   : > { %v1514_v7 = vsel %vm1318_vm1, %v2991_v6, 0.0 }
 0x417   : > { %v2993_v8 = vpop.eup %2992  ;;  %1515 = vadd.xlane.f32.xlu1 %v1514_v7 }
 0x418   : > { %v1511_v9 = vsel %vm1318_vm1, %v2993_v8, 0.0 }
 0x419   : > { %1512 = vadd.xlane.f32.xlu0 %v1511_v9 }
 0x498   : > { %v1336_v10 = vpop.xlane.xlu1 %1335 }
 0x499   : > { %2994 = vrcp.f32 %v1336_v10 }
 0x49a   : > { %v1333_v11 = vpop.xlane.xlu0 %1332 }
 0x49b   : > { %2996 = vrcp.f32 %v1333_v11  ;;  %v2003_v11 = vld [vmem:[#allocation9 + $0xf8] sm:$0xff] }
 0x4a0   : > { %v1516_v12 = vpop.xlane.xlu1 %1515 }
 0x4a1   : > { %2998 = vrcp.f32 %v1516_v12  ;;  %v2035_v12 = vld [vmem:[#allocation9 + $0x1f8] sm:$0xff] }
 0x4a2   : > { %v1513_v15 = vpop.xlane.xlu0 %1512 }
 0x4a3   : > { %3000 = vrcp.f32 %v1513_v15  ;;  %v2019_v15 = vld [vmem:[#allocation9 + $0x178] sm:$0xff] }
 0x4a6   : > { %v2995_v16 = vpop.eup %2994 }
 0x4a7   : > { %v1340_v23 = vmul.f32 %v2995_v16, %v2987_v1  ;;  %v2034_v16 = vld [vmem:[#allocation9 + $0x1f0] sm:$0xff] }
 0x4a8   : > { %v2997_v17 = vpop.eup %2996 }
 0x4a9   : > { %v1339_v20 = vmul.f32 %v2997_v17, %v2989_v4  ;;  %v2018_v17 = vld [vmem:[#allocation9 + $0x170] sm:$0xff] }
 0x4ab   : > { %2763 = vmatprep.mubr.msk.f32.mxu1 %vm1318_vm1, %v1339_v20  ;;  %v2017_v20 = vld [vmem:[#allocation9 + $0x168] sm:$0xff] }
 0x4ac   : > { %2764 = vmatmul.mubr.msk.f32.vlgmr.msra.gmra.mxu1 %vm1318_vm1, %v1340_v23  ;;  %v2032_v23 = vld [vmem:[#allocation9 + $0x1e0] sm:$0xff] }
 0x4ad   : > { %2774 = vmatpush3.msra.mxu1 %v3630_v41 }
 0x4ae   : > { %2775 = vmatprep.subr.mxu1 %v3623_v28  ;;  %v2999_v27 = vpop.eup %2998 }
 0x4af   : > { %2776 = vmatpush3.msra.mxu1 %v3623_v28  ;;  %v1520_v35 = vmul.f32 %v2999_v27, %v2991_v6  ;;  %v931_v28 = vadd.f32 %v3597_v53, %v732_v31  ;;  %v2015_v27 = vld [vmem:[#allocation9 + $0x158] sm:$0xff]  ;;  %v2030_v31 = vld [vmem:[#allocation9 + $0x1d0] sm:$0xff] }
 0x4b0   : > { %v3001_v33 = vpop.eup %3000  ;;  %2780 = vmatprep.subr.mxu1 %v1085_v26 }
 0x4b1   : > { %v1519_v34 = vmul.f32 %v3001_v33, %v2993_v8  ;;  %v2014_v33 = vld [vmem:[#allocation9 + $0x150] sm:$0xff] }
 0x4b3   : > { %2777 = vmatprep.mubr.msk.f32.mxu1 %vm1318_vm1, %v1519_v34  ;;  %v2029_v34 = vld [vmem:[#allocation9 + $0x1c8] sm:$0xff] }
 0x4b4   : > { %2778 = vmatmul.mubr.msk.f32.vlgmr.msra.gmra.mxu1 %vm1318_vm1, %v1520_v35  ;;  %v2013_v35 = vld [vmem:[#allocation9 + $0x148] sm:$0xff] }
 0x4b5   : > { %2781 = vmatpush3.xpose.msra.mxu1 %v1085_v26  ;;  %2784 = vmatprep.mubr.f32.mxu1 %v925_v37  ;;  %v2031_v26 = vld [vmem:[#allocation9 + $0x1d8] sm:$0xff]  ;;  %v2028_v37 = vld [vmem:[#allocation9 + $0x1c0] sm:$0xff] }
 0x4b6   : > { %2782 = vmatprep.subr.mxu1 %v1079_v38 }
 0x4b9   : > { %2783 = vmatpush3.xpose.msra.mxu1 %v1079_v38  ;;  %v2012_v38 = vld [vmem:[#allocation9 + $0x140] sm:$0xff] }
 0x4ba   : > { %2801 = vmatprep.subr.mxu1 %v1241_v22 }
 0x4bc   : > { %2785 = vmatmul.mubr.f32.vlgmr.msra.gmra.mxu1 %v931_v28  ;;  %v2026_v28 = vld [vmem:[#allocation9 + $0x1b0] sm:$0xff] }
 0x4bd   : > { %2802 = vmatpush3.msra.mxu1 %v1241_v22  ;;  %v2011_v22 = vld [vmem:[#allocation9 + $0x138] sm:$0xff] }
 0x4be   : > { %2803 = vmatprep.subr.mxu1 %v3626_v30 }
 0x4bf   : > { %2804 = vmatpush3.msra.mxu1 %v3626_v30 }
 0x4c0   : > { %2640 = vmatprep.subr.mxu1 %v2003_v11  ;;  %v1991_v11 = vld [vmem:[#allocation9 + $0x98] sm:$0xff] }
 0x56c   : > { %v3661_v36 = vpop.f32.mrf.mxu1 }
 0x56e   : > { %v3663_v57 = vpop.f32.mrf.mxu1 }
 0x574   : > { %v3665_v39 = vpop.f32.mrf.mxu1 }
 0x576   : > { %v3667_v41 = vpop.f32.mrf.mxu1 }
 0x57c   : > { %v2786_v29 = vpop.f32.mrf.mxu1 }
 0x57d   : > { %v1682_v18 = vsel %vm1318_vm1, %v2786_v29, -inf }
 0x57e   : > { %1683 = vmax.xlane.f32.xlu1 %v1682_v18  ;;  %v1670_v53 = vpop.f32.mrf.mxu1  ;;  %v2025_v18 = vld [vmem:[#allocation9 + $0x1a8] sm:$0xff] }
 0x57f   : > { %v1679_v42 = vsel %vm1318_vm1, %v1670_v53, -inf }
 0x580   : > { %1680 = vmax.xlane.f32.xlu0 %v1679_v42  ;;  %v2024_v42 = vld [vmem:[#allocation9 + $0x1a0] sm:$0xff] }
 0x607   : > { %v1684_v43 = vpop.xlane.xlu1 %1683 }
 0x608   : > { %v1686_v44 = vsub.f32 %v2786_v29, %v1684_v43  ;;  %v2010_v29 = vld [vmem:[#allocation9 + $0x130] sm:$0xff]  ;;  %v2008_v43 = vld [vmem:[#allocation9 + $0x120] sm:$0xff] }
 0x609   : > { %v1681_v46 = vpop.xlane.xlu0 %1680 }
 0x60a   : > { %v1689_v30 = vmul.f32 1.442695, %v1686_v44  ;;  %v1685_v48 = vsub.f32 %v1670_v53, %v1681_v46  ;;  %v2009_v53 = vld [vmem:[#allocation9 + $0x128] sm:$0xff]  ;;  %v2023_v44 = vld [vmem:[#allocation9 + $0x198] sm:$0xff] }
 0x60b   : > { %v2007_v46 = vld [vmem:[#allocation9 + $0x118] sm:$0xff] }
 0x60c   : > { %3002 = vpow2.f32 %v1689_v30  ;;  %v1687_v49 = vmul.f32 1.442695, %v1685_v48  ;;  %v2022_v30 = vld [vmem:[#allocation9 + $0x190] sm:$0xff] }
 0x60d   : > { %v2006_v48 = vld [vmem:[#allocation9 + $0x110] sm:$0xff] }
 0x60e   : > { %3004 = vpow2.f32 %v1687_v49 }
 0x619   : > { %v3003_v50 = vpop.eup %3002 }
 0x61a   : > { %v1694_v51 = vsel %vm1318_vm1, %v3003_v50, 0.0 }
 0x61b   : > { %v3005_v52 = vpop.eup %3004  ;;  %1695 = vadd.xlane.f32.xlu1 %v1694_v51 }
 0x61c   : > { %v1691_v21 = vsel %vm1318_vm1, %v3005_v52, 0.0 }
 0x61d   : > { %1692 = vadd.xlane.f32.xlu0 %v1691_v21 }
 0x6a4   : > { %v1696_v32 = vpop.xlane.xlu1 %1695 }
 0x6a5   : > { %3006 = vrcp.f32 %v1696_v32 }
 0x6a6   : > { %v1693_v55 = vpop.xlane.xlu0 %1692 }
 0x6a7   : > { %3008 = vrcp.f32 %v1693_v55  ;;  %v1987_v55 = vld [vmem:[#allocation9 + $0x78] sm:$0xff] }
 0x6b2   : > { %v3007_v56 = vpop.eup %3006 }
 0x6b3   : > { %v1700_v62 = vmul.f32 %v3007_v56, %v3003_v50  ;;  %v2002_v56 = vld [vmem:[#allocation9 + $0xf0] sm:$0xff] }
 0x6b4   : > { %v3009_v59 = vpop.eup %3008 }
 0x6b5   : > { %v1699_v60 = vmul.f32 %v3009_v59, %v3005_v52  ;;  %v2001_v59 = vld [vmem:[#allocation9 + $0xe8] sm:$0xff] }
 0x6b7   : > { %2791 = vmatprep.mubr.msk.f32.mxu0 %vm1318_vm1, %v1699_v60  ;;  %v1985_v60 = vld [vmem:[#allocation9 + $0x68] sm:$0xff] }
 0x6b8   : > { %2792 = vmatmul.mubr.msk.f32.vlgmr.msra.gmra.mxu0 %vm1318_vm1, %v1700_v62  ;;  %v2000_v62 = vld [vmem:[#allocation9 + $0xe0] sm:$0xff] }
 0x6b9   : > { %2795 = vmatpush3.xpose.msra.mxu0 %v3628_v40  ;;  %2798 = vmatprep.mubr.f32.mxu0 %v927_v63  ;;  %v1984_v63 = vld [vmem:[#allocation9 + $0x60] sm:$0xff] }
 0x6ba   : > { %2796 = vmatprep.subr.mxu0 %v3606_v61 }
 0x6bd   : > { %2797 = vmatpush3.xpose.msra.mxu0 %v3606_v61 }
 0x6be   : > { %2678 = vmatprep.subr.mxu0 %v2035_v12  ;;  %v1975_v12 = vld [vmem:[#allocation9 + $0x18] sm:$0xff] }
 0x6c0   : > { %2799 = vmatmul.mubr.f32.vlgmr.msra.gmra.mxu0 %v933_v45  ;;  %v1999_v45 = vld [vmem:[#allocation9 + $0xd8] sm:$0xff] }
 0x6c1   : > { %2679 = vmatpush3.msra.mxu0 %v2019_v15  ;;  %v1990_v15 = vld [vmem:[#allocation9 + $0x90] sm:$0xff] }
 0x6c2   : > { %2680 = vmatprep.subr.mxu0 %v2034_v16  ;;  %v1974_v16 = vld [vmem:[#allocation9 + $0x10] sm:$0xff] }
 0x6c3   : > { %2681 = vmatpush3.msra.mxu0 %v2018_v17  ;;  %v1989_v17 = vld [vmem:[#allocation9 + $0x88] sm:$0xff] }
 0x6c4   : > { %2682 = vmatprep.subr.mxu0 %v2033_v19  ;;  %v1973_v19 = vld [vmem:[#allocation9 + $0x8] sm:$0xff] }
 0x6c5   : > { %2683 = vmatpush3.msra.mxu0 %v2017_v20  ;;  %v1988_v20 = vld [vmem:[#allocation9 + $0x80] sm:$0xff] }
 0x6c6   : > { %2684 = vmatprep.subr.mxu0 %v2032_v23  ;;  %v1972_v23 = vld [vmem:[#allocation9] sm:$0xff] }
 0x6c7   : > { %2685 = vmatpush3.msra.mxu0 %v2016_v24  ;;  %v2021_v24 = vld [vmem:[#allocation9 + $0x188] sm:$0xff] }
 0x6c8   : > { %2686 = vmatprep.subr.mxu0 %v2031_v26  ;;  %v2005_v26 = vld [vmem:[#allocation9 + $0x108] sm:$0xff] }
 0x6c9   : > { %2687 = vmatpush3.msra.mxu0 %v2015_v27  ;;  %v2020_v27 = vld [vmem:[#allocation9 + $0x180] sm:$0xff] }
 0x6ca   : > { %2688 = vmatprep.subr.mxu0 %v2030_v31  ;;  %v2004_v31 = vld [vmem:[#allocation9 + $0x100] sm:$0xff] }
 0x6cb   : > { %2689 = vmatpush3.msra.mxu0 %v2014_v33 }
 0x6cc   : > { %2690 = vmatprep.subr.mxu0 %v2029_v34 }
 0x6cd   : > { %2691 = vmatpush3.msra.mxu0 %v2013_v35 }
 0x6ce   : > { %2692 = vmatprep.subr.mxu0 %v2028_v37  ;;  %v2598_v37 = vld [vmem:[%s3803_s6] ss:$0 sm:$0xff] }
 0x6cf   : > { %2693 = vmatpush3.msra.mxu0 %v2012_v38 }
 0x6d0   : > { %2694 = vmatprep.subr.mxu0 %v2027_v13 }
 0x6d1   : > { %2695 = vmatpush3.msra.mxu0 %v2011_v22 }
 0x6d2   : > { %2696 = vmatprep.subr.mxu0 %v2026_v28 }
 0x6d3   : > { %2697 = vmatpush3.msra.mxu0 %v2010_v29 }
 0x6d4   : > { %2698 = vmatprep.subr.mxu0 %v2025_v18 }
 0x6d5   : > { %2699 = vmatpush3.msra.mxu0 %v2009_v53 }
 0x6d6   : > { %2700 = vmatprep.subr.mxu0 %v2024_v42 }
 0x6d7   : > { %2701 = vmatpush3.msra.mxu0 %v2008_v43 }
 0x6d8   : > { %2702 = vmatprep.subr.mxu0 %v2023_v44  ;;  %v3026_v44 = vld [vmem:[%s3516_s27] sm:$0xff] }
 0x6d9   : > { %2703 = vmatpush3.msra.mxu0 %v2007_v46 }
 0x6da   : > { %2704 = vmatprep.subr.mxu0 %v2022_v30 }
 0x6db   : > { %2705 = vmatpush3.msra.mxu0 %v2006_v48  ;;  %v3027_v48 = vld [vmem:[%s3516_s27 + $0x8] sm:$0xff] }
 0x6dc   : > { %2706 = vmatprep.subr.mxu0 %v2021_v24  ;;  %v3028_v24 = vld [vmem:[%s3798_s1] ss:$0 sm:$0xff] }
 0x6dd   : > { %2707 = vmatpush3.msra.mxu0 %v2005_v26 }
 0x6de   : > { %2708 = vmatprep.subr.mxu0 %v2020_v27 }
 0x6df   : > { %2709 = vmatpush3.msra.mxu0 %v2004_v31 }
 0x778   : > { %v3683_v47 = vpop.f32.mrf.mxu0 }
 0x77a   : > { %v3685_v14 = vpop.f32.mrf.mxu0 }
 0x780   : > { %v2800_v0 = vpop.f32.mrf.mxu0 }
 0x781   : > { %v1862_v2 = vsel %vm1318_vm1, %v2800_v0, -inf }
 0x782   : > { %1863 = vmax.xlane.f32.xlu1 %v1862_v2  ;;  %v1850_v1 = vpop.f32.mrf.mxu0  ;;  %v1998_v2 = vld [vmem:[#allocation9 + $0xd0] sm:$0xff] }
 0x783   : > { %v1859_v3 = vsel %vm1318_vm1, %v1850_v1, -inf }
 0x784   : > { %1860 = vmax.xlane.f32.xlu0 %v1859_v3  ;;  %v1997_v3 = vld [vmem:[#allocation9 + $0xc8] sm:$0xff] }
 0x80b   : > { %v1864_v40 = vpop.xlane.xlu1 %1863 }
 0x80c   : > { %v1866_v4 = vsub.f32 %v2800_v0, %v1864_v40  ;;  %v1983_v0 = vld [vmem:[#allocation9 + $0x58] sm:$0xff]  ;;  %v1981_v40 = vld [vmem:[#allocation9 + $0x48] sm:$0xff] }
 0x80d   : > { %v1861_v5 = vpop.xlane.xlu0 %1860 }
 0x80e   : > { %v1869_v6 = vmul.f32 1.442695, %v1866_v4  ;;  %v1865_v61 = vsub.f32 %v1850_v1, %v1861_v5  ;;  %v1982_v1 = vld [vmem:[#allocation9 + $0x50] sm:$0xff]  ;;  %v1980_v4 = vld [vmem:[#allocation9 + $0x40] sm:$0xff]  ;;  %v1995_v5 = vld [vmem:[#allocation9 + $0xb8] sm:$0xff] }
 0x810   : > { %3010 = vpow2.f32 %v1869_v6  ;;  %v1867_v54 = vmul.f32 1.442695, %v1865_v61  ;;  %v1979_v6 = vld [vmem:[#allocation9 + $0x38] sm:$0xff]  ;;  %v1994_v61 = vld [vmem:[#allocation9 + $0xb0] sm:$0xff] }
 0x812   : > { %3012 = vpow2.f32 %v1867_v54  ;;  %v1978_v54 = vld [vmem:[#allocation9 + $0x30] sm:$0xff] }
 0x81d   : > { %v3689_v7 = vpop.eup %3010 }
 0x81e   : > { %v1874_v8 = vsel %vm1318_vm1, %v3689_v7, 0.0 }
 0x81f   : > { %v3693_v9 = vpop.eup %3012  ;;  %1875 = vadd.xlane.f32.xlu1 %v1874_v8  ;;  %v1977_v8 = vld [vmem:[#allocation9 + $0x28] sm:$0xff] }
 0x820   : > { %v1871_v10 = vsel %vm1318_vm1, %v3693_v9, 0.0 }
 0x821   : > { %1872 = vadd.xlane.f32.xlu0 %v1871_v10  ;;  %v1976_v10 = vld [vmem:[#allocation9 + $0x20] sm:$0xff] }
 0x8a8   : > { %v1876_v49 = vpop.xlane.xlu1 %1875 }
 0x8a9   : > { %3014 = vrcp.f32 %v1876_v49 }
 0x8aa   : > { %v1873_v50 = vpop.xlane.xlu0 %1872 }
 0x8ab   : > { %3016 = vrcp.f32 %v1873_v50  ;;  %v2238_v50 = vld [vmem:[#allocation11 + $0x78] sm:$0xff] }
 0x8b6   : > { %v3015_v51 = vpop.eup %3014 }
 0x8b7   : > { %v1880_v32 = vmul.f32 %v3015_v51, %v3689_v7  ;;  %v1993_v7 = vld [vmem:[#allocation9 + $0xa8] sm:$0xff]  ;;  %v2237_v51 = vld [vmem:[#allocation11 + $0x70] sm:$0xff] }
 0x8b8   : > { %v3017_v52 = vpop.eup %3016 }
 0x8b9   : > { %v1879_v21 = vmul.f32 %v3017_v52, %v3693_v9  ;;  %v1992_v9 = vld [vmem:[#allocation9 + $0xa0] sm:$0xff] }
 0x8bb   : > { %2805 = vmatprep.mubr.msk.f32.mxu1 %vm1318_vm1, %v1879_v21 }
 0x8bc   : > { %2806 = vmatmul.mubr.msk.f32.vlgmr.msra.gmra.mxu1 %vm1318_vm1, %v1880_v32 }
 0x8bd   : > { %2641 = vmatpush3.msra.mxu1 %v1987_v55  ;;  %2107 = vmatprep.mubr.f32.mxu1 %v3667_v41  ;;  %v1996_v41 = vld [vmem:[#allocation9 + $0xc0] sm:$0xff] }
 0x8be   : > { %2642 = vmatprep.subr.mxu1 %v2002_v56 }
 0x8bf   : > { %2643 = vmatpush3.msra.mxu1 %v1986_v58 }
 0x8c0   : > { %2644 = vmatprep.subr.mxu1 %v2001_v59 }
 0x8c1   : > { %2645 = vmatpush3.msra.mxu1 %v1985_v60 }
 0x8c2   : > { %2646 = vmatprep.subr.mxu1 %v2000_v62 }
 0x8c3   : > { %2647 = vmatpush3.msra.mxu1 %v1984_v63 }
 0x8c4   : > { %2648 = vmatprep.subr.mxu1 %v1999_v45  ;;  %v2236_v45 = vld [vmem:[#allocation11 + $0x68] sm:$0xff] }
 0x8c5   : > { %2649 = vmatpush3.msra.mxu1 %v1983_v0  ;;  %v2235_v0 = vld [vmem:[#allocation11 + $0x60] sm:$0xff] }
 0x8c6   : > { %2650 = vmatprep.subr.mxu1 %v1998_v2  ;;  %v2234_v2 = vld [vmem:[#allocation11 + $0x58] sm:$0xff] }
 0x8c7   : > { %2651 = vmatpush3.msra.mxu1 %v1982_v1  ;;  %v2233_v1 = vld [vmem:[#allocation11 + $0x50] sm:$0xff] }
 0x8c8   : > { %2652 = vmatprep.subr.mxu1 %v1997_v3  ;;  %v2232_v3 = vld [vmem:[#allocation11 + $0x48] sm:$0xff] }
 0x8c9   : > { %2653 = vmatpush3.msra.mxu1 %v1981_v40  ;;  %v2230_v40 = vld [vmem:[#allocation11 + $0x38] sm:$0xff] }
 0x8ca   : > { %2654 = vmatprep.subr.mxu1 %v1996_v41  ;;  %v2229_v41 = vld [vmem:[#allocation11 + $0x30] sm:$0xff] }
 0x8cb   : > { %2655 = vmatpush3.msra.mxu1 %v1980_v4  ;;  %v2228_v4 = vld [vmem:[#allocation11 + $0x28] sm:$0xff] }
 0x8cc   : > { %2656 = vmatprep.subr.mxu1 %v1995_v5  ;;  %v2227_v5 = vld [vmem:[#allocation11 + $0x20] sm:$0xff] }
 0x8cd   : > { %2657 = vmatpush3.msra.mxu1 %v1979_v6  ;;  %v2226_v6 = vld [vmem:[#allocation11 + $0x18] sm:$0xff] }
 0x8ce   : > { %2658 = vmatprep.subr.mxu1 %v1994_v61  ;;  %v2225_v61 = vld [vmem:[#allocation11 + $0x10] sm:$0xff] }
 0x8cf   : > { %2659 = vmatpush3.msra.mxu1 %v1978_v54  ;;  %v2224_v54 = vld [vmem:[#allocation11 + $0x8] sm:$0xff] }
 0x8d0   : > { %2660 = vmatprep.subr.mxu1 %v1993_v7  ;;  %v2223_v7 = vld [vmem:[#allocation11] sm:$0xff] }
 0x8d1   : > { %2661 = vmatpush3.msra.mxu1 %v1977_v8  ;;  %v2346_v8 = vld [vmem:[#allocation12 + $0x78] sm:$0xff] }
 0x8d2   : > { %2662 = vmatprep.subr.mxu1 %v1992_v9  ;;  %v2345_v9 = vld [vmem:[#allocation12 + $0x70] sm:$0xff]  ;;  %2843 = vmatprep.subr.mxu0 %v2346_v8 }
 0x8d3   : > { %2663 = vmatpush3.msra.mxu1 %v1976_v10  ;;  %v2344_v10 = vld [vmem:[#allocation12 + $0x68] sm:$0xff] }
 0x8d4   : > { %2664 = vmatprep.subr.mxu1 %v1991_v11 }
 0x8d5   : > { %2665 = vmatpush3.msra.mxu1 %v1975_v12 }
 0x8d6   : > { %2666 = vmatprep.subr.mxu1 %v1990_v15 }
 0x8d7   : > { %2667 = vmatpush3.msra.mxu1 %v1974_v16 }
 0x8d8   : > { %2668 = vmatprep.subr.mxu1 %v1989_v17 }
 0x8d9   : > { %2669 = vmatpush3.msra.mxu1 %v1973_v19 }
 0x8da   : > { %2670 = vmatprep.subr.mxu1 %v1988_v20 }
 0x8db   : > { %2671 = vmatpush3.msra.mxu1 %v1972_v23 }
 0x8dc   : > { %2108 = vmatmul.mubr.f32.vlgmr.msra.gmra.mxu1 %v3663_v57  ;;  %2808 = vmatprep.subr.mxu1 %v2238_v50 }
 0x8dd   : > { %2112 = vmatprep.mubr.f32.mxu1 %v3665_v39  ;;  %2809 = vmatpush3.msra.mxu1 %v2238_v50 }
 0x8de   : > { %2810 = vmatprep.subr.mxu1 %v2237_v51 }
 0x8df   : > { %2811 = vmatpush3.msra.mxu1 %v2237_v51 }
 0x8e0   : > { %2113 = vmatmul.mubr.f32.gmra.mxu1 %v3661_v36  ;;  %2812 = vmatprep.subr.mxu1 %v2236_v45 }
 0x8e1   : > { %2813 = vmatpush3.msra.mxu1 %v2236_v45 }
 0x8e2   : > { %2814 = vmatprep.subr.mxu1 %v2235_v0 }
 0x8e3   : > { %2815 = vmatpush3.msra.mxu1 %v2235_v0 }
 0x8e4   : > { %2816 = vmatprep.subr.mxu1 %v2234_v2 }
 0x8e5   : > { %2817 = vmatpush3.msra.mxu1 %v2234_v2 }
 0x8e6   : > { %2818 = vmatprep.subr.mxu1 %v2233_v1 }
 0x8e7   : > { %2819 = vmatpush3.msra.mxu1 %v2233_v1 }
 0x8e8   : > { %2820 = vmatprep.subr.mxu1 %v2232_v3 }
 0x8e9   : > { %2821 = vmatpush3.msra.mxu1 %v2232_v3 }
 0x97c   : > { %v2807_v33 = vpop.f32.mrf.mxu1 }
 0x97e   : > { %v1953_v34 = vpop.f32.mrf.mxu1 }
 0x97f   : > { %2182 = vmatprep.mubr.f32.mxu0 %v1953_v34 }
 0x980   : > { %2183 = vmatmul.mubr.f32.vlgmr.msra.gmra.mxu0 %v3685_v14 }
 0x981   : > { %2187 = vmatprep.mubr.f32.mxu0 %v2807_v33  ;;  %2844 = vmatpush3.msra.mxu0 %v2346_v8  ;;  %v3029_v33 = vld [vmem:[%s3799_s2] ss:$0 sm:$0xff] }
 0x982   : > { %2845 = vmatprep.subr.mxu0 %v2345_v9 }
 0x983   : > { %2846 = vmatpush3.msra.mxu0 %v2345_v9 }
 0x984   : > { %2188 = vmatmul.mubr.f32.gmra.mxu0 %v3683_v47  ;;  %2847 = vmatprep.subr.mxu0 %v2344_v10 }
 0x985   : > { %2848 = vmatpush3.msra.mxu0 %v2344_v10 }
 0x99c   : > { %v2672_v57 = vpop.f32.mrf.mxu1 }
 0x99e   : > { %v2673_v39 = vpop.f32.mrf.mxu1 }
 0x99f   : > { %v2674_v35 = vadd.f32 %v2673_v39, %v2672_v57 }
 0x9a0   : > { %v2675_v36 = vpop.f32.mrf.mxu1 }
 0x9a1   : > { %v2110_v28 = vadd.f32 %v2674_v35, %v2598_v37  ;;  %v2342_v35 = vld [vmem:[#allocation12 + $0x58] sm:$0xff] }
 0x9a2   : > { %v2676_v38 = vpop.f32.mrf.mxu1 }
 0x9a3   : > { %v2677_v29 = vadd.f32 %v2676_v38, %v2675_v36  ;;  %v2343_v36 = vld [vmem:[#allocation12 + $0x60] sm:$0xff]  ;;  %v2340_v38 = vld [vmem:[#allocation12 + $0x48] sm:$0xff] }
 0x9a4   : > { %2849 = vmatprep.subr.mxu0 %v2343_v36 }
 0x9a5   : > { %v2115_v47 = vadd.f32 %v2677_v29, %v2598_v37  ;;  %2850 = vmatpush3.msra.mxu0 %v2343_v36  ;;  %v2341_v37 = vld [vmem:[#allocation12 + $0x50] sm:$0xff]  ;;  %v2336_v29 = vld [vmem:[#allocation12 + $0x28] sm:$0xff] }
 0x9a6   : > { %2851 = vmatprep.subr.mxu0 %v2342_v35 }
 0x9a7   : > { %2852 = vmatpush3.msra.mxu0 %v2342_v35 }
 0x9a8   : > { %2853 = vmatprep.subr.mxu0 %v2341_v37 }
 0x9a9   : > { %2854 = vmatpush3.msra.mxu0 %v2341_v37 }
 0x9aa   : > { %2855 = vmatprep.subr.mxu0 %v2340_v38 }
 0x9ab   : > { %2856 = vmatpush3.msra.mxu0 %v2340_v38 }
 0xa40   : > { %v2710_v13 = vpop.f32.mrf.mxu0 }
 0xa42   : > { %v2711_v22 = vpop.f32.mrf.mxu0 }
 0xa43   : > { %v2712_v18 = vadd.f32 %v2711_v22, %v2710_v13  ;;  %v2339_v13 = vld [vmem:[#allocation12 + $0x40] sm:$0xff]  ;;  %v2338_v22 = vld [vmem:[#allocation12 + $0x38] sm:$0xff] }
 0xa44   : > { %v2713_v14 = vpop.f32.mrf.mxu0  ;;  %2857 = vmatprep.subr.mxu0 %v2339_v13 }
 0xa45   : > { %v2185_v53 = vadd.f32 %v2712_v18, %v2110_v28  ;;  %2858 = vmatpush3.msra.mxu0 %v2339_v13  ;;  %v2337_v28 = vld [vmem:[#allocation12 + $0x30] sm:$0xff]  ;;  %v2335_v18 = vld [vmem:[#allocation12 + $0x20] sm:$0xff] }
 0xa46   : > { %v2714_v42 = vpop.f32.mrf.mxu0  ;;  %2859 = vmatprep.subr.mxu0 %v2338_v22 }
 0xa47   : > { %v2715_v43 = vadd.f32 %v2714_v42, %v2713_v14  ;;  %v3711_v46 = vadd.f32 %v3026_v44, %v2185_v53  ;;  %2860 = vmatpush3.msra.mxu0 %v2338_v22  ;;  %v2334_v14 = vld [vmem:[#allocation12 + $0x18] sm:$0xff]  ;;  %v2333_v53 = vld [vmem:[#allocation12 + $0x10] sm:$0xff]  ;;  %v2332_v42 = vld [vmem:[#allocation12 + $0x8] sm:$0xff] }
 0xa48   : > { %2861 = vmatprep.subr.mxu0 %v2337_v28 }
 0xa49   : > { %v2190_v30 = vadd.f32 %v2715_v43, %v2115_v47  ;;  %2195 = vadd.xlane.f32.xlu0 %v3711_v46  ;;  %2862 = vmatpush3.msra.mxu0 %v2337_v28  ;;  %v2331_v47 = vld [vmem:[#allocation12] sm:$0xff]  ;;  %v2599_v43 = vld [vmem:[%s3805_s8] ss:$0 sm:$0xff] }
 0xa4a   : > { %2863 = vmatprep.subr.mxu0 %v2336_v29 }
 0xa4b   : > { %v3715_v49 = vadd.f32 %v3027_v48, %v2190_v30  ;;  %2864 = vmatpush3.msra.mxu0 %v2336_v29 }
 0xa4c   : > { %2865 = vmatprep.subr.mxu0 %v2335_v18 }
 0xa4d   : > { %2197 = vadd.xlane.f32.xlu1 %v3715_v49  ;;  %2866 = vmatpush3.msra.mxu0 %v2335_v18 }
 0xa4e   : > { %2867 = vmatprep.subr.mxu0 %v2334_v14 }
 0xa4f   : > { %2868 = vmatpush3.msra.mxu0 %v2334_v14 }
 0xa50   : > { %2869 = vmatprep.subr.mxu0 %v2333_v53 }
 0xa51   : > { %2870 = vmatpush3.msra.mxu0 %v2333_v53 }
 0xa52   : > { %2871 = vmatprep.subr.mxu0 %v2332_v42 }
 0xa53   : > { %2872 = vmatpush3.msra.mxu0 %v2332_v42 }
 0xa54   : > { %2873 = vmatprep.subr.mxu0 %v2331_v47 }
 0xa55   : > { %2874 = vmatpush3.msra.mxu0 %v2331_v47 }
 0xad2   : > { %v2196_v52 = vpop.xlane.xlu0 %2195 }
 0xad3   : > { %v2199_v21 = vmul.f32 0.03125, %v2196_v52 }
 0xad5   : > { %v2201_v32 = vsub.f32 %v3711_v46, %v2199_v21 }
 0xad6   : > { %v2198_v55 = vpop.xlane.xlu1 %2197 }
 0xad7   : > { %v2200_v56 = vmul.f32 0.03125, %v2198_v55  ;;  %v3720_v58 = vmul.f32 %v3540_v25, %v2201_v32 }
 0xad9   : > { %v2202_v59 = vsub.f32 %v3715_v49, %v2200_v56  ;;  %v2205_v60 = vmul.f32 %v3720_v58, %v3720_v58 }
 0xadb   : > { %2207 = vadd.xlane.f32.xlu0 %v2205_v60  ;;  %v3726_v62 = vmul.f32 %v3540_v25, %v2202_v59  ;;  %v2231_v25 = vld [vmem:[#allocation11 + $0x40] sm:$0xff] }
 0xadc   : > { %2822 = vmatprep.subr.mxu1 %v2231_v25 }
 0xadd   : > { %v2206_v63 = vmul.f32 %v3726_v62, %v3726_v62  ;;  %2823 = vmatpush3.msra.mxu1 %v2231_v25 }
 0xade   : > { %2824 = vmatprep.subr.mxu1 %v2230_v40 }
 0xadf   : > { %2209 = vadd.xlane.f32.xlu1 %v2206_v63  ;;  %2825 = vmatpush3.msra.mxu1 %v2230_v40  ;;  %v2600_v63 = vld [vmem:[%s3807_s10] ss:$0 sm:$0xff] }
 0xae0   : > { %2826 = vmatprep.subr.mxu1 %v2229_v41 }
 0xae1   : > { %2827 = vmatpush3.msra.mxu1 %v2229_v41 }
 0xae2   : > { %2828 = vmatprep.subr.mxu1 %v2228_v4 }
 0xae3   : > { %2829 = vmatpush3.msra.mxu1 %v2228_v4 }
 0xae4   : > { %2830 = vmatprep.subr.mxu1 %v2227_v5 }
 0xae5   : > { %2831 = vmatpush3.msra.mxu1 %v2227_v5 }
 0xae6   : > { %2832 = vmatprep.subr.mxu1 %v2226_v6 }
 0xae7   : > { %2833 = vmatpush3.msra.mxu1 %v2226_v6 }
 0xae8   : > { %2834 = vmatprep.subr.mxu1 %v2225_v61 }
 0xae9   : > { %2835 = vmatpush3.msra.mxu1 %v2225_v61 }
 0xaea   : > { %2836 = vmatprep.subr.mxu1 %v2224_v54 }
 0xaeb   : > { %2837 = vmatpush3.msra.mxu1 %v2224_v54 }
 0xaec   : > { %2838 = vmatprep.subr.mxu1 %v2223_v7 }
 0xaed   : > { %2839 = vmatpush3.msra.mxu1 %v2223_v7 }
 0xb64   : > { %v2208_v11 = vpop.xlane.xlu0 %2207 }
 0xb65   : > { %v2211_v12 = vmul.f32 0.03125, %v2208_v11 }
 0xb67   : > { %v2213_v15 = vadd.f32 1e-05, %v2211_v12 }
 0xb68   : > { %v2210_v16 = vpop.xlane.xlu1 %2209 }
 0xb69   : > { %3018 = vrsqrt.f32 %v2213_v15  ;;  %v2212_v17 = vmul.f32 0.03125, %v2210_v16 }
 0xb6b   : > { %v2214_v19 = vadd.f32 1e-05, %v2212_v17 }
 0xb6d   : > { %3020 = vrsqrt.f32 %v2214_v19 }
 0xb76   : > { %v3019_v20 = vpop.eup %3018 }
 0xb77   : > { %v2217_v23 = vmul.f32 %v3019_v20, %v3720_v58 }
 0xb79   : > { %v2219_v26 = vmul.f32 %v3028_v24, %v2217_v23 }
 0xb7a   : > { %v3021_v27 = vpop.eup %3020 }
 0xb7b   : > { %v2218_v31 = vmul.f32 %v3021_v27, %v3726_v62  ;;  %v2221_v34 = vadd.f32 %v3029_v33, %v2219_v26 }
 0xb7d   : > { %2840 = vmatprep.mubr.f32.mxu1 %v2221_v34  ;;  %v2220_v57 = vmul.f32 %v3028_v24, %v2218_v31 }
 0xb7f   : > { %v2222_v39 = vadd.f32 %v3029_v33, %v2220_v57 }
 0xb81   : > { %2841 = vmatmul.mubr.f32.vlgmr.msra.gmra.mxu1 %v2222_v39 }
 0xc41   : > { %v2842_v44 = vpop.f32.mrf.mxu1 }
 0xc42   : > { %v2318_v30 = vadd.f32 %v2842_v44, %v2599_v43 }
 0xc43   : > { %v2312_v48 = vpop.f32.mrf.mxu1 }
 0xc44   : > { %v2324_v50 = vmul.f32 0.70710677, %v2318_v30  ;;  %v2313_v51 = vadd.f32 %v2599_v43, %v2312_v48  ;;  %v2322_v59 = vmul.f32 0.5, %v2318_v30 }
 0xc46   : > { %3022 = verf.f32 %v2324_v50  ;;  %v2323_v52 = vmul.f32 0.70710677, %v2313_v51  ;;  %v2321_v56 = vmul.f32 0.5, %v2313_v51 }
 0xc48   : > { %3024 = verf.f32 %v2323_v52 }
 0xc53   : > { %v3023_v21 = vpop.eup %3022 }
 0xc54   : > { %v2328_v55 = vadd.f32 1.0, %v3023_v21 }
 0xc55   : > { %v3025_v32 = vpop.eup %3024 }
 0xc56   : > { %v2327_v58 = vadd.f32 1.0, %v3025_v32  ;;  %v2330_v62 = vmul.f32 %v2328_v55, %v2322_v59 }
 0xc58   : > { %v2329_v60 = vmul.f32 %v2327_v58, %v2321_v56 }
 0xc5a   : > { %2875 = vmatprep.mubr.f32.mxu0 %v2329_v60 }
 0xc5b   : > { %2876 = vmatmul.mubr.f32.vlgmr.msra.gmra.mxu0 %v2330_v62 }
 0xd1b   : > { %v2877_v45 = vpop.f32.mrf.mxu0 }
 0xd1c   : > { %v2426_v0 = vadd.f32 %v2877_v45, %v2600_v63 }
 0xd1d   : > { %v2420_v2 = vpop.f32.mrf.mxu0 }
 0xd1e   : > { %v2430_v1 = vadd.f32 %v2426_v0, %v3715_v49  ;;  %v2421_v3 = vadd.f32 %v2600_v63, %v2420_v2 }
 0xd20   : > { %2432 = vst [vmem:[%s475_s4 + $0x8] sm:$0xff] %v2430_v1  ;;  %v2429_v25 = vadd.f32 %v2421_v3, %v3711_v46 }
 0xd22   : > { %2431 = vst [vmem:[%s475_s4] sm:$0xff] %v2429_v25 }
 0xd23   : > { %3201 = shalt.err (!%p3198_p3)
}
 0xd24   : > { %s3202_s26 = scalar_lea.hbm %s3753_s21, 256  ;;  %s3206_s3 = scalar_lea.hbm %s3808_s11, 512 }
 0xd25   : > { %p3203_p4 = scmp.ne.s32.totalorder %s3753_s21, %s3202_s26  ;;  %p3207_p2 = scmp.lt.s32.totalorder %s3753_s21, %s3808_s11 }
 0xd26   : > { %p3208_p7 = scmp.lt.s32.totalorder %s3206_s3, %s3202_s26 }
 0xd27   : > { %p3204_p12 = pnand %p3203_p4, %p3842_p11 }
 0xd28   : > { %p3209_p8 = por %p3208_p7, %p3207_p2 }
 0xd29   : > { %p3205_p6 = pneg %p3204_p12 }
 0xd2b   : > { %p3210_p10 = pnand %p3209_p8, %p3205_p6 }
 0xd2d   : > { %3213 = shalt.err (!%p3210_p10)
}
 0xd2e   : > { %s3278_s29 = smov 128   ;;  %s3279_s28 = smov 8  }
 0xd2f   : > { %2900 = dma.vmem_to_hbm [thread:$0]  (%p3842_p11), %s3748_s24, 256, %s3753_s21, %s2434_s9, %s3278_s29, %s3278_s29, %s3279_s28  }
 0xd30 PF: > { %s2462_s23 = sand.u32 1, %s3252_s17   ;;  %p3843_p0 = scmp.ne.s32.totalorder %s3830_s14, 0 }
 0xd31   : > { %p3844_p13 = scmp.ge.s32.totalorder %s3264_s20, 2  ;;  %s2463_s13 = scalar_lea.sflag [#allocation5], %s2462_s23 }
 0xd33   : > { %p2923_p5 = pnand %p3844_p13, %p3843_p0 }
 0xd35   : > { %p2924_p9 = pneg %p2923_p5 }
 0xd37   : > { %3247 = dma.done.wait (%p2924_p9), %s2463_s13, 256  }
 0xd38   : > { %3249 = vsyncadd (%p2924_p9), %s2463_s13, 4294967040  ;;  %p27_p1 = scmp.ge.s32.totalorder %s3441_s30, 4   ;;  %s3845_s17 = smov %s3256_s18 }
 0xd39   : > { %s3846_s18 = smov %s3260_s19  ;;  %s3847_s19 = smov %s3453_s12 }
 0xd3a   : > { %s3848_s20 = smov %s3441_s30  ;;  %29 = sbr.rel (!%p27_p1) target bundleno = 14 (0xe), region = 129 }
 0xd3f   :  { %2468 = vsyncpa [#allocation4], 1 }
 0xd40   :  { %2470 = vsyncpa [#allocation4 + $0x1], 1 }
 0xd41   :  { %2471 = vsyncpa [#allocation7], 1 }
 0xd42   :  { %2472 = vsyncpa [#allocation10], 1 }
 0xd43   :  { %2473 = vsyncpa [#allocation13], 1 }
 0xd44   :  { %2474 = vsyncpa [#allocation5], 1 }
 0xd45   :  { %2476 = vsyncpa [#allocation5 + $0x1], 1 }

// kernel: tpu_custom_call.1
= control target key start
LH: loop header
LB: loop body
LE: loop exit
PB: predicated region body
PF: predicated region fallthrough
CT: control target
= control target key end

     0   :  { %s3797_s0 = inlined_call_operand.hbm [shape: f32[2,16,128], index: 0, kind: input, shape index: {}]   ;;  %s3798_s1 = inlined_call_operand.vmem [shape: f32[1,128], index: 1, kind: input, shape index: {}]   ;;  %s3799_s2 = inlined_call_operand.vmem [shape: f32[1,128], index: 2, kind: input, shape index: {}]   ;;  %s3800_s3 = inlined_call_operand.hbm [shape: f32[128,1536], index: 3, kind: input, shape index: {}]   ;;  %s3801_s4 = inlined_call_operand.hbm [shape: f32[1,1536], index: 4, kind: input, shape index: {}]   ;;  %s3802_s5 = inlined_call_operand.hbm [shape: f32[512,128], index: 5, kind: input, shape index: {}]   ;;  %s3803_s6 = inlined_call_operand.vmem [shape: f32[1,128], index: 6, kind: input, shape index: {}]   ;;  %s3804_s7 = inlined_call_operand.hbm [shape: f32[128,128], index: 7, kind: input, shape index: {}]   ;;  %s3805_s8 = inlined_call_operand.vmem [shape: f32[1,128], index: 8, kind: input, shape index: {}]   ;;  %s3806_s9 = inlined_call_operand.hbm [shape: f32[128,128], index: 9, kind: input, shape index: {}]   ;;  %s3807_s10 = inlined_call_operand.vmem [shape: f32[1,128], index: 10, kind: input, shape index: {}]   ;;  %s3808_s11 = inlined_call_operand.hbm [shape: f32[2,16,128], index: 11, kind: output, shape index: {}]  }
   0x1   :  { %3815 = sst [smem:[#allocation20_spill]] %s3800_s3 }
   0x2   :  { %3816 = sst [smem:[#allocation21_spill]] %s3801_s4 }
   0x3   :  { %3817 = sst [smem:[#allocation22_spill]] %s3802_s5 }
   0x4   :  { %3818 = sst [smem:[#allocation23_spill]] %s3804_s7 }
   0x5   :  { %3819 = sst [smem:[#allocation24_spill]] %s3806_s9 }
   0x6   :  { %16 = vsyncpa [#allocation4], 0 }
   0x7   :  { %18 = vsyncpa [#allocation4 + $0x1], 0 }
   0x8   :  { %19 = vsyncpa [#allocation7], 0 }
   0x9   :  { %20 = vsyncpa [#allocation10], 0 }
   0xa   :  { %21 = vsyncpa [#allocation13], 0 }
   0xb   :  { %22 = vsyncpa [#allocation5], 0 }
   0xc   :  { %24 = vsyncpa [#allocation5 + $0x1], 0  ;;  %s3340_s17 = smov 0   ;;  %s3342_s18 = smov 0  }
   0xd   :  { %s3344_s19 = smov 0   ;;  %s3346_s20 = smov 0  }
   0xe LB: > { %s3266_s21 = smov [#allocation6]   ;;  %s3361_s23 = sadd.s32 4294967295, %s3264_s20   ;;  %s3264_s20 = sphi %s3346_s20, %s3848_s20   ;;  %s3260_s19 = sphi %s3344_s19, %s3847_s19   ;;  %s3256_s18 = sphi %s3342_s18, %s3846_s18   ;;  %s3252_s17 = sphi %s3340_s17, %s3845_s17  }
   0xf   : > { %s315_s22 = sshll.u32 %s3266_s21, 4  ;;  %p2569_p0 = scmp.ge.s32.totalorder %s3264_s20, 1  ;;  %s316_s22 = int_to_ptr.vmem [resolvable:$true] %s315_s22 }
  0x10   : > { %p3811_p1 = scmp.eq.s32.totalorder %s3361_s23, 0  ;;  %p297_p2 = scmp.lt.s32.totalorder %s3264_s20, 3 }
  0x11   : > { %s3267_s25 = smov [#allocation9]   ;;  %s3268_s28 = smov [#allocation8]  }
  0x12   : > { %p3366_p3 = pnand %p2569_p0, %p297_p2  ;;  %s339_s26 = sshll.u32 %s3267_s25, 4  ;;  %s3379_s26 = int_to_ptr.vmem [resolvable:$true] %s339_s26 }
  0x13   : > { %s3381_s29 = sshll.u32 %s3268_s28, 4  ;;  %s3041_s12 = scalar_lea.vmem %s316_s22, 24576  ;;  %s330_s29 = int_to_ptr.vmem [resolvable:$true] %s3381_s29 }
  0x14   : > { %s3820_s24 = scalar_select %p3366_p3, 1, 0 }
  0x15   : > { %p2902_p5 = pneg %p3366_p3  ;;  %p3042_p8 = scmp.ne.s32.totalorder %s316_s22, %s3041_s12 }
  0x16   : > { %p3049_p11 = scmp.lt.s32.totalorder %s316_s22, %s316_s22  ;;  %p3050_p12 = scmp.lt.s32.totalorder %s3041_s12, %s3041_s12 }
  0x17   : > { %p3375_p6 = pnand %p2902_p5, %p3811_p1 }
  0x18   : > { %p3051_p13 = por %p3050_p12, %p3049_p11 }
  0x19   : > { %p3385_p7 = pneg %p3375_p6 }
  0x1b   : > { %p3044_p9 = pnand %p3042_p8, %p3385_p7 }
  0x1d   : > { %p3045_p10 = pneg %p3044_p9 }
  0x1f   : > { %p3052_p0 = pnand %p3051_p13, %p3045_p10 }
  0x21   : > { %3055 = shalt.err (!%p3052_p0)
}
  0x22   : > { %s3269_s13 = smov 1536   ;;  %s3270_s14 = smov 96  }
  0x23   : > { %s3823_s3 = sld [smem:[#allocation20_spill]]  ;;  %s3067_s21 = scalar_lea.vmem %s3379_s26, 8192 }
  0x24   : > { %p3068_p2 = scmp.ne.s32.totalorder %s3379_s26, %s3067_s21  ;;  %p3075_p9 = scmp.lt.s32.totalorder %s3379_s26, %s3379_s26 }
  0x25   : > { %p3076_p10 = scmp.lt.s32.totalorder %s3067_s21, %s3067_s21 }
  0x26   : > { %p3070_p5 = pnand %p3068_p2, %p3385_p7 }
  0x27   : > { %p3077_p11 = por %p3076_p10, %p3075_p9 }
  0x28   : > { %p3071_p8 = pneg %p3070_p5 }
  0x29   : > { %2905 = dma.hbm_to_vmem [thread:$0]  (!%p3375_p6), %s3823_s3, 24576, %s316_s22, [#allocation7], %s3269_s13, %s3269_s13, %s3270_s14  }
  0x2a   : > { %p3078_p12 = pnand %p3077_p11, %p3071_p8 }
  0x2c   : > { %3081 = shalt.err (!%p3078_p12)
}
  0x2d   : > { %s3809_s25 = smov 128   ;;  %s3810_s28 = smov 8  }
  0x2e   : > { %s3824_s5 = sld [smem:[#allocation22_spill]]  ;;  %s3093_s13 = scalar_lea.vmem %s330_s29, 192 }
  0x2f   : > { %p3094_p13 = scmp.ne.s32.totalorder %s330_s29, %s3093_s13  ;;  %p3101_p5 = scmp.lt.s32.totalorder %s330_s29, %s330_s29 }
  0x30   : > { %p3102_p8 = scmp.lt.s32.totalorder %s3093_s13, %s3093_s13 }
  0x31   : > { %p3096_p0 = pnand %p3094_p13, %p3385_p7 }
  0x32   : > { %p3103_p9 = por %p3102_p8, %p3101_p5 }
  0x33   : > { %p3097_p2 = pneg %p3096_p0 }
  0x34   : > { %2911 = dma.hbm_to_vmem [thread:$0]  (!%p3375_p6), %s3824_s5, 8192, %s3379_s26, [#allocation10], %s3809_s25, %s3809_s25, %s3810_s28  }
  0x35   : > { %p3104_p10 = pnand %p3103_p9, %p3097_p2 }
  0x37   : > { %3107 = shalt.err (!%p3104_p10)
}
  0x38   : > { %s3825_s4 = sld [smem:[#allocation21_spill]]  ;;  %s3273_s16 = smov [#allocation11]  }
  0x39   : > { %s355_s26 = sshll.u32 %s3273_s16, 4  ;;  %s3274_s21 = smov [#allocation12]   ;;  %s356_s26 = int_to_ptr.vmem [resolvable:$true] %s355_s26 }
  0x3a   : > { %s371_s22 = sshll.u32 %s3274_s21, 4  ;;  %s3119_s12 = scalar_lea.vmem %s356_s26, 2048  ;;  %s372_s22 = int_to_ptr.vmem [resolvable:$true] %s371_s22 }
  0x3b   : > { %p3120_p11 = scmp.ne.s32.totalorder %s356_s26, %s3119_s12  ;;  %p3127_p0 = scmp.lt.s32.totalorder %s356_s26, %s356_s26 }
  0x3c   : > { %p3128_p2 = scmp.lt.s32.totalorder %s3119_s12, %s3119_s12 }
  0x3d   : > { %p3122_p12 = pnand %p3120_p11, %p3385_p7 }
  0x3e   : > { %2908 = dma.hbm_to_vmem [thread:$0]  (!%p3375_p6), %s3825_s4, 192, %s330_s29, [#allocation7]  }
  0x3f   : > { %p3123_p13 = pneg %p3122_p12  ;;  %p3129_p5 = por %p3128_p2, %p3127_p0 }
  0x41   : > { %p3130_p8 = pnand %p3129_p5, %p3123_p13 }
  0x43   : > { %3133 = shalt.err (!%p3130_p8)
}
  0x44   : > { %s3826_s7 = sld [smem:[#allocation23_spill]]  ;;  %s3145_s14 = scalar_lea.vmem %s372_s22, 2048 }
  0x45   : > { %p3146_p9 = scmp.ne.s32.totalorder %s372_s22, %s3145_s14  ;;  %p3153_p12 = scmp.lt.s32.totalorder %s372_s22, %s372_s22 }
  0x46   : > { %p3154_p0 = scmp.lt.s32.totalorder %s3145_s14, %s3145_s14 }
  0x47   : > { %p3148_p10 = pnand %p3146_p9, %p3385_p7 }
  0x48   : > { %p3155_p13 = por %p3154_p0, %p3153_p12 }
  0x49   : > { %p3149_p11 = pneg %p3148_p10 }
  0x4a   : > { %2914 = dma.hbm_to_vmem [thread:$0]  (!%p3375_p6), %s3826_s7, 2048, %s356_s26, [#allocation10], %s3809_s25, %s3809_s25, %s3810_s28  }
  0x4b   : > { %p3156_p2 = pnand %p3155_p13, %p3149_p11 }
  0x4d   : > { %3159 = shalt.err (!%p3156_p2)
}
  0x4e   : > { %s3827_s9 = sld [smem:[#allocation24_spill]]  ;;  %s2568_s27 = sadd.s32 4294967294, %s3264_s20  }
  0x4f   : > { %s3441_s30 = sadd.s32 1, %s3264_s20   ;;  %s37_s26 = sadd.s32 1, %s3260_s19 }
  0x50   : > { %s34_s21 = ssub.s32 %s3264_s20, %s3441_s30  ;;  %p44_p7 = scmp.ne.s32.totalorder %s3260_s19, %s3256_s18 }
  0x51   : > { %p35_p5 = scmp.eq.s32.totalorder %s34_s21, 0  ;;  %p45_p8 = scmp.eq.s32.totalorder %s3264_s20, 0 }
  0x52   : > { %p50_p9 = scmp.ne.s32.totalorder %s3256_s18, %s3252_s17  ;;  %p284_p10 = scmp.eq.s32.totalorder %s3361_s23, 1 }
  0x53   : > { %s3453_s12 = scalar_select %p35_p5, %s3260_s19, %s37_s26  }
  0x54   : > { %2917 = dma.hbm_to_vmem [thread:$0]  (!%p3375_p6), %s3827_s9, 2048, %s372_s22, [#allocation13], %s3809_s25, %s3809_s25, %s3810_s28  }
  0x55   : > { %p46_p11 = por %p45_p8, %p44_p7  ;;  %p3457_p12 = por %p3811_p1, %p50_p9 }
  0x56   : > { %p3461_p6 = por %p284_p10, %p44_p7  ;;  %p290_p0 = scmp.eq.s32.totalorder %s2568_s27, 1 }
  0x57   : > { %s3828_s29 = scalar_select %p3457_p12, 1, 0 }
  0x58   : > { %s3829_s22 = scalar_select %p3461_p6, 1, 0 }
  0x59   : > { %p2931_p13 = scmp.lt.s32.totalorder %s3264_s20, 2  ;;  %s388_s13 = sand.u32 1, %s3260_s19  }
  0x5a   : > { %p3467_p2 = por %p290_p0, %p50_p9  ;;  %s2576_s15 = sshll.u32 %s388_s13, 4 }
  0x5b   : > { %s2606_s16 = sshll.u32 %s3264_s20, 8  ;;  %s392_s28 = scalar_lea.vmem [#allocation3], %s2576_s15 }
  0x5c   : > { %s3830_s14 = scalar_select %p3467_p2, 1, 0 }
  0x5d   : > { %s3475_s25 = scalar_lea.hbm %s3797_s0, %s2606_s16  ;;  %s399_s3 = sshll.u32 %s392_s28, 4  ;;  %s3481_s3 = int_to_ptr.vmem [resolvable:$true] %s399_s3 }
  0x5e   : > { %p3477_p7 = pnand %p2931_p13, %p46_p11  ;;  %s3483_s4 = scalar_lea.sflag [#allocation4], %s388_s13 }
  0x5f   : > { %s3160_s5 = scalar_lea.hbm %s3475_s25, 256  ;;  %s3165_s15 = scalar_lea.hbm %s3797_s0, 512 }
  0x60   : > { %p3161_p5 = scmp.ne.s32.totalorder %s3475_s25, %s3160_s5  ;;  %p3162_p8 = pneg %p3477_p7 }
  0x61   : > { %p3166_p11 = scmp.lt.s32.totalorder %s3475_s25, %s3797_s0  ;;  %p3167_p0 = scmp.lt.s32.totalorder %s3165_s15, %s3160_s5 }
  0x62   : > { %p3163_p9 = pnand %p3162_p8, %p3161_p5 }
  0x63   : > { %p3168_p13 = por %p3167_p0, %p3166_p11 }
  0x64   : > { %p3164_p10 = pneg %p3163_p9 }
  0x66   : > { %p3169_p4 = pnand %p3168_p13, %p3164_p10 }
  0x68   : > { %3172 = shalt.err (!%p3169_p4)
}
  0x69   : > { %s3173_s13 = scalar_lea.vmem %s3481_s3, 256  ;;  %s3275_s7 = smov [#allocation3]  }
  0x6a   : > { %p3174_p1 = scmp.ne.s32.totalorder %s3481_s3, %s3173_s13  ;;  %s3178_s9 = sshll.u32 %s3275_s7, 4  ;;  %s3179_s9 = int_to_ptr.vmem [resolvable:$false] %s3178_s9 }
  0x6b   : > { %s3180_s16 = scalar_lea.vmem %s3179_s9, 512  ;;  %p3181_p9 = scmp.lt.s32.totalorder %s3481_s3, %s3179_s9 }
  0x6c   : > { %p3176_p2 = pnand %p3174_p1, %p3162_p8  ;;  %p3182_p6 = scmp.lt.s32.totalorder %s3180_s16, %s3173_s13 }
  0x6e   : > { %p3177_p5 = pneg %p3176_p2  ;;  %p3183_p12 = por %p3182_p6, %p3181_p9 }
  0x70   : > { %p3184_p3 = pnand %p3183_p12, %p3177_p5 }
  0x72   : > { %3187 = shalt.err (!%p3184_p3)
}
  0x73   : > { %s3832_s5 = smov 8   ;;  %s3833_s26 = smov 128  }
  0x74   : > { %2921 = dma.hbm_to_vmem [thread:$0]  (!%p3477_p7), %s3475_s25, 256, %s3481_s3, %s3483_s4, %s3833_s26, %s3833_s26, %s3832_s5  }
  0x75   : > { %p3834_p1 = scmp.ne.s32.totalorder %s3820_s24, 0 }
  0x76   : > { %s3510_s7 = sand.u32 (!%p3834_p1), 1, %s3256_s18   ;;  %p3835_p3 = scmp.ne.s32.totalorder (!%p3834_p1), %s3828_s29, 0 }
  0x77   : > { %411 = sbr.rel (%p3834_p1) target bundleno = 3376 (0xd30), region = 64  ;;  %s2580_s9 = sshll.u32 (!%p3834_p1), %s3510_s7, 4 }
  0x78   : > { %s414_s15 = scalar_lea.sflag (!%p3834_p1), [#allocation4], %s3510_s7  ;;  %s3516_s27 = scalar_lea.vmem (!%p3834_p1), [#allocation3], %s2580_s9 }
  0x7c   : > { %3231 = dma.done.wait (%p3835_p3), %s414_s15, 256  }
  0x7d   : > { %3233 = vsyncadd (%p3835_p3), %s414_s15, 4294967040  ;;  %p3836_p4 = scmp.eq.s32.totalorder %s3361_s23, 0 }
  0x7f   : > { %3235 = dma.done.wait (%p3836_p4), [#allocation7], 24768   ;;  %p3837_p12 = pmov %p3836_p4 }
  0x80   : > { %p3838_p6 = pmov %p3836_p4 }
  0x81   : > { %3237 = vsyncadd (%p3837_p12), [#allocation7], 4294942528 }
  0x82   : > { %3239 = dma.done.wait (%p3838_p6), [#allocation10], 10240   ;;  %p3839_p2 = pmov %p3836_p4 }
  0x84   : > { %3241 = vsyncadd (%p3839_p2), [#allocation10], 4294957056  ;;  %p3840_p7 = pmov %p3839_p2 }
  0x85   : > { %p3841_p8 = pmov %p3839_p2 }
  0x86   : > { %3243 = dma.done.wait (%p3840_p7), [#allocation13], 2048  }
  0x87   : > { %3245 = vsyncadd (%p3841_p8), [#allocation13], 4294965248  ;;  %v476_v0 = vld [vmem:[%s3516_s27] sm:$0xff]  ;;  %v477_v1 = vld [vmem:[%s3516_s27 + $0x8] sm:$0xff]  ;;  %v3276_v2 = vmov 0.0   ;;  %v480_v21 = vlaneseq  ;;  %vm1318_vm1 = vcmask 130048  }
  0x88   : > { %485 = vadd.xlane.f32.xlu0 %v476_v0  ;;  %845 = vmatprep.mubr.f32.mxu0 %v3276_v2  ;;  %v706_v3 = vld [vmem:[#allocation6 + $0x5a8] sm:$0xff]  ;;  %v708_v4 = vld [vmem:[#allocation6 + $0x5b8] sm:$0xff]  ;;  %v705_v5 = vld [vmem:[#allocation6 + $0x5a0] sm:$0xff]  ;;  %s475_s4 = scalar_lea.vmem [#allocation14], %s2580_s9  ;;  %s2607_s25 = sshll.u32 %s3361_s23, 8 }
  0x89   : > { %922 = vmatprep.mubr.f32.mxu1 %v3276_v2  ;;  %781 = vmatprep.subr.mxu0 %v706_v3  ;;  %v707_v6 = vld [vmem:[#allocation6 + $0x5b0] sm:$0xff]  ;;  %v694_v7 = vld [vmem:[#allocation6 + $0x548] sm:$0xff]  ;;  %v696_v8 = vld [vmem:[#allocation6 + $0x558] sm:$0xff]  ;;  %v481_v22 = vand.u32 127, %v480_v21  ;;  %s2447_s24 = sshll.u32 %s475_s4, 4  ;;  %s3753_s21 = scalar_lea.hbm %s3808_s11, %s2607_s25  ;;  %s3748_s24 = int_to_ptr.vmem [resolvable:$true] %s2447_s24 }
  0x8a   : > { %858 = vmatprep.subr.mxu1 %v708_v4  ;;  %782 = vmatpush1.msra.mxu0 %v705_v5  ;;  %v693_v9 = vld [vmem:[#allocation6 + $0x540] sm:$0xff]  ;;  %v695_v10 = vld [vmem:[#allocation6 + $0x550] sm:$0xff]  ;;  %v682_v11 = vld [vmem:[#allocation6 + $0x4e8] sm:$0xff]  ;;  %s2434_s9 = scalar_lea.sflag [#allocation5], %s3510_s7  ;;  %s3188_s23 = scalar_lea.vmem %s3748_s24, 256 }
  0x8b   : > { %859 = vmatpush1.msra.mxu1 %v707_v6  ;;  %783 = vmatprep.subr.mxu0 %v694_v7  ;;  %v684_v12 = vld [vmem:[#allocation6 + $0x4f8] sm:$0xff]  ;;  %v681_v13 = vld [vmem:[#allocation6 + $0x4e0] sm:$0xff]  ;;  %v683_v14 = vld [vmem:[#allocation6 + $0x4f0] sm:$0xff]  ;;  %vm482_vm0 = vcmp.lt.s32.totalorder %v481_v22, 32  ;;  %p3189_p10 = scmp.ne.s32.totalorder %s3748_s24, %s3188_s23  ;;  %p3842_p11 = scmp.ne.s32.totalorder %s3829_s22, 0 }
  0x8c   : > { %487 = vadd.xlane.f32.xlu0 %v477_v1  ;;  %860 = vmatprep.subr.mxu1 %v696_v8  ;;  %v670_v15 = vld [vmem:[#allocation6 + $0x488] sm:$0xff]  ;;  %v672_v16 = vld [vmem:[#allocation6 + $0x498] sm:$0xff]  ;;  %v669_v17 = vld [vmem:[#allocation6 + $0x480] sm:$0xff]  ;;  %v3540_v25 = vsel %vm482_vm0, 1.0, %v3276_v2  ;;  %s3277_s13 = smov [#allocation14]  }
  0x8d   : > { %784 = vmatpush1.msra.mxu0 %v693_v9  ;;  %861 = vmatpush1.msra.mxu1 %v695_v10  ;;  %v671_v18 = vld [vmem:[#allocation6 + $0x490] sm:$0xff]  ;;  %v658_v19 = vld [vmem:[#allocation6 + $0x428] sm:$0xff]  ;;  %v660_v20 = vld [vmem:[#allocation6 + $0x438] sm:$0xff]  ;;  %p3190_p0 = pnand %p3189_p10, %p3842_p11  ;;  %s3192_s16 = sshll.u32 %s3277_s13, 4  ;;  %s3193_s16 = int_to_ptr.vmem [resolvable:$false] %s3192_s16 }
  0x8e   : > { %785 = vmatprep.subr.mxu0 %v682_v11  ;;  %862 = vmatprep.subr.mxu1 %v684_v12  ;;  %v657_v34 = vld [vmem:[#allocation6 + $0x420] sm:$0xff]  ;;  %v659_v35 = vld [vmem:[#allocation6 + $0x430] sm:$0xff]  ;;  %v646_v36 = vld [vmem:[#allocation6 + $0x3c8] sm:$0xff]  ;;  %s3194_s5 = scalar_lea.vmem %s3193_s16, 512  ;;  %p3195_p5 = scmp.lt.s32.totalorder %s3748_s24, %s3193_s16 }
  0x8f   : > { %786 = vmatpush1.msra.mxu0 %v681_v13  ;;  %863 = vmatpush1.msra.mxu1 %v683_v14  ;;  %v648_v37 = vld [vmem:[#allocation6 + $0x3d8] sm:$0xff]  ;;  %v645_v38 = vld [vmem:[#allocation6 + $0x3c0] sm:$0xff]  ;;  %v647_v39 = vld [vmem:[#allocation6 + $0x3d0] sm:$0xff]  ;;  %p3191_p13 = pneg %p3190_p0  ;;  %p3196_p9 = scmp.lt.s32.totalorder %s3194_s5, %s3188_s23 }
  0x90   : > { %787 = vmatprep.subr.mxu0 %v670_v15  ;;  %864 = vmatprep.subr.mxu1 %v672_v16  ;;  %v634_v40 = vld [vmem:[#allocation6 + $0x368] sm:$0xff]  ;;  %v636_v41 = vld [vmem:[#allocation6 + $0x378] sm:$0xff]  ;;  %v633_v42 = vld [vmem:[#allocation6 + $0x360] sm:$0xff] }
  0x91   : > { %788 = vmatpush1.msra.mxu0 %v669_v17  ;;  %865 = vmatpush1.msra.mxu1 %v671_v18  ;;  %v635_v43 = vld [vmem:[#allocation6 + $0x370] sm:$0xff]  ;;  %v622_v44 = vld [vmem:[#allocation6 + $0x308] sm:$0xff]  ;;  %v624_v45 = vld [vmem:[#allocation6 + $0x318] sm:$0xff]  ;;  %p3197_p1 = por %p3196_p9, %p3195_p5 }
  0x92   : > { %789 = vmatprep.subr.mxu0 %v658_v19  ;;  %866 = vmatprep.subr.mxu1 %v660_v20  ;;  %v621_v46 = vld [vmem:[#allocation6 + $0x300] sm:$0xff]  ;;  %v623_v47 = vld [vmem:[#allocation6 + $0x310] sm:$0xff]  ;;  %v610_v48 = vld [vmem:[#allocation6 + $0x2a8] sm:$0xff] }
  0x93   : > { %790 = vmatpush1.msra.mxu0 %v657_v34  ;;  %867 = vmatpush1.msra.mxu1 %v659_v35  ;;  %v612_v49 = vld [vmem:[#allocation6 + $0x2b8] sm:$0xff]  ;;  %v609_v50 = vld [vmem:[#allocation6 + $0x2a0] sm:$0xff]  ;;  %v611_v51 = vld [vmem:[#allocation6 + $0x2b0] sm:$0xff]  ;;  %p3198_p3 = pnand %p3197_p1, %p3191_p13 }
  0x94   : > { %791 = vmatprep.subr.mxu0 %v646_v36  ;;  %868 = vmatprep.subr.mxu1 %v648_v37  ;;  %v598_v52 = vld [vmem:[#allocation6 + $0x248] sm:$0xff]  ;;  %v600_v53 = vld [vmem:[#allocation6 + $0x258] sm:$0xff]  ;;  %v597_v54 = vld [vmem:[#allocation6 + $0x240] sm:$0xff] }
  0x95   : > { %792 = vmatpush1.msra.mxu0 %v645_v38  ;;  %869 = vmatpush1.msra.mxu1 %v647_v39  ;;  %v599_v55 = vld [vmem:[#allocation6 + $0x250] sm:$0xff]  ;;  %v586_v56 = vld [vmem:[#allocation6 + $0x1e8] sm:$0xff]  ;;  %v588_v57 = vld [vmem:[#allocation6 + $0x1f8] sm:$0xff] }
  0x96   : > { %793 = vmatprep.subr.mxu0 %v634_v40  ;;  %870 = vmatprep.subr.mxu1 %v636_v41  ;;  %v585_v58 = vld [vmem:[#allocation6 + $0x1e0] sm:$0xff]  ;;  %v587_v59 = vld [vmem:[#allocation6 + $0x1f0] sm:$0xff]  ;;  %v574_v60 = vld [vmem:[#allocation6 + $0x188] sm:$0xff] }
  0x97   : > { %794 = vmatpush1.msra.mxu0 %v633_v42  ;;  %871 = vmatpush1.msra.mxu1 %v635_v43  ;;  %v576_v61 = vld [vmem:[#allocation6 + $0x198] sm:$0xff]  ;;  %v573_v62 = vld [vmem:[#allocation6 + $0x180] sm:$0xff]  ;;  %v575_v63 = vld [vmem:[#allocation6 + $0x190] sm:$0xff] }
  0x98   : > { %795 = vmatprep.subr.mxu0 %v622_v44  ;;  %872 = vmatprep.subr.mxu1 %v624_v45  ;;  %v561_v3 = vld [vmem:[#allocation6 + $0x120] sm:$0xff]  ;;  %v563_v4 = vld [vmem:[#allocation6 + $0x130] sm:$0xff]  ;;  %v550_v5 = vld [vmem:[#allocation6 + $0xc8] sm:$0xff] }
  0x99   : > { %796 = vmatpush1.msra.mxu0 %v621_v46  ;;  %873 = vmatpush1.msra.mxu1 %v623_v47  ;;  %v552_v6 = vld [vmem:[#allocation6 + $0xd8] sm:$0xff]  ;;  %v549_v7 = vld [vmem:[#allocation6 + $0xc0] sm:$0xff]  ;;  %v551_v8 = vld [vmem:[#allocation6 + $0xd0] sm:$0xff] }
  0x9a   : > { %797 = vmatprep.subr.mxu0 %v610_v48  ;;  %874 = vmatprep.subr.mxu1 %v612_v49  ;;  %v538_v9 = vld [vmem:[#allocation6 + $0x68] sm:$0xff]  ;;  %v540_v10 = vld [vmem:[#allocation6 + $0x78] sm:$0xff]  ;;  %v537_v11 = vld [vmem:[#allocation6 + $0x60] sm:$0xff] }
  0x9b   : > { %798 = vmatpush1.msra.mxu0 %v609_v50  ;;  %875 = vmatpush1.msra.mxu1 %v611_v51  ;;  %v539_v12 = vld [vmem:[#allocation6 + $0x70] sm:$0xff]  ;;  %v526_v13 = vld [vmem:[#allocation6 + $0x8] sm:$0xff]  ;;  %v528_v14 = vld [vmem:[#allocation6 + $0x18] sm:$0xff] }
  0x9c   : > { %799 = vmatprep.subr.mxu0 %v598_v52  ;;  %876 = vmatprep.subr.mxu1 %v600_v53  ;;  %v525_v15 = vld [vmem:[#allocation6] sm:$0xff]  ;;  %v527_v16 = vld [vmem:[#allocation6 + $0x10] sm:$0xff]  ;;  %v710_v17 = vld [vmem:[#allocation6 + $0x5c8] sm:$0xff] }
  0x9d   : > { %800 = vmatpush1.msra.mxu0 %v597_v54  ;;  %877 = vmatpush1.msra.mxu1 %v599_v55  ;;  %v712_v18 = vld [vmem:[#allocation6 + $0x5d8] sm:$0xff]  ;;  %v709_v37 = vld [vmem:[#allocation6 + $0x5c0] sm:$0xff]  ;;  %v711_v38 = vld [vmem:[#allocation6 + $0x5d0] sm:$0xff] }
  0x9e   : > { %801 = vmatprep.subr.mxu0 %v586_v56  ;;  %878 = vmatprep.subr.mxu1 %v588_v57  ;;  %v698_v39 = vld [vmem:[#allocation6 + $0x568] sm:$0xff]  ;;  %v700_v40 = vld [vmem:[#allocation6 + $0x578] sm:$0xff]  ;;  %v699_v42 = vld [vmem:[#allocation6 + $0x570] sm:$0xff] }
  0x9f   : > { %802 = vmatpush1.msra.mxu0 %v585_v58  ;;  %879 = vmatpush1.msra.mxu1 %v587_v59  ;;  %v686_v43 = vld [vmem:[#allocation6 + $0x508] sm:$0xff]  ;;  %v688_v44 = vld [vmem:[#allocation6 + $0x518] sm:$0xff]  ;;  %v685_v45 = vld [vmem:[#allocation6 + $0x500] sm:$0xff] }
  0xa0   : > { %803 = vmatprep.subr.mxu0 %v574_v60  ;;  %880 = vmatprep.subr.mxu1 %v576_v61  ;;  %v687_v46 = vld [vmem:[#allocation6 + $0x510] sm:$0xff]  ;;  %v674_v47 = vld [vmem:[#allocation6 + $0x4a8] sm:$0xff]  ;;  %v676_v48 = vld [vmem:[#allocation6 + $0x4b8] sm:$0xff] }
  0xa1   : > { %804 = vmatpush1.msra.mxu0 %v573_v62  ;;  %881 = vmatpush1.msra.mxu1 %v575_v63  ;;  %v673_v49 = vld [vmem:[#allocation6 + $0x4a0] sm:$0xff]  ;;  %v675_v50 = vld [vmem:[#allocation6 + $0x4b0] sm:$0xff]  ;;  %v662_v51 = vld [vmem:[#allocation6 + $0x448] sm:$0xff] }
  0xa2   : > { %v664_v52 = vld [vmem:[#allocation6 + $0x458] sm:$0xff]  ;;  %v661_v53 = vld [vmem:[#allocation6 + $0x440] sm:$0xff]  ;;  %v663_v54 = vld [vmem:[#allocation6 + $0x450] sm:$0xff] }
  0xa3   : > { %v650_v55 = vld [vmem:[#allocation6 + $0x3e8] sm:$0xff]  ;;  %v652_v56 = vld [vmem:[#allocation6 + $0x3f8] sm:$0xff]  ;;  %v649_v57 = vld [vmem:[#allocation6 + $0x3e0] sm:$0xff] }
  0xa4   : > { %v651_v58 = vld [vmem:[#allocation6 + $0x3f0] sm:$0xff]  ;;  %v638_v59 = vld [vmem:[#allocation6 + $0x388] sm:$0xff]  ;;  %v640_v60 = vld [vmem:[#allocation6 + $0x398] sm:$0xff] }
  0xa5   : > { %v637_v61 = vld [vmem:[#allocation6 + $0x380] sm:$0xff]  ;;  %v639_v62 = vld [vmem:[#allocation6 + $0x390] sm:$0xff]  ;;  %v626_v63 = vld [vmem:[#allocation6 + $0x328] sm:$0xff] }
 0x111   : > { %v486_v23 = vpop.xlane.xlu0 %485 }
 0x112   : > { %v489_v24 = vmul.f32 0.03125, %v486_v23 }
 0x114   : > { %v491_v26 = vsub.f32 %v476_v0, %v489_v24  ;;  %v562_v0 = vld [vmem:[#allocation6 + $0x128] sm:$0xff] }
 0x115   : > { %v488_v27 = vpop.xlane.xlu0 %487  ;;  %805 = vmatprep.subr.mxu0 %v562_v0  ;;  %v628_v0 = vld [vmem:[#allocation6 + $0x338] sm:$0xff] }
 0x116   : > { %v490_v28 = vmul.f32 0.03125, %v488_v27  ;;  %v3543_v29 = vmul.f32 %v3540_v25, %v491_v26  ;;  %806 = vmatpush1.msra.mxu0 %v561_v3  ;;  %v627_v3 = vld [vmem:[#allocation6 + $0x330] sm:$0xff] }
 0x117   : > { %807 = vmatprep.subr.mxu0 %v550_v5  ;;  %v616_v5 = vld [vmem:[#allocation6 + $0x2d8] sm:$0xff] }
 0x118   : > { %v492_v30 = vsub.f32 %v477_v1, %v490_v28  ;;  %v495_v31 = vmul.f32 %v3543_v29, %v3543_v29  ;;  %v564_v1 = vld [vmem:[#allocation6 + $0x138] sm:$0xff]  ;;  %808 = vmatpush1.msra.mxu0 %v549_v7  ;;  %v2588_v28 = vld [vmem:[%s3798_s1] ss:$0 sm:$0xff]  ;;  %v615_v7 = vld [vmem:[#allocation6 + $0x2d0] sm:$0xff] }
 0x119   : > { %882 = vmatprep.subr.mxu1 %v564_v1  ;;  %809 = vmatprep.subr.mxu0 %v538_v9  ;;  %v625_v1 = vld [vmem:[#allocation6 + $0x320] sm:$0xff]  ;;  %v604_v9 = vld [vmem:[#allocation6 + $0x278] sm:$0xff] }
 0x11a   : > { %497 = vadd.xlane.f32.xlu1 %v495_v31  ;;  %v3548_v32 = vmul.f32 %v3540_v25, %v492_v30  ;;  %883 = vmatpush1.msra.mxu1 %v563_v4  ;;  %v2589_v31 = vld [vmem:[%s3799_s2] ss:$0 sm:$0xff]  ;;  %v614_v4 = vld [vmem:[#allocation6 + $0x2c8] sm:$0xff] }
 0x11b   : > { %884 = vmatprep.subr.mxu1 %v552_v6  ;;  %810 = vmatpush1.msra.mxu0 %v537_v11  ;;  %v613_v6 = vld [vmem:[#allocation6 + $0x2c0] sm:$0xff]  ;;  %v603_v11 = vld [vmem:[#allocation6 + $0x270] sm:$0xff] }
 0x11c   : > { %v496_v33 = vmul.f32 %v3548_v32, %v3548_v32  ;;  %885 = vmatpush1.msra.mxu1 %v551_v8  ;;  %811 = vmatprep.subr.mxu0 %v526_v13  ;;  %v602_v8 = vld [vmem:[#allocation6 + $0x268] sm:$0xff]  ;;  %v592_v13 = vld [vmem:[#allocation6 + $0x218] sm:$0xff] }
 0x11d   : > { %886 = vmatprep.subr.mxu1 %v540_v10  ;;  %812 = vmatpush1.msra.mxu0 %v525_v15  ;;  %v601_v10 = vld [vmem:[#allocation6 + $0x260] sm:$0xff]  ;;  %v591_v15 = vld [vmem:[#allocation6 + $0x210] sm:$0xff] }
 0x11e   : > { %499 = vadd.xlane.f32.xlu1 %v496_v33  ;;  %887 = vmatpush1.msra.mxu1 %v539_v12  ;;  %v590_v12 = vld [vmem:[#allocation6 + $0x208] sm:$0xff] }
 0x11f   : > { %888 = vmatprep.subr.mxu1 %v528_v14  ;;  %935 = vmatprep.subr.mxu0 %v710_v17  ;;  %v589_v14 = vld [vmem:[#allocation6 + $0x200] sm:$0xff]  ;;  %v580_v17 = vld [vmem:[#allocation6 + $0x1b8] sm:$0xff] }
 0x120   : > { %889 = vmatpush1.msra.mxu1 %v527_v16  ;;  %v578_v16 = vld [vmem:[#allocation6 + $0x1a8] sm:$0xff] }
 0x121   : > { %1012 = vmatprep.subr.mxu1 %v712_v18  ;;  %v577_v18 = vld [vmem:[#allocation6 + $0x1a0] sm:$0xff] }
 0x1a3   : > { %v498_v19 = vpop.xlane.xlu1 %497 }
 0x1a4   : > { %v501_v20 = vmul.f32 0.03125, %v498_v19  ;;  %v579_v19 = vld [vmem:[#allocation6 + $0x1b0] sm:$0xff] }
 0x1a6   : > { %v503_v22 = vadd.f32 1e-05, %v501_v20  ;;  %v566_v20 = vld [vmem:[#allocation6 + $0x148] sm:$0xff] }
 0x1a7   : > { %v500_v23 = vpop.xlane.xlu1 %499 }
 0x1a8   : > { %2982 = vrsqrt.f32 %v503_v22  ;;  %v502_v24 = vmul.f32 0.03125, %v500_v23  ;;  %v568_v22 = vld [vmem:[#allocation6 + $0x158] sm:$0xff]  ;;  %v565_v23 = vld [vmem:[#allocation6 + $0x140] sm:$0xff] }
 0x1aa   : > { %v504_v26 = vadd.f32 1e-05, %v502_v24  ;;  %v567_v24 = vld [vmem:[#allocation6 + $0x150] sm:$0xff] }
 0x1ac   : > { %2984 = vrsqrt.f32 %v504_v26  ;;  %v554_v26 = vld [vmem:[#allocation6 + $0xe8] sm:$0xff] }
 0x1b5   : > { %v2983_v27 = vpop.eup %2982 }
 0x1b6   : > { %v507_v30 = vmul.f32 %v2983_v27, %v3543_v29  ;;  %v697_v29 = vld [vmem:[#allocation6 + $0x560] sm:$0xff]  ;;  %v556_v27 = vld [vmem:[#allocation6 + $0xf8] sm:$0xff] }
 0x1b8   : > { %v515_v33 = vmul.f32 %v2588_v28, %v507_v30  ;;  %v555_v30 = vld [vmem:[#allocation6 + $0xf0] sm:$0xff] }
 0x1b9   : > { %v2985_v34 = vpop.eup %2984 }
 0x1ba   : > { %v508_v35 = vmul.f32 %v2985_v34, %v3548_v32  ;;  %v3560_v36 = vadd.f32 %v2589_v31, %v515_v33  ;;  %v544_v33 = vld [vmem:[#allocation6 + $0x98] sm:$0xff]  ;;  %v541_v34 = vld [vmem:[#allocation6 + $0x80] sm:$0xff] }
 0x1bc   : > { %v516_v41 = vmul.f32 %v2588_v28, %v508_v35  ;;  %846 = vmatmul.mubr.f32.vlgmr.msra.gmra.mxu0 %v3560_v36  ;;  %923 = vmatmul.mubr.f32.vlgmr.msra.gmra.mxu1 %v3560_v36  ;;  %v553_v28 = vld [vmem:[#allocation6 + $0xe0] sm:$0xff]  ;;  %v543_v35 = vld [vmem:[#allocation6 + $0x90] sm:$0xff] }
 0x1bd   : > { %936 = vmatpush1.msra.mxu0 %v709_v37  ;;  %1013 = vmatpush1.msra.mxu1 %v711_v38  ;;  %v530_v37 = vld [vmem:[#allocation6 + $0x28] sm:$0xff]  ;;  %v532_v38 = vld [vmem:[#allocation6 + $0x38] sm:$0xff] }
 0x1be   : > { %937 = vmatprep.subr.mxu0 %v698_v39  ;;  %1014 = vmatprep.subr.mxu1 %v700_v40  ;;  %v3564_v32 = vadd.f32 %v2589_v31, %v516_v41  ;;  %v542_v31 = vld [vmem:[#allocation6 + $0x88] sm:$0xff]  ;;  %v529_v39 = vld [vmem:[#allocation6 + $0x20] sm:$0xff]  ;;  %v531_v40 = vld [vmem:[#allocation6 + $0x30] sm:$0xff] }
 0x1bf   : > { %938 = vmatpush1.msra.mxu0 %v697_v29  ;;  %1015 = vmatpush1.msra.mxu1 %v699_v42  ;;  %v714_v41 = vld [vmem:[#allocation6 + $0x5e8] sm:$0xff]  ;;  %v716_v29 = vld [vmem:[#allocation6 + $0x5f8] sm:$0xff]  ;;  %v713_v42 = vld [vmem:[#allocation6 + $0x5e0] sm:$0xff] }
 0x1c0   : > { %851 = vmatprep.mubr.f32.mxu0 %v3276_v2  ;;  %928 = vmatprep.mubr.f32.mxu1 %v3276_v2 }
 0x1c1   : > { %939 = vmatprep.subr.mxu0 %v686_v43  ;;  %1016 = vmatprep.subr.mxu1 %v688_v44  ;;  %v715_v43 = vld [vmem:[#allocation6 + $0x5f0] sm:$0xff]  ;;  %v702_v44 = vld [vmem:[#allocation6 + $0x588] sm:$0xff] }
 0x1c2   : > { %852 = vmatmul.mubr.f32.gmra.mxu0 %v3564_v32  ;;  %929 = vmatmul.mubr.f32.gmra.mxu1 %v3564_v32 }
 0x1c3   : > { %940 = vmatpush1.msra.mxu0 %v685_v45  ;;  %1017 = vmatpush1.msra.mxu1 %v687_v46  ;;  %v704_v45 = vld [vmem:[#allocation6 + $0x598] sm:$0xff]  ;;  %v701_v46 = vld [vmem:[#allocation6 + $0x580] sm:$0xff] }
 0x1c4   : > { %941 = vmatprep.subr.mxu0 %v674_v47  ;;  %1018 = vmatprep.subr.mxu1 %v676_v48  ;;  %v703_v47 = vld [vmem:[#allocation6 + $0x590] sm:$0xff]  ;;  %v690_v48 = vld [vmem:[#allocation6 + $0x528] sm:$0xff] }
 0x1c5   : > { %942 = vmatpush1.msra.mxu0 %v673_v49  ;;  %1019 = vmatpush1.msra.mxu1 %v675_v50  ;;  %v692_v49 = vld [vmem:[#allocation6 + $0x538] sm:$0xff]  ;;  %v689_v50 = vld [vmem:[#allocation6 + $0x520] sm:$0xff] }
 0x1c6   : > { %943 = vmatprep.subr.mxu0 %v662_v51  ;;  %1020 = vmatprep.subr.mxu1 %v664_v52  ;;  %v691_v51 = vld [vmem:[#allocation6 + $0x530] sm:$0xff]  ;;  %v678_v52 = vld [vmem:[#allocation6 + $0x4c8] sm:$0xff] }
 0x1c7   : > { %944 = vmatpush1.msra.mxu0 %v661_v53  ;;  %1021 = vmatpush1.msra.mxu1 %v663_v54  ;;  %v680_v53 = vld [vmem:[#allocation6 + $0x4d8] sm:$0xff]  ;;  %v677_v54 = vld [vmem:[#allocation6 + $0x4c0] sm:$0xff] }
 0x1c8   : > { %945 = vmatprep.subr.mxu0 %v650_v55  ;;  %1022 = vmatprep.subr.mxu1 %v652_v56  ;;  %v679_v55 = vld [vmem:[#allocation6 + $0x4d0] sm:$0xff]  ;;  %v666_v56 = vld [vmem:[#allocation6 + $0x468] sm:$0xff] }
 0x1c9   : > { %946 = vmatpush1.msra.mxu0 %v649_v57  ;;  %1023 = vmatpush1.msra.mxu1 %v651_v58  ;;  %v668_v57 = vld [vmem:[#allocation6 + $0x478] sm:$0xff]  ;;  %v665_v58 = vld [vmem:[#allocation6 + $0x460] sm:$0xff] }
 0x1ca   : > { %947 = vmatprep.subr.mxu0 %v638_v59  ;;  %1024 = vmatprep.subr.mxu1 %v640_v60  ;;  %v667_v59 = vld [vmem:[#allocation6 + $0x470] sm:$0xff]  ;;  %v654_v60 = vld [vmem:[#allocation6 + $0x408] sm:$0xff] }
 0x1cb   : > { %948 = vmatpush1.msra.mxu0 %v637_v61  ;;  %1025 = vmatpush1.msra.mxu1 %v639_v62  ;;  %v656_v61 = vld [vmem:[#allocation6 + $0x418] sm:$0xff]  ;;  %v653_v62 = vld [vmem:[#allocation6 + $0x400] sm:$0xff] }
 0x1cc   : > { %949 = vmatprep.subr.mxu0 %v626_v63  ;;  %1026 = vmatprep.subr.mxu1 %v628_v0  ;;  %v655_v63 = vld [vmem:[#allocation6 + $0x410] sm:$0xff]  ;;  %v642_v0 = vld [vmem:[#allocation6 + $0x3a8] sm:$0xff] }
 0x1cd   : > { %950 = vmatpush1.msra.mxu0 %v625_v1  ;;  %1027 = vmatpush1.msra.mxu1 %v627_v3  ;;  %v644_v1 = vld [vmem:[#allocation6 + $0x3b8] sm:$0xff]  ;;  %v641_v3 = vld [vmem:[#allocation6 + $0x3a0] sm:$0xff] }
 0x1ce   : > { %951 = vmatprep.subr.mxu0 %v614_v4  ;;  %1028 = vmatprep.subr.mxu1 %v616_v5  ;;  %v643_v4 = vld [vmem:[#allocation6 + $0x3b0] sm:$0xff]  ;;  %v630_v5 = vld [vmem:[#allocation6 + $0x348] sm:$0xff] }
 0x1cf   : > { %952 = vmatpush1.msra.mxu0 %v613_v6  ;;  %1029 = vmatpush1.msra.mxu1 %v615_v7  ;;  %v632_v6 = vld [vmem:[#allocation6 + $0x358] sm:$0xff]  ;;  %v629_v7 = vld [vmem:[#allocation6 + $0x340] sm:$0xff] }
 0x1d0   : > { %953 = vmatprep.subr.mxu0 %v602_v8  ;;  %1030 = vmatprep.subr.mxu1 %v604_v9  ;;  %v631_v8 = vld [vmem:[#allocation6 + $0x350] sm:$0xff]  ;;  %v618_v9 = vld [vmem:[#allocation6 + $0x2e8] sm:$0xff] }
 0x1d1   : > { %954 = vmatpush1.msra.mxu0 %v601_v10  ;;  %1031 = vmatpush1.msra.mxu1 %v603_v11  ;;  %v620_v10 = vld [vmem:[#allocation6 + $0x2f8] sm:$0xff]  ;;  %v617_v11 = vld [vmem:[#allocation6 + $0x2e0] sm:$0xff] }
 0x1d2   : > { %955 = vmatprep.subr.mxu0 %v590_v12  ;;  %1032 = vmatprep.subr.mxu1 %v592_v13  ;;  %v619_v12 = vld [vmem:[#allocation6 + $0x2f0] sm:$0xff]  ;;  %v606_v13 = vld [vmem:[#allocation6 + $0x288] sm:$0xff] }
 0x1d3   : > { %956 = vmatpush1.msra.mxu0 %v589_v14  ;;  %1033 = vmatpush1.msra.mxu1 %v591_v15  ;;  %v608_v14 = vld [vmem:[#allocation6 + $0x298] sm:$0xff]  ;;  %v605_v15 = vld [vmem:[#allocation6 + $0x280] sm:$0xff] }
 0x1d4   : > { %957 = vmatprep.subr.mxu0 %v578_v16  ;;  %1034 = vmatprep.subr.mxu1 %v580_v17  ;;  %v607_v16 = vld [vmem:[#allocation6 + $0x290] sm:$0xff]  ;;  %v594_v17 = vld [vmem:[#allocation6 + $0x228] sm:$0xff] }
 0x1d5   : > { %958 = vmatpush1.msra.mxu0 %v577_v18  ;;  %1035 = vmatpush1.msra.mxu1 %v579_v19  ;;  %v596_v18 = vld [vmem:[#allocation6 + $0x238] sm:$0xff]  ;;  %v593_v19 = vld [vmem:[#allocation6 + $0x220] sm:$0xff] }
 0x1d6   : > { %959 = vmatprep.subr.mxu0 %v566_v20  ;;  %1036 = vmatprep.subr.mxu1 %v568_v22  ;;  %v595_v20 = vld [vmem:[#allocation6 + $0x230] sm:$0xff]  ;;  %v582_v22 = vld [vmem:[#allocation6 + $0x1c8] sm:$0xff] }
 0x1d7   : > { %960 = vmatpush1.msra.mxu0 %v565_v23  ;;  %1037 = vmatpush1.msra.mxu1 %v567_v24  ;;  %v584_v23 = vld [vmem:[#allocation6 + $0x1d8] sm:$0xff]  ;;  %v581_v24 = vld [vmem:[#allocation6 + $0x1c0] sm:$0xff] }
 0x1d8   : > { %961 = vmatprep.subr.mxu0 %v554_v26  ;;  %1038 = vmatprep.subr.mxu1 %v556_v27  ;;  %v583_v26 = vld [vmem:[#allocation6 + $0x1d0] sm:$0xff]  ;;  %v570_v27 = vld [vmem:[#allocation6 + $0x168] sm:$0xff] }
 0x1d9   : > { %962 = vmatpush1.msra.mxu0 %v553_v28  ;;  %1039 = vmatpush1.msra.mxu1 %v555_v30  ;;  %v572_v28 = vld [vmem:[#allocation6 + $0x178] sm:$0xff]  ;;  %v569_v30 = vld [vmem:[#allocation6 + $0x160] sm:$0xff] }
 0x1da   : > { %963 = vmatprep.subr.mxu0 %v542_v31  ;;  %1040 = vmatprep.subr.mxu1 %v544_v33  ;;  %v571_v31 = vld [vmem:[#allocation6 + $0x170] sm:$0xff]  ;;  %v558_v33 = vld [vmem:[#allocation6 + $0x108] sm:$0xff] }
 0x1db   : > { %964 = vmatpush1.msra.mxu0 %v541_v34  ;;  %1041 = vmatpush1.msra.mxu1 %v543_v35  ;;  %v560_v34 = vld [vmem:[#allocation6 + $0x118] sm:$0xff]  ;;  %v557_v35 = vld [vmem:[#allocation6 + $0x100] sm:$0xff] }
 0x1dc   : > { %965 = vmatprep.subr.mxu0 %v530_v37  ;;  %1042 = vmatprep.subr.mxu1 %v532_v38  ;;  %v559_v37 = vld [vmem:[#allocation6 + $0x110] sm:$0xff]  ;;  %v546_v38 = vld [vmem:[#allocation6 + $0xa8] sm:$0xff] }
 0x1dd   : > { %966 = vmatpush1.msra.mxu0 %v529_v39  ;;  %999 = vmatprep.mubr.f32.mxu0 %v3276_v2  ;;  %v548_v39 = vld [vmem:[#allocation6 + $0xb8] sm:$0xff] }
 0x1de   : > { %1043 = vmatpush1.msra.mxu1 %v531_v40  ;;  %1076 = vmatprep.mubr.f32.mxu1 %v3276_v2  ;;  %v545_v40 = vld [vmem:[#allocation6 + $0xa0] sm:$0xff] }
 0x1df   : > { %1000 = vmatmul.mubr.f32.vlgmr.msra.gmra.mxu0 %v3560_v36  ;;  %1077 = vmatmul.mubr.f32.vlgmr.msra.gmra.mxu1 %v3560_v36 }
 0x1e0   : > { %1089 = vmatprep.subr.mxu0 %v714_v41  ;;  %1166 = vmatprep.subr.mxu1 %v716_v29  ;;  %v547_v41 = vld [vmem:[#allocation6 + $0xb0] sm:$0xff]  ;;  %v534_v29 = vld [vmem:[#allocation6 + $0x48] sm:$0xff] }
 0x1e1   : > { %1090 = vmatpush1.msra.mxu0 %v713_v42  ;;  %1167 = vmatpush1.msra.mxu1 %v715_v43  ;;  %v536_v42 = vld [vmem:[#allocation6 + $0x58] sm:$0xff]  ;;  %v533_v43 = vld [vmem:[#allocation6 + $0x40] sm:$0xff] }
 0x1e2   : > { %1091 = vmatprep.subr.mxu0 %v702_v44  ;;  %1168 = vmatprep.subr.mxu1 %v704_v45  ;;  %v535_v44 = vld [vmem:[#allocation6 + $0x50] sm:$0xff]  ;;  %v3587_v45 = vshrl.u32 %v480_v21, 7 }
 0x1e3   : > { %1005 = vmatprep.mubr.f32.mxu0 %v3276_v2  ;;  %1082 = vmatprep.mubr.f32.mxu1 %v3276_v2 }
 0x1e4   : > { %1092 = vmatpush1.msra.mxu0 %v701_v46  ;;  %1169 = vmatpush1.msra.mxu1 %v703_v47  ;;  %v723_v46 = vsub.s32 0, %v3587_v45  ;;  %v3590_v47 = vld [vmem:[#allocation8] sm:$0xff]  ;;  %v751_v21 = vsub.s32 7, %v3587_v45 }
 0x1e5   : > { %1006 = vmatmul.mubr.f32.gmra.mxu0 %v3564_v32  ;;  %1083 = vmatmul.mubr.f32.gmra.mxu1 %v3564_v32 }
 0x1e6   : > { %1093 = vmatprep.subr.mxu0 %v690_v48  ;;  %1170 = vmatprep.subr.mxu1 %v692_v49  ;;  %v724_v48 = vrot.slane %v3590_v47, %v723_v46 }
 0x1e7   : > { %1094 = vmatpush1.msra.mxu0 %v689_v50  ;;  %1171 = vmatpush1.msra.mxu1 %v691_v51 }
 0x1e8   : > { %1095 = vmatprep.subr.mxu0 %v678_v52  ;;  %1172 = vmatprep.subr.mxu1 %v680_v53 }
 0x1e9   : > { %1096 = vmatpush1.msra.mxu0 %v677_v54  ;;  %1173 = vmatpush1.msra.mxu1 %v679_v55  ;;  %v752_v55 = vrot.slane %v3590_v47, %v751_v21 }
 0x1ea   : > { %1097 = vmatprep.subr.mxu0 %v666_v56  ;;  %1174 = vmatprep.subr.mxu1 %v668_v57 }
 0x1eb   : > { %1098 = vmatpush1.msra.mxu0 %v665_v58  ;;  %1175 = vmatpush1.msra.mxu1 %v667_v59  ;;  %v739_v58 = vsub.s32 4, %v3587_v45 }
 0x1ec   : > { %1099 = vmatprep.subr.mxu0 %v654_v60  ;;  %1176 = vmatprep.subr.mxu1 %v656_v61 }
 0x1ed   : > { %1100 = vmatpush1.msra.mxu0 %v653_v62  ;;  %1177 = vmatpush1.msra.mxu1 %v655_v63  ;;  %v740_v62 = vrot.slane %v3590_v47, %v739_v58 }
 0x1ee   : > { %1101 = vmatprep.subr.mxu0 %v642_v0  ;;  %1178 = vmatprep.subr.mxu1 %v644_v1  ;;  %v743_v0 = vsub.s32 5, %v3587_v45 }
 0x1ef   : > { %1102 = vmatpush1.msra.mxu0 %v641_v3  ;;  %1179 = vmatpush1.msra.mxu1 %v643_v4  ;;  %v727_v3 = vsub.s32 1, %v3587_v45 }
 0x1f0   : > { %1103 = vmatprep.subr.mxu0 %v630_v5  ;;  %1180 = vmatprep.subr.mxu1 %v632_v6  ;;  %v744_v6 = vrot.slane %v3590_v47, %v743_v0 }
 0x1f1   : > { %1104 = vmatpush1.msra.mxu0 %v629_v7  ;;  %1181 = vmatpush1.msra.mxu1 %v631_v8  ;;  %v728_v7 = vrot.slane %v3590_v47, %v727_v3 }
 0x1f2   : > { %1105 = vmatprep.subr.mxu0 %v618_v9  ;;  %1182 = vmatprep.subr.mxu1 %v620_v10 }
 0x1f3   : > { %1106 = vmatpush1.msra.mxu0 %v617_v11  ;;  %1183 = vmatpush1.msra.mxu1 %v619_v12 }
 0x1f4   : > { %1107 = vmatprep.subr.mxu0 %v606_v13  ;;  %1184 = vmatprep.subr.mxu1 %v608_v14  ;;  %v735_v14 = vsub.s32 3, %v3587_v45 }
 0x1f5   : > { %1108 = vmatpush1.msra.mxu0 %v605_v15  ;;  %1185 = vmatpush1.msra.mxu1 %v607_v16  ;;  %v718_v16 = vld [vmem:[#allocation8 + $0x8] sm:$0xf] }
 0x1f6   : > { %1109 = vmatprep.subr.mxu0 %v594_v17  ;;  %1186 = vmatprep.subr.mxu1 %v596_v18  ;;  %v760_v17 = vrot.slane %v718_v16, %v727_v3  ;;  %v3618_v18 = vrot.slane %v718_v16, %v735_v14 }
 0x1f7   : > { %1110 = vmatpush1.msra.mxu0 %v593_v19  ;;  %1187 = vmatpush1.msra.mxu1 %v595_v20 }
 0x1f8   : > { %1111 = vmatprep.subr.mxu0 %v582_v22  ;;  %1188 = vmatprep.subr.mxu1 %v584_v23  ;;  %v731_v22 = vsub.s32 2, %v3587_v45 }
 0x1f9   : > { %1112 = vmatpush1.msra.mxu0 %v581_v24  ;;  %1189 = vmatpush1.msra.mxu1 %v583_v26  ;;  %v756_v26 = vrot.slane %v718_v16, %v723_v46 }
 0x1fa   : > { %1113 = vmatprep.subr.mxu0 %v570_v27  ;;  %1190 = vmatprep.subr.mxu1 %v572_v28  ;;  %v764_v27 = vrot.slane %v718_v16, %v731_v22 }
 0x1fb   : > { %1114 = vmatpush1.msra.mxu0 %v569_v30  ;;  %1191 = vmatpush1.msra.mxu1 %v571_v31 }
 0x1fc   : > { %1115 = vmatprep.subr.mxu0 %v558_v33  ;;  %1192 = vmatprep.subr.mxu1 %v560_v34 }
 0x1fd   : > { %1116 = vmatpush1.msra.mxu0 %v557_v35  ;;  %1193 = vmatpush1.msra.mxu1 %v559_v37 }
 0x1fe   : > { %1117 = vmatprep.subr.mxu0 %v546_v38  ;;  %1194 = vmatprep.subr.mxu1 %v548_v39 }
 0x1ff   : > { %1118 = vmatpush1.msra.mxu0 %v545_v40  ;;  %1195 = vmatpush1.msra.mxu1 %v547_v41 }
 0x200   : > { %1119 = vmatprep.subr.mxu0 %v534_v29  ;;  %1196 = vmatprep.subr.mxu1 %v536_v42 }
 0x201   : > { %1120 = vmatpush1.msra.mxu0 %v533_v43  ;;  %1153 = vmatprep.mubr.f32.mxu0 %v3276_v2 }
 0x202   : > { %1197 = vmatpush1.msra.mxu1 %v535_v44  ;;  %1230 = vmatprep.mubr.f32.mxu1 %v3276_v2 }
 0x203   : > { %1154 = vmatmul.mubr.f32.vlgmr.msra.gmra.mxu0 %v3560_v36  ;;  %1231 = vmatmul.mubr.f32.vlgmr.msra.gmra.mxu1 %v3560_v36 }
 0x204   : > { %1159 = vmatprep.mubr.f32.mxu0 %v3276_v2  ;;  %1236 = vmatprep.mubr.f32.mxu1 %v3276_v2 }
 0x207   : > { %1160 = vmatmul.mubr.f32.gmra.mxu0 %v3564_v32  ;;  %1237 = vmatmul.mubr.f32.gmra.mxu1 %v3564_v32 }
 0x27c   : > { %v847_v49 = vpop.f32.mrf.mxu0  ;;  %v3593_v36 = vpop.f32.mrf.mxu1 }
 0x27d   : > { %v848_v50 = vadd.f32 %v847_v49, %v724_v48 }
 0x27e   : > { %v849_v51 = vpop.f32.mrf.mxu0  ;;  %v3595_v2 = vpop.f32.mrf.mxu1 }
 0x27f   : > { %2756 = vmatprep.mubr.f32.mxu0 %v848_v50  ;;  %v850_v10 = vadd.f32 %v849_v51, %v728_v7 }
 0x282   : > { %v853_v52 = vpop.f32.mrf.mxu0  ;;  %v3597_v53 = vpop.f32.mrf.mxu1 }
 0x283   : > { %v854_v9 = vadd.f32 %v853_v52, %v724_v48 }
 0x284   : > { %v855_v32 = vpop.f32.mrf.mxu0  ;;  %v3600_v54 = vpop.f32.mrf.mxu1 }
 0x285   : > { %v856_v12 = vadd.f32 %v855_v32, %v728_v7 }
 0x29f   : > { %v1001_v56 = vpop.f32.mrf.mxu0  ;;  %v3603_v57 = vpop.f32.mrf.mxu1 }
 0x2a0   : > { %v1002_v4 = vadd.f32 %v1001_v56, %v740_v62 }
 0x2a1   : > { %v1003_v59 = vpop.f32.mrf.mxu0  ;;  %v1080_v60 = vpop.f32.mrf.mxu1 }
 0x2a2   : > { %v3606_v61 = vadd.f32 %v1080_v60, %v752_v55  ;;  %v1004_v11 = vadd.f32 %v1003_v59, %v744_v6 }
 0x2a5   : > { %v1007_v63 = vpop.f32.mrf.mxu0  ;;  %v3613_v13 = vpop.f32.mrf.mxu1 }
 0x2a6   : > { %v1008_v1 = vadd.f32 %v1007_v63, %v740_v62 }
 0x2a7   : > { %v1009_v5 = vpop.f32.mrf.mxu0  ;;  %v1086_v15 = vpop.f32.mrf.mxu1 }
 0x2a8   : > { %2752 = vmatprep.subr.mxu0 %v1008_v1  ;;  %v1010_v8 = vadd.f32 %v1009_v5, %v744_v6  ;;  %v3628_v40 = vadd.f32 %v1086_v15, %v752_v55 }
 0x2a9   : > { %2753 = vmatpush3.xpose.msra.mxu0 %v1008_v1 }
 0x2aa   : > { %2754 = vmatprep.subr.mxu0 %v1002_v4 }
 0x2ad   : > { %2755 = vmatpush3.xpose.msra.mxu0 %v1002_v4 }
 0x2ae   : > { %2766 = vmatprep.subr.mxu0 %v1010_v8 }
 0x2b0   : > { %2757 = vmatmul.mubr.f32.vlgmr.msra.gmra.mxu0 %v854_v9 }
 0x2b1   : > { %2767 = vmatpush3.xpose.msra.mxu0 %v1010_v8  ;;  %2770 = vmatprep.mubr.f32.mxu0 %v850_v10 }
 0x2b2   : > { %2768 = vmatprep.subr.mxu0 %v1004_v11 }
 0x2b5   : > { %2769 = vmatpush3.xpose.msra.mxu0 %v1004_v11 }
 0x2b8   : > { %2771 = vmatmul.mubr.f32.vlgmr.msra.gmra.mxu0 %v856_v12 }
 0x2c3   : > { %v1155_v19 = vpop.f32.mrf.mxu0  ;;  %v1232_v20 = vpop.f32.mrf.mxu1 }
 0x2c4   : > { %v1156_v38 = vadd.f32 %v1155_v19, %v756_v26  ;;  %v1233_v39 = vadd.f32 %v1232_v20, %v764_v27  ;;  %v747_v19 = vsub.s32 6, %v3587_v45 }
 0x2c5   : > { %v1157_v23 = vpop.f32.mrf.mxu0  ;;  %v1234_v24 = vpop.f32.mrf.mxu1 }
 0x2c6   : > { %v3623_v28 = vadd.f32 %v1157_v23, %v760_v17  ;;  %v3626_v30 = vadd.f32 %v1234_v24, %v3618_v18  ;;  %v748_v24 = vrot.slane %v3590_v47, %v747_v19  ;;  %v2033_v19 = vld [vmem:[#allocation9 + $0x1e8] sm:$0xff] }
 0x2c7   : > { %v1161_v31 = vpop.f32.mrf.mxu0  ;;  %v1238_v33 = vpop.f32.mrf.mxu1 }
 0x2c8   : > { %v1162_v34 = vadd.f32 %v1161_v31, %v756_v26  ;;  %v1239_v35 = vadd.f32 %v1238_v33, %v764_v27  ;;  %v1085_v26 = vadd.f32 %v3613_v13, %v748_v24  ;;  %v732_v31 = vrot.slane %v3590_v47, %v731_v22 }
 0x2c9   : > { %v1163_v37 = vpop.f32.mrf.mxu0  ;;  %v1240_v13 = vpop.f32.mrf.mxu1 }
 0x2ca   : > { %2759 = vmatprep.subr.mxu1 %v1162_v34  ;;  %2787 = vmatprep.subr.mxu0 %v1239_v35  ;;  %v3630_v41 = vadd.f32 %v1163_v37, %v760_v17  ;;  %v925_v37 = vadd.f32 %v3593_v36, %v732_v31  ;;  %v1241_v22 = vadd.f32 %v1240_v13, %v3618_v18  ;;  %v2027_v13 = vld [vmem:[#allocation9 + $0x1b8] sm:$0xff] }
 0x2cb   : > { %2760 = vmatpush3.msra.mxu1 %v1162_v34  ;;  %2788 = vmatpush3.msra.mxu0 %v1239_v35 }
 0x2cc   : > { %2761 = vmatprep.subr.mxu1 %v1156_v38  ;;  %2789 = vmatprep.subr.mxu0 %v1233_v39 }
 0x2cd   : > { %2762 = vmatpush3.msra.mxu1 %v1156_v38  ;;  %2790 = vmatpush3.msra.mxu0 %v1233_v39  ;;  %v1079_v38 = vadd.f32 %v3603_v57, %v748_v24  ;;  %v2016_v24 = vld [vmem:[#allocation9 + $0x160] sm:$0xff] }
 0x2ce   : > { %2773 = vmatprep.subr.mxu1 %v3630_v41  ;;  %2794 = vmatprep.subr.mxu0 %v3628_v40 }
 0x370   : > { %v2758_v29 = vpop.f32.mrf.mxu0 }
 0x371   : > { %v1322_v42 = vsel %vm1318_vm1, %v2758_v29, -inf }
 0x372   : > { %1323 = vmax.xlane.f32.xlu1 %v1322_v42  ;;  %v1309_v43 = vpop.f32.mrf.mxu0 }
 0x373   : > { %v1319_v44 = vsel %vm1318_vm1, %v1309_v43, -inf }
 0x374   : > { %1320 = vmax.xlane.f32.xlu0 %v1319_v44 }
 0x378   : > { %v2772_v46 = vpop.f32.mrf.mxu0 }
 0x379   : > { %v1502_v48 = vsel %vm1318_vm1, %v2772_v46, -inf }
 0x37a   : > { %1503 = vmax.xlane.f32.xlu1 %v1502_v48  ;;  %v1490_v49 = vpop.f32.mrf.mxu0 }
 0x37b   : > { %v1499_v50 = vsel %vm1318_vm1, %v1490_v49, -inf }
 0x37c   : > { %1500 = vmax.xlane.f32.xlu0 %v1499_v50 }
 0x3fb   : > { %v1324_v51 = vpop.xlane.xlu1 %1323 }
 0x3fc   : > { %v1326_v52 = vsub.f32 %v2758_v29, %v1324_v51 }
 0x3fd   : > { %v1321_v21 = vpop.xlane.xlu0 %1320 }
 0x3fe   : > { %v1329_v32 = vmul.f32 1.442695, %v1326_v52  ;;  %v1325_v55 = vsub.f32 %v1309_v43, %v1321_v21 }
 0x400   : > { %2986 = vpow2.f32 %v1329_v32  ;;  %v1327_v56 = vmul.f32 1.442695, %v1325_v55 }
 0x402   : > { %2988 = vpow2.f32 %v1327_v56 }
 0x403   : > { %v1504_v58 = vpop.xlane.xlu1 %1503 }
 0x404   : > { %v1506_v59 = vsub.f32 %v2772_v46, %v1504_v58  ;;  %v736_v58 = vrot.slane %v3590_v47, %v735_v14 }
 0x405   : > { %v1501_v60 = vpop.xlane.xlu0 %1500 }
 0x406   : > { %v1509_v62 = vmul.f32 1.442695, %v1506_v59  ;;  %v1505_v63 = vsub.f32 %v1490_v49, %v1501_v60  ;;  %v933_v45 = vadd.f32 %v3600_v54, %v736_v58 }
 0x408   : > { %2990 = vpow2.f32 %v1509_v62  ;;  %v1507_v0 = vmul.f32 1.442695, %v1505_v63  ;;  %v927_v63 = vadd.f32 %v3595_v2, %v736_v58  ;;  %v1986_v58 = vld [vmem:[#allocation9 + $0x70] sm:$0xff] }
 0x40a   : > { %2992 = vpow2.f32 %v1507_v0 }
 0x40d   : > { %v2987_v1 = vpop.eup %2986 }
 0x40e   : > { %v1334_v3 = vsel %vm1318_vm1, %v2987_v1, 0.0 }
 0x40f   : > { %v2989_v4 = vpop.eup %2988  ;;  %1335 = vadd.xlane.f32.xlu1 %v1334_v3 }
 0x410   : > { %v1331_v5 = vsel %vm1318_vm1, %v2989_v4, 0.0 }
 0x411   : > { %1332 = vadd.xlane.f32.xlu0 %v1331_v5 }
 0x415   : > { %v2991_v6 = vpop.eup %2990 }
 0x416   : > { %v1514_v7 = vsel %vm1318_vm1, %v2991_v6, 0.0 }
 0x417   : > { %v2993_v8 = vpop.eup %2992  ;;  %1515 = vadd.xlane.f32.xlu1 %v1514_v7 }
 0x418   : > { %v1511_v9 = vsel %vm1318_vm1, %v2993_v8, 0.0 }
 0x419   : > { %1512 = vadd.xlane.f32.xlu0 %v1511_v9 }
 0x498   : > { %v1336_v10 = vpop.xlane.xlu1 %1335 }
 0x499   : > { %2994 = vrcp.f32 %v1336_v10 }
 0x49a   : > { %v1333_v11 = vpop.xlane.xlu0 %1332 }
 0x49b   : > { %2996 = vrcp.f32 %v1333_v11  ;;  %v2003_v11 = vld [vmem:[#allocation9 + $0xf8] sm:$0xff] }
 0x4a0   : > { %v1516_v12 = vpop.xlane.xlu1 %1515 }
 0x4a1   : > { %2998 = vrcp.f32 %v1516_v12  ;;  %v2035_v12 = vld [vmem:[#allocation9 + $0x1f8] sm:$0xff] }
 0x4a2   : > { %v1513_v15 = vpop.xlane.xlu0 %1512 }
 0x4a3   : > { %3000 = vrcp.f32 %v1513_v15  ;;  %v2019_v15 = vld [vmem:[#allocation9 + $0x178] sm:$0xff] }
 0x4a6   : > { %v2995_v16 = vpop.eup %2994 }
 0x4a7   : > { %v1340_v23 = vmul.f32 %v2995_v16, %v2987_v1  ;;  %v2034_v16 = vld [vmem:[#allocation9 + $0x1f0] sm:$0xff] }
 0x4a8   : > { %v2997_v17 = vpop.eup %2996 }
 0x4a9   : > { %v1339_v20 = vmul.f32 %v2997_v17, %v2989_v4  ;;  %v2018_v17 = vld [vmem:[#allocation9 + $0x170] sm:$0xff] }
 0x4ab   : > { %2763 = vmatprep.mubr.msk.f32.mxu1 %vm1318_vm1, %v1339_v20  ;;  %v2017_v20 = vld [vmem:[#allocation9 + $0x168] sm:$0xff] }
 0x4ac   : > { %2764 = vmatmul.mubr.msk.f32.vlgmr.msra.gmra.mxu1 %vm1318_vm1, %v1340_v23  ;;  %v2032_v23 = vld [vmem:[#allocation9 + $0x1e0] sm:$0xff] }
 0x4ad   : > { %2774 = vmatpush3.msra.mxu1 %v3630_v41 }
 0x4ae   : > { %2775 = vmatprep.subr.mxu1 %v3623_v28  ;;  %v2999_v27 = vpop.eup %2998 }
 0x4af   : > { %2776 = vmatpush3.msra.mxu1 %v3623_v28  ;;  %v1520_v35 = vmul.f32 %v2999_v27, %v2991_v6  ;;  %v931_v28 = vadd.f32 %v3597_v53, %v732_v31  ;;  %v2015_v27 = vld [vmem:[#allocation9 + $0x158] sm:$0xff]  ;;  %v2030_v31 = vld [vmem:[#allocation9 + $0x1d0] sm:$0xff] }
 0x4b0   : > { %v3001_v33 = vpop.eup %3000  ;;  %2780 = vmatprep.subr.mxu1 %v1085_v26 }
 0x4b1   : > { %v1519_v34 = vmul.f32 %v3001_v33, %v2993_v8  ;;  %v2014_v33 = vld [vmem:[#allocation9 + $0x150] sm:$0xff] }
 0x4b3   : > { %2777 = vmatprep.mubr.msk.f32.mxu1 %vm1318_vm1, %v1519_v34  ;;  %v2029_v34 = vld [vmem:[#allocation9 + $0x1c8] sm:$0xff] }
 0x4b4   : > { %2778 = vmatmul.mubr.msk.f32.vlgmr.msra.gmra.mxu1 %vm1318_vm1, %v1520_v35  ;;  %v2013_v35 = vld [vmem:[#allocation9 + $0x148] sm:$0xff] }
 0x4b5   : > { %2781 = vmatpush3.xpose.msra.mxu1 %v1085_v26  ;;  %2784 = vmatprep.mubr.f32.mxu1 %v925_v37  ;;  %v2031_v26 = vld [vmem:[#allocation9 + $0x1d8] sm:$0xff]  ;;  %v2028_v37 = vld [vmem:[#allocation9 + $0x1c0] sm:$0xff] }
 0x4b6   : > { %2782 = vmatprep.subr.mxu1 %v1079_v38 }
 0x4b9   : > { %2783 = vmatpush3.xpose.msra.mxu1 %v1079_v38  ;;  %v2012_v38 = vld [vmem:[#allocation9 + $0x140] sm:$0xff] }
 0x4ba   : > { %2801 = vmatprep.subr.mxu1 %v1241_v22 }
 0x4bc   : > { %2785 = vmatmul.mubr.f32.vlgmr.msra.gmra.mxu1 %v931_v28  ;;  %v2026_v28 = vld [vmem:[#allocation9 + $0x1b0] sm:$0xff] }
 0x4bd   : > { %2802 = vmatpush3.msra.mxu1 %v1241_v22  ;;  %v2011_v22 = vld [vmem:[#allocation9 + $0x138] sm:$0xff] }
 0x4be   : > { %2803 = vmatprep.subr.mxu1 %v3626_v30 }
 0x4bf   : > { %2804 = vmatpush3.msra.mxu1 %v3626_v30 }
 0x4c0   : > { %2640 = vmatprep.subr.mxu1 %v2003_v11  ;;  %v1991_v11 = vld [vmem:[#allocation9 + $0x98] sm:$0xff] }
 0x56c   : > { %v3661_v36 = vpop.f32.mrf.mxu1 }
 0x56e   : > { %v3663_v57 = vpop.f32.mrf.mxu1 }
 0x574   : > { %v3665_v39 = vpop.f32.mrf.mxu1 }
 0x576   : > { %v3667_v41 = vpop.f32.mrf.mxu1 }
 0x57c   : > { %v2786_v29 = vpop.f32.mrf.mxu1 }
 0x57d   : > { %v1682_v18 = vsel %vm1318_vm1, %v2786_v29, -inf }
 0x57e   : > { %1683 = vmax.xlane.f32.xlu1 %v1682_v18  ;;  %v1670_v53 = vpop.f32.mrf.mxu1  ;;  %v2025_v18 = vld [vmem:[#allocation9 + $0x1a8] sm:$0xff] }
 0x57f   : > { %v1679_v42 = vsel %vm1318_vm1, %v1670_v53, -inf }
 0x580   : > { %1680 = vmax.xlane.f32.xlu0 %v1679_v42  ;;  %v2024_v42 = vld [vmem:[#allocation9 + $0x1a0] sm:$0xff] }
 0x607   : > { %v1684_v43 = vpop.xlane.xlu1 %1683 }
 0x608   : > { %v1686_v44 = vsub.f32 %v2786_v29, %v1684_v43  ;;  %v2010_v29 = vld [vmem:[#allocation9 + $0x130] sm:$0xff]  ;;  %v2008_v43 = vld [vmem:[#allocation9 + $0x120] sm:$0xff] }
 0x609   : > { %v1681_v46 = vpop.xlane.xlu0 %1680 }
 0x60a   : > { %v1689_v30 = vmul.f32 1.442695, %v1686_v44  ;;  %v1685_v48 = vsub.f32 %v1670_v53, %v1681_v46  ;;  %v2009_v53 = vld [vmem:[#allocation9 + $0x128] sm:$0xff]  ;;  %v2023_v44 = vld [vmem:[#allocation9 + $0x198] sm:$0xff] }
 0x60b   : > { %v2007_v46 = vld [vmem:[#allocation9 + $0x118] sm:$0xff] }
 0x60c   : > { %3002 = vpow2.f32 %v1689_v30  ;;  %v1687_v49 = vmul.f32 1.442695, %v1685_v48  ;;  %v2022_v30 = vld [vmem:[#allocation9 + $0x190] sm:$0xff] }
 0x60d   : > { %v2006_v48 = vld [vmem:[#allocation9 + $0x110] sm:$0xff] }
 0x60e   : > { %3004 = vpow2.f32 %v1687_v49 }
 0x619   : > { %v3003_v50 = vpop.eup %3002 }
 0x61a   : > { %v1694_v51 = vsel %vm1318_vm1, %v3003_v50, 0.0 }
 0x61b   : > { %v3005_v52 = vpop.eup %3004  ;;  %1695 = vadd.xlane.f32.xlu1 %v1694_v51 }
 0x61c   : > { %v1691_v21 = vsel %vm1318_vm1, %v3005_v52, 0.0 }
 0x61d   : > { %1692 = vadd.xlane.f32.xlu0 %v1691_v21 }
 0x6a4   : > { %v1696_v32 = vpop.xlane.xlu1 %1695 }
 0x6a5   : > { %3006 = vrcp.f32 %v1696_v32 }
 0x6a6   : > { %v1693_v55 = vpop.xlane.xlu0 %1692 }
 0x6a7   : > { %3008 = vrcp.f32 %v1693_v55  ;;  %v1987_v55 = vld [vmem:[#allocation9 + $0x78] sm:$0xff] }
 0x6b2   : > { %v3007_v56 = vpop.eup %3006 }
 0x6b3   : > { %v1700_v62 = vmul.f32 %v3007_v56, %v3003_v50  ;;  %v2002_v56 = vld [vmem:[#allocation9 + $0xf0] sm:$0xff] }
 0x6b4   : > { %v3009_v59 = vpop.eup %3008 }
 0x6b5   : > { %v1699_v60 = vmul.f32 %v3009_v59, %v3005_v52  ;;  %v2001_v59 = vld [vmem:[#allocation9 + $0xe8] sm:$0xff] }
 0x6b7   : > { %2791 = vmatprep.mubr.msk.f32.mxu0 %vm1318_vm1, %v1699_v60  ;;  %v1985_v60 = vld [vmem:[#allocation9 + $0x68] sm:$0xff] }
 0x6b8   : > { %2792 = vmatmul.mubr.msk.f32.vlgmr.msra.gmra.mxu0 %vm1318_vm1, %v1700_v62  ;;  %v2000_v62 = vld [vmem:[#allocation9 + $0xe0] sm:$0xff] }
 0x6b9   : > { %2795 = vmatpush3.xpose.msra.mxu0 %v3628_v40  ;;  %2798 = vmatprep.mubr.f32.mxu0 %v927_v63  ;;  %v1984_v63 = vld [vmem:[#allocation9 + $0x60] sm:$0xff] }
 0x6ba   : > { %2796 = vmatprep.subr.mxu0 %v3606_v61 }
 0x6bd   : > { %2797 = vmatpush3.xpose.msra.mxu0 %v3606_v61 }
 0x6be   : > { %2678 = vmatprep.subr.mxu0 %v2035_v12  ;;  %v1975_v12 = vld [vmem:[#allocation9 + $0x18] sm:$0xff] }
 0x6c0   : > { %2799 = vmatmul.mubr.f32.vlgmr.msra.gmra.mxu0 %v933_v45  ;;  %v1999_v45 = vld [vmem:[#allocation9 + $0xd8] sm:$0xff] }
 0x6c1   : > { %2679 = vmatpush3.msra.mxu0 %v2019_v15  ;;  %v1990_v15 = vld [vmem:[#allocation9 + $0x90] sm:$0xff] }
 0x6c2   : > { %2680 = vmatprep.subr.mxu0 %v2034_v16  ;;  %v1974_v16 = vld [vmem:[#allocation9 + $0x10] sm:$0xff] }
 0x6c3   : > { %2681 = vmatpush3.msra.mxu0 %v2018_v17  ;;  %v1989_v17 = vld [vmem:[#allocation9 + $0x88] sm:$0xff] }
 0x6c4   : > { %2682 = vmatprep.subr.mxu0 %v2033_v19  ;;  %v1973_v19 = vld [vmem:[#allocation9 + $0x8] sm:$0xff] }
 0x6c5   : > { %2683 = vmatpush3.msra.mxu0 %v2017_v20  ;;  %v1988_v20 = vld [vmem:[#allocation9 + $0x80] sm:$0xff] }
 0x6c6   : > { %2684 = vmatprep.subr.mxu0 %v2032_v23  ;;  %v1972_v23 = vld [vmem:[#allocation9] sm:$0xff] }
 0x6c7   : > { %2685 = vmatpush3.msra.mxu0 %v2016_v24  ;;  %v2021_v24 = vld [vmem:[#allocation9 + $0x188] sm:$0xff] }
 0x6c8   : > { %2686 = vmatprep.subr.mxu0 %v2031_v26  ;;  %v2005_v26 = vld [vmem:[#allocation9 + $0x108] sm:$0xff] }
 0x6c9   : > { %2687 = vmatpush3.msra.mxu0 %v2015_v27  ;;  %v2020_v27 = vld [vmem:[#allocation9 + $0x180] sm:$0xff] }
 0x6ca   : > { %2688 = vmatprep.subr.mxu0 %v2030_v31  ;;  %v2004_v31 = vld [vmem:[#allocation9 + $0x100] sm:$0xff] }
 0x6cb   : > { %2689 = vmatpush3.msra.mxu0 %v2014_v33 }
 0x6cc   : > { %2690 = vmatprep.subr.mxu0 %v2029_v34 }
 0x6cd   : > { %2691 = vmatpush3.msra.mxu0 %v2013_v35 }
 0x6ce   : > { %2692 = vmatprep.subr.mxu0 %v2028_v37  ;;  %v2598_v37 = vld [vmem:[%s3803_s6] ss:$0 sm:$0xff] }
 0x6cf   : > { %2693 = vmatpush3.msra.mxu0 %v2012_v38 }
 0x6d0   : > { %2694 = vmatprep.subr.mxu0 %v2027_v13 }
 0x6d1   : > { %2695 = vmatpush3.msra.mxu0 %v2011_v22 }
 0x6d2   : > { %2696 = vmatprep.subr.mxu0 %v2026_v28 }
 0x6d3   : > { %2697 = vmatpush3.msra.mxu0 %v2010_v29 }
 0x6d4   : > { %2698 = vmatprep.subr.mxu0 %v2025_v18 }
 0x6d5   : > { %2699 = vmatpush3.msra.mxu0 %v2009_v53 }
 0x6d6   : > { %2700 = vmatprep.subr.mxu0 %v2024_v42 }
 0x6d7   : > { %2701 = vmatpush3.msra.mxu0 %v2008_v43 }
 0x6d8   : > { %2702 = vmatprep.subr.mxu0 %v2023_v44  ;;  %v3026_v44 = vld [vmem:[%s3516_s27] sm:$0xff] }
 0x6d9   : > { %2703 = vmatpush3.msra.mxu0 %v2007_v46 }
 0x6da   : > { %2704 = vmatprep.subr.mxu0 %v2022_v30 }
 0x6db   : > { %2705 = vmatpush3.msra.mxu0 %v2006_v48  ;;  %v3027_v48 = vld [vmem:[%s3516_s27 + $0x8] sm:$0xff] }
 0x6dc   : > { %2706 = vmatprep.subr.mxu0 %v2021_v24  ;;  %v3028_v24 = vld [vmem:[%s3798_s1] ss:$0 sm:$0xff] }
 0x6dd   : > { %2707 = vmatpush3.msra.mxu0 %v2005_v26 }
 0x6de   : > { %2708 = vmatprep.subr.mxu0 %v2020_v27 }
 0x6df   : > { %2709 = vmatpush3.msra.mxu0 %v2004_v31 }
 0x778   : > { %v3683_v47 = vpop.f32.mrf.mxu0 }
 0x77a   : > { %v3685_v14 = vpop.f32.mrf.mxu0 }
 0x780   : > { %v2800_v0 = vpop.f32.mrf.mxu0 }
 0x781   : > { %v1862_v2 = vsel %vm1318_vm1, %v2800_v0, -inf }
 0x782   : > { %1863 = vmax.xlane.f32.xlu1 %v1862_v2  ;;  %v1850_v1 = vpop.f32.mrf.mxu0  ;;  %v1998_v2 = vld [vmem:[#allocation9 + $0xd0] sm:$0xff] }
 0x783   : > { %v1859_v3 = vsel %vm1318_vm1, %v1850_v1, -inf }
 0x784   : > { %1860 = vmax.xlane.f32.xlu0 %v1859_v3  ;;  %v1997_v3 = vld [vmem:[#allocation9 + $0xc8] sm:$0xff] }
 0x80b   : > { %v1864_v40 = vpop.xlane.xlu1 %1863 }
 0x80c   : > { %v1866_v4 = vsub.f32 %v2800_v0, %v1864_v40  ;;  %v1983_v0 = vld [vmem:[#allocation9 + $0x58] sm:$0xff]  ;;  %v1981_v40 = vld [vmem:[#allocation9 + $0x48] sm:$0xff] }
 0x80d   : > { %v1861_v5 = vpop.xlane.xlu0 %1860 }
 0x80e   : > { %v1869_v6 = vmul.f32 1.442695, %v1866_v4  ;;  %v1865_v61 = vsub.f32 %v1850_v1, %v1861_v5  ;;  %v1982_v1 = vld [vmem:[#allocation9 + $0x50] sm:$0xff]  ;;  %v1980_v4 = vld [vmem:[#allocation9 + $0x40] sm:$0xff]  ;;  %v1995_v5 = vld [vmem:[#allocation9 + $0xb8] sm:$0xff] }
 0x810   : > { %3010 = vpow2.f32 %v1869_v6  ;;  %v1867_v54 = vmul.f32 1.442695, %v1865_v61  ;;  %v1979_v6 = vld [vmem:[#allocation9 + $0x38] sm:$0xff]  ;;  %v1994_v61 = vld [vmem:[#allocation9 + $0xb0] sm:$0xff] }
 0x812   : > { %3012 = vpow2.f32 %v1867_v54  ;;  %v1978_v54 = vld [vmem:[#allocation9 + $0x30] sm:$0xff] }
 0x81d   : > { %v3689_v7 = vpop.eup %3010 }
 0x81e   : > { %v1874_v8 = vsel %vm1318_vm1, %v3689_v7, 0.0 }
 0x81f   : > { %v3693_v9 = vpop.eup %3012  ;;  %1875 = vadd.xlane.f32.xlu1 %v1874_v8  ;;  %v1977_v8 = vld [vmem:[#allocation9 + $0x28] sm:$0xff] }
 0x820   : > { %v1871_v10 = vsel %vm1318_vm1, %v3693_v9, 0.0 }
 0x821   : > { %1872 = vadd.xlane.f32.xlu0 %v1871_v10  ;;  %v1976_v10 = vld [vmem:[#allocation9 + $0x20] sm:$0xff] }
 0x8a8   : > { %v1876_v49 = vpop.xlane.xlu1 %1875 }
 0x8a9   : > { %3014 = vrcp.f32 %v1876_v49 }
 0x8aa   : > { %v1873_v50 = vpop.xlane.xlu0 %1872 }
 0x8ab   : > { %3016 = vrcp.f32 %v1873_v50  ;;  %v2238_v50 = vld [vmem:[#allocation11 + $0x78] sm:$0xff] }
 0x8b6   : > { %v3015_v51 = vpop.eup %3014 }
 0x8b7   : > { %v1880_v32 = vmul.f32 %v3015_v51, %v3689_v7  ;;  %v1993_v7 = vld [vmem:[#allocation9 + $0xa8] sm:$0xff]  ;;  %v2237_v51 = vld [vmem:[#allocation11 + $0x70] sm:$0xff] }
 0x8b8   : > { %v3017_v52 = vpop.eup %3016 }
 0x8b9   : > { %v1879_v21 = vmul.f32 %v3017_v52, %v3693_v9  ;;  %v1992_v9 = vld [vmem:[#allocation9 + $0xa0] sm:$0xff] }
 0x8bb   : > { %2805 = vmatprep.mubr.msk.f32.mxu1 %vm1318_vm1, %v1879_v21 }
 0x8bc   : > { %2806 = vmatmul.mubr.msk.f32.vlgmr.msra.gmra.mxu1 %vm1318_vm1, %v1880_v32 }
 0x8bd   : > { %2641 = vmatpush3.msra.mxu1 %v1987_v55  ;;  %2107 = vmatprep.mubr.f32.mxu1 %v3667_v41  ;;  %v1996_v41 = vld [vmem:[#allocation9 + $0xc0] sm:$0xff] }
 0x8be   : > { %2642 = vmatprep.subr.mxu1 %v2002_v56 }
 0x8bf   : > { %2643 = vmatpush3.msra.mxu1 %v1986_v58 }
 0x8c0   : > { %2644 = vmatprep.subr.mxu1 %v2001_v59 }
 0x8c1   : > { %2645 = vmatpush3.msra.mxu1 %v1985_v60 }
 0x8c2   : > { %2646 = vmatprep.subr.mxu1 %v2000_v62 }
 0x8c3   : > { %2647 = vmatpush3.msra.mxu1 %v1984_v63 }
 0x8c4   : > { %2648 = vmatprep.subr.mxu1 %v1999_v45  ;;  %v2236_v45 = vld [vmem:[#allocation11 + $0x68] sm:$0xff] }
 0x8c5   : > { %2649 = vmatpush3.msra.mxu1 %v1983_v0  ;;  %v2235_v0 = vld [vmem:[#allocation11 + $0x60] sm:$0xff] }
 0x8c6   : > { %2650 = vmatprep.subr.mxu1 %v1998_v2  ;;  %v2234_v2 = vld [vmem:[#allocation11 + $0x58] sm:$0xff] }
 0x8c7   : > { %2651 = vmatpush3.msra.mxu1 %v1982_v1  ;;  %v2233_v1 = vld [vmem:[#allocation11 + $0x50] sm:$0xff] }
 0x8c8   : > { %2652 = vmatprep.subr.mxu1 %v1997_v3  ;;  %v2232_v3 = vld [vmem:[#allocation11 + $0x48] sm:$0xff] }
 0x8c9   : > { %2653 = vmatpush3.msra.mxu1 %v1981_v40  ;;  %v2230_v40 = vld [vmem:[#allocation11 + $0x38] sm:$0xff] }
 0x8ca   : > { %2654 = vmatprep.subr.mxu1 %v1996_v41  ;;  %v2229_v41 = vld [vmem:[#allocation11 + $0x30] sm:$0xff] }
 0x8cb   : > { %2655 = vmatpush3.msra.mxu1 %v1980_v4  ;;  %v2228_v4 = vld [vmem:[#allocation11 + $0x28] sm:$0xff] }
 0x8cc   : > { %2656 = vmatprep.subr.mxu1 %v1995_v5  ;;  %v2227_v5 = vld [vmem:[#allocation11 + $0x20] sm:$0xff] }
 0x8cd   : > { %2657 = vmatpush3.msra.mxu1 %v1979_v6  ;;  %v2226_v6 = vld [vmem:[#allocation11 + $0x18] sm:$0xff] }
 0x8ce   : > { %2658 = vmatprep.subr.mxu1 %v1994_v61  ;;  %v2225_v61 = vld [vmem:[#allocation11 + $0x10] sm:$0xff] }
 0x8cf   : > { %2659 = vmatpush3.msra.mxu1 %v1978_v54  ;;  %v2224_v54 = vld [vmem:[#allocation11 + $0x8] sm:$0xff] }
 0x8d0   : > { %2660 = vmatprep.subr.mxu1 %v1993_v7  ;;  %v2223_v7 = vld [vmem:[#allocation11] sm:$0xff] }
 0x8d1   : > { %2661 = vmatpush3.msra.mxu1 %v1977_v8  ;;  %v2346_v8 = vld [vmem:[#allocation12 + $0x78] sm:$0xff] }
 0x8d2   : > { %2662 = vmatprep.subr.mxu1 %v1992_v9  ;;  %v2345_v9 = vld [vmem:[#allocation12 + $0x70] sm:$0xff]  ;;  %2843 = vmatprep.subr.mxu0 %v2346_v8 }
 0x8d3   : > { %2663 = vmatpush3.msra.mxu1 %v1976_v10  ;;  %v2344_v10 = vld [vmem:[#allocation12 + $0x68] sm:$0xff] }
 0x8d4   : > { %2664 = vmatprep.subr.mxu1 %v1991_v11 }
 0x8d5   : > { %2665 = vmatpush3.msra.mxu1 %v1975_v12 }
 0x8d6   : > { %2666 = vmatprep.subr.mxu1 %v1990_v15 }
 0x8d7   : > { %2667 = vmatpush3.msra.mxu1 %v1974_v16 }
 0x8d8   : > { %2668 = vmatprep.subr.mxu1 %v1989_v17 }
 0x8d9   : > { %2669 = vmatpush3.msra.mxu1 %v1973_v19 }
 0x8da   : > { %2670 = vmatprep.subr.mxu1 %v1988_v20 }
 0x8db   : > { %2671 = vmatpush3.msra.mxu1 %v1972_v23 }
 0x8dc   : > { %2108 = vmatmul.mubr.f32.vlgmr.msra.gmra.mxu1 %v3663_v57  ;;  %2808 = vmatprep.subr.mxu1 %v2238_v50 }
 0x8dd   : > { %2112 = vmatprep.mubr.f32.mxu1 %v3665_v39  ;;  %2809 = vmatpush3.msra.mxu1 %v2238_v50 }
 0x8de   : > { %2810 = vmatprep.subr.mxu1 %v2237_v51 }
 0x8df   : > { %2811 = vmatpush3.msra.mxu1 %v2237_v51 }
 0x8e0   : > { %2113 = vmatmul.mubr.f32.gmra.mxu1 %v3661_v36  ;;  %2812 = vmatprep.subr.mxu1 %v2236_v45 }
 0x8e1   : > { %2813 = vmatpush3.msra.mxu1 %v2236_v45 }
 0x8e2   : > { %2814 = vmatprep.subr.mxu1 %v2235_v0 }
 0x8e3   : > { %2815 = vmatpush3.msra.mxu1 %v2235_v0 }
 0x8e4   : > { %2816 = vmatprep.subr.mxu1 %v2234_v2 }
 0x8e5   : > { %2817 = vmatpush3.msra.mxu1 %v2234_v2 }
 0x8e6   : > { %2818 = vmatprep.subr.mxu1 %v2233_v1 }
 0x8e7   : > { %2819 = vmatpush3.msra.mxu1 %v2233_v1 }
 0x8e8   : > { %2820 = vmatprep.subr.mxu1 %v2232_v3 }
 0x8e9   : > { %2821 = vmatpush3.msra.mxu1 %v2232_v3 }
 0x97c   : > { %v2807_v33 = vpop.f32.mrf.mxu1 }
 0x97e   : > { %v1953_v34 = vpop.f32.mrf.mxu1 }
 0x97f   : > { %2182 = vmatprep.mubr.f32.mxu0 %v1953_v34 }
 0x980   : > { %2183 = vmatmul.mubr.f32.vlgmr.msra.gmra.mxu0 %v3685_v14 }
 0x981   : > { %2187 = vmatprep.mubr.f32.mxu0 %v2807_v33  ;;  %2844 = vmatpush3.msra.mxu0 %v2346_v8  ;;  %v3029_v33 = vld [vmem:[%s3799_s2] ss:$0 sm:$0xff] }
 0x982   : > { %2845 = vmatprep.subr.mxu0 %v2345_v9 }
 0x983   : > { %2846 = vmatpush3.msra.mxu0 %v2345_v9 }
 0x984   : > { %2188 = vmatmul.mubr.f32.gmra.mxu0 %v3683_v47  ;;  %2847 = vmatprep.subr.mxu0 %v2344_v10 }
 0x985   : > { %2848 = vmatpush3.msra.mxu0 %v2344_v10 }
 0x99c   : > { %v2672_v57 = vpop.f32.mrf.mxu1 }
 0x99e   : > { %v2673_v39 = vpop.f32.mrf.mxu1 }
 0x99f   : > { %v2674_v35 = vadd.f32 %v2673_v39, %v2672_v57 }
 0x9a0   : > { %v2675_v36 = vpop.f32.mrf.mxu1 }
 0x9a1   : > { %v2110_v28 = vadd.f32 %v2674_v35, %v2598_v37  ;;  %v2342_v35 = vld [vmem:[#allocation12 + $0x58] sm:$0xff] }
 0x9a2   : > { %v2676_v38 = vpop.f32.mrf.mxu1 }
 0x9a3   : > { %v2677_v29 = vadd.f32 %v2676_v38, %v2675_v36  ;;  %v2343_v36 = vld [vmem:[#allocation12 + $0x60] sm:$0xff]  ;;  %v2340_v38 = vld [vmem:[#allocation12 + $0x48] sm:$0xff] }
 0x9a4   : > { %2849 = vmatprep.subr.mxu0 %v2343_v36 }
 0x9a5   : > { %v2115_v47 = vadd.f32 %v2677_v29, %v2598_v37  ;;  %2850 = vmatpush3.msra.mxu0 %v2343_v36  ;;  %v2341_v37 = vld [vmem:[#allocation12 + $0x50] sm:$0xff]  ;;  %v2336_v29 = vld [vmem:[#allocation12 + $0x28] sm:$0xff] }
 0x9a6   : > { %2851 = vmatprep.subr.mxu0 %v2342_v35 }
 0x9a7   : > { %2852 = vmatpush3.msra.mxu0 %v2342_v35 }
 0x9a8   : > { %2853 = vmatprep.subr.mxu0 %v2341_v37 }
 0x9a9   : > { %2854 = vmatpush3.msra.mxu0 %v2341_v37 }
 0x9aa   : > { %2855 = vmatprep.subr.mxu0 %v2340_v38 }
 0x9ab   : > { %2856 = vmatpush3.msra.mxu0 %v2340_v38 }
 0xa40   : > { %v2710_v13 = vpop.f32.mrf.mxu0 }
 0xa42   : > { %v2711_v22 = vpop.f32.mrf.mxu0 }
 0xa43   : > { %v2712_v18 = vadd.f32 %v2711_v22, %v2710_v13  ;;  %v2339_v13 = vld [vmem:[#allocation12 + $0x40] sm:$0xff]  ;;  %v2338_v22 = vld [vmem:[#allocation12 + $0x38] sm:$0xff] }
 0xa44   : > { %v2713_v14 = vpop.f32.mrf.mxu0  ;;  %2857 = vmatprep.subr.mxu0 %v2339_v13 }
 0xa45   : > { %v2185_v53 = vadd.f32 %v2712_v18, %v2110_v28  ;;  %2858 = vmatpush3.msra.mxu0 %v2339_v13  ;;  %v2337_v28 = vld [vmem:[#allocation12 + $0x30] sm:$0xff]  ;;  %v2335_v18 = vld [vmem:[#allocation12 + $0x20] sm:$0xff] }
 0xa46   : > { %v2714_v42 = vpop.f32.mrf.mxu0  ;;  %2859 = vmatprep.subr.mxu0 %v2338_v22 }
 0xa47   : > { %v2715_v43 = vadd.f32 %v2714_v42, %v2713_v14  ;;  %v3711_v46 = vadd.f32 %v3026_v44, %v2185_v53  ;;  %2860 = vmatpush3.msra.mxu0 %v2338_v22  ;;  %v2334_v14 = vld [vmem:[#allocation12 + $0x18] sm:$0xff]  ;;  %v2333_v53 = vld [vmem:[#allocation12 + $0x10] sm:$0xff]  ;;  %v2332_v42 = vld [vmem:[#allocation12 + $0x8] sm:$0xff] }
 0xa48   : > { %2861 = vmatprep.subr.mxu0 %v2337_v28 }
 0xa49   : > { %v2190_v30 = vadd.f32 %v2715_v43, %v2115_v47  ;;  %2195 = vadd.xlane.f32.xlu0 %v3711_v46  ;;  %2862 = vmatpush3.msra.mxu0 %v2337_v28  ;;  %v2331_v47 = vld [vmem:[#allocation12] sm:$0xff]  ;;  %v2599_v43 = vld [vmem:[%s3805_s8] ss:$0 sm:$0xff] }
 0xa4a   : > { %2863 = vmatprep.subr.mxu0 %v2336_v29 }
 0xa4b   : > { %v3715_v49 = vadd.f32 %v3027_v48, %v2190_v30  ;;  %2864 = vmatpush3.msra.mxu0 %v2336_v29 }
 0xa4c   : > { %2865 = vmatprep.subr.mxu0 %v2335_v18 }
 0xa4d   : > { %2197 = vadd.xlane.f32.xlu1 %v3715_v49  ;;  %2866 = vmatpush3.msra.mxu0 %v2335_v18 }
 0xa4e   : > { %2867 = vmatprep.subr.mxu0 %v2334_v14 }
 0xa4f   : > { %2868 = vmatpush3.msra.mxu0 %v2334_v14 }
 0xa50   : > { %2869 = vmatprep.subr.mxu0 %v2333_v53 }
 0xa51   : > { %2870 = vmatpush3.msra.mxu0 %v2333_v53 }
 0xa52   : > { %2871 = vmatprep.subr.mxu0 %v2332_v42 }
 0xa53   : > { %2872 = vmatpush3.msra.mxu0 %v2332_v42 }
 0xa54   : > { %2873 = vmatprep.subr.mxu0 %v2331_v47 }
 0xa55   : > { %2874 = vmatpush3.msra.mxu0 %v2331_v47 }
 0xad2   : > { %v2196_v52 = vpop.xlane.xlu0 %2195 }
 0xad3   : > { %v2199_v21 = vmul.f32 0.03125, %v2196_v52 }
 0xad5   : > { %v2201_v32 = vsub.f32 %v3711_v46, %v2199_v21 }
 0xad6   : > { %v2198_v55 = vpop.xlane.xlu1 %2197 }
 0xad7   : > { %v2200_v56 = vmul.f32 0.03125, %v2198_v55  ;;  %v3720_v58 = vmul.f32 %v3540_v25, %v2201_v32 }
 0xad9   : > { %v2202_v59 = vsub.f32 %v3715_v49, %v2200_v56  ;;  %v2205_v60 = vmul.f32 %v3720_v58, %v3720_v58 }
 0xadb   : > { %2207 = vadd.xlane.f32.xlu0 %v2205_v60  ;;  %v3726_v62 = vmul.f32 %v3540_v25, %v2202_v59  ;;  %v2231_v25 = vld [vmem:[#allocation11 + $0x40] sm:$0xff] }
 0xadc   : > { %2822 = vmatprep.subr.mxu1 %v2231_v25 }
 0xadd   : > { %v2206_v63 = vmul.f32 %v3726_v62, %v3726_v62  ;;  %2823 = vmatpush3.msra.mxu1 %v2231_v25 }
 0xade   : > { %2824 = vmatprep.subr.mxu1 %v2230_v40 }
 0xadf   : > { %2209 = vadd.xlane.f32.xlu1 %v2206_v63  ;;  %2825 = vmatpush3.msra.mxu1 %v2230_v40  ;;  %v2600_v63 = vld [vmem:[%s3807_s10] ss:$0 sm:$0xff] }
 0xae0   : > { %2826 = vmatprep.subr.mxu1 %v2229_v41 }
 0xae1   : > { %2827 = vmatpush3.msra.mxu1 %v2229_v41 }
 0xae2   : > { %2828 = vmatprep.subr.mxu1 %v2228_v4 }
 0xae3   : > { %2829 = vmatpush3.msra.mxu1 %v2228_v4 }
 0xae4   : > { %2830 = vmatprep.subr.mxu1 %v2227_v5 }
 0xae5   : > { %2831 = vmatpush3.msra.mxu1 %v2227_v5 }
 0xae6   : > { %2832 = vmatprep.subr.mxu1 %v2226_v6 }
 0xae7   : > { %2833 = vmatpush3.msra.mxu1 %v2226_v6 }
 0xae8   : > { %2834 = vmatprep.subr.mxu1 %v2225_v61 }
 0xae9   : > { %2835 = vmatpush3.msra.mxu1 %v2225_v61 }
 0xaea   : > { %2836 = vmatprep.subr.mxu1 %v2224_v54 }
 0xaeb   : > { %2837 = vmatpush3.msra.mxu1 %v2224_v54 }
 0xaec   : > { %2838 = vmatprep.subr.mxu1 %v2223_v7 }
 0xaed   : > { %2839 = vmatpush3.msra.mxu1 %v2223_v7 }
 0xb64   : > { %v2208_v11 = vpop.xlane.xlu0 %2207 }
 0xb65   : > { %v2211_v12 = vmul.f32 0.03125, %v2208_v11 }
 0xb67   : > { %v2213_v15 = vadd.f32 1e-05, %v2211_v12 }
 0xb68   : > { %v2210_v16 = vpop.xlane.xlu1 %2209 }
 0xb69   : > { %3018 = vrsqrt.f32 %v2213_v15  ;;  %v2212_v17 = vmul.f32 0.03125, %v2210_v16 }
 0xb6b   : > { %v2214_v19 = vadd.f32 1e-05, %v2212_v17 }
 0xb6d   : > { %3020 = vrsqrt.f32 %v2214_v19 }
 0xb76   : > { %v3019_v20 = vpop.eup %3018 }
 0xb77   : > { %v2217_v23 = vmul.f32 %v3019_v20, %v3720_v58 }
 0xb79   : > { %v2219_v26 = vmul.f32 %v3028_v24, %v2217_v23 }
 0xb7a   : > { %v3021_v27 = vpop.eup %3020 }
 0xb7b   : > { %v2218_v31 = vmul.f32 %v3021_v27, %v3726_v62  ;;  %v2221_v34 = vadd.f32 %v3029_v33, %v2219_v26 }
 0xb7d   : > { %2840 = vmatprep.mubr.f32.mxu1 %v2221_v34  ;;  %v2220_v57 = vmul.f32 %v3028_v24, %v2218_v31 }
 0xb7f   : > { %v2222_v39 = vadd.f32 %v3029_v33, %v2220_v57 }
 0xb81   : > { %2841 = vmatmul.mubr.f32.vlgmr.msra.gmra.mxu1 %v2222_v39 }
 0xc41   : > { %v2842_v44 = vpop.f32.mrf.mxu1 }
 0xc42   : > { %v2318_v30 = vadd.f32 %v2842_v44, %v2599_v43 }
 0xc43   : > { %v2312_v48 = vpop.f32.mrf.mxu1 }
 0xc44   : > { %v2324_v50 = vmul.f32 0.70710677, %v2318_v30  ;;  %v2313_v51 = vadd.f32 %v2599_v43, %v2312_v48  ;;  %v2322_v59 = vmul.f32 0.5, %v2318_v30 }
 0xc46   : > { %3022 = verf.f32 %v2324_v50  ;;  %v2323_v52 = vmul.f32 0.70710677, %v2313_v51  ;;  %v2321_v56 = vmul.f32 0.5, %v2313_v51 }
 0xc48   : > { %3024 = verf.f32 %v2323_v52 }
 0xc53   : > { %v3023_v21 = vpop.eup %3022 }
 0xc54   : > { %v2328_v55 = vadd.f32 1.0, %v3023_v21 }
 0xc55   : > { %v3025_v32 = vpop.eup %3024 }
 0xc56   : > { %v2327_v58 = vadd.f32 1.0, %v3025_v32  ;;  %v2330_v62 = vmul.f32 %v2328_v55, %v2322_v59 }
 0xc58   : > { %v2329_v60 = vmul.f32 %v2327_v58, %v2321_v56 }
 0xc5a   : > { %2875 = vmatprep.mubr.f32.mxu0 %v2329_v60 }
 0xc5b   : > { %2876 = vmatmul.mubr.f32.vlgmr.msra.gmra.mxu0 %v2330_v62 }
 0xd1b   : > { %v2877_v45 = vpop.f32.mrf.mxu0 }
 0xd1c   : > { %v2426_v0 = vadd.f32 %v2877_v45, %v2600_v63 }
 0xd1d   : > { %v2420_v2 = vpop.f32.mrf.mxu0 }
 0xd1e   : > { %v2430_v1 = vadd.f32 %v2426_v0, %v3715_v49  ;;  %v2421_v3 = vadd.f32 %v2600_v63, %v2420_v2 }
 0xd20   : > { %2432 = vst [vmem:[%s475_s4 + $0x8] sm:$0xff] %v2430_v1  ;;  %v2429_v25 = vadd.f32 %v2421_v3, %v3711_v46 }
 0xd22   : > { %2431 = vst [vmem:[%s475_s4] sm:$0xff] %v2429_v25 }
 0xd23   : > { %3201 = shalt.err (!%p3198_p3)
}
 0xd24   : > { %s3202_s26 = scalar_lea.hbm %s3753_s21, 256  ;;  %s3206_s3 = scalar_lea.hbm %s3808_s11, 512 }
 0xd25   : > { %p3203_p4 = scmp.ne.s32.totalorder %s3753_s21, %s3202_s26  ;;  %p3207_p2 = scmp.lt.s32.totalorder %s3753_s21, %s3808_s11 }
 0xd26   : > { %p3208_p7 = scmp.lt.s32.totalorder %s3206_s3, %s3202_s26 }
 0xd27   : > { %p3204_p12 = pnand %p3203_p4, %p3842_p11 }
 0xd28   : > { %p3209_p8 = por %p3208_p7, %p3207_p2 }
 0xd29   : > { %p3205_p6 = pneg %p3204_p12 }
 0xd2b   : > { %p3210_p10 = pnand %p3209_p8, %p3205_p6 }
 0xd2d   : > { %3213 = shalt.err (!%p3210_p10)
}
 0xd2e   : > { %s3278_s29 = smov 128   ;;  %s3279_s28 = smov 8  }
 0xd2f   : > { %2900 = dma.vmem_to_hbm [thread:$0]  (%p3842_p11), %s3748_s24, 256, %s3753_s21, %s2434_s9, %s3278_s29, %s3278_s29, %s3279_s28  }
 0xd30 PF: > { %s2462_s23 = sand.u32 1, %s3252_s17   ;;  %p3843_p0 = scmp.ne.s32.totalorder %s3830_s14, 0 }
 0xd31   : > { %p3844_p13 = scmp.ge.s32.totalorder %s3264_s20, 2  ;;  %s2463_s13 = scalar_lea.sflag [#allocation5], %s2462_s23 }
 0xd33   : > { %p2923_p5 = pnand %p3844_p13, %p3843_p0 }
 0xd35   : > { %p2924_p9 = pneg %p2923_p5 }
 0xd37   : > { %3247 = dma.done.wait (%p2924_p9), %s2463_s13, 256  }
 0xd38   : > { %3249 = vsyncadd (%p2924_p9), %s2463_s13, 4294967040  ;;  %p27_p1 = scmp.ge.s32.totalorder %s3441_s30, 4   ;;  %s3845_s17 = smov %s3256_s18 }
 0xd39   : > { %s3846_s18 = smov %s3260_s19  ;;  %s3847_s19 = smov %s3453_s12 }
 0xd3a   : > { %s3848_s20 = smov %s3441_s30  ;;  %29 = sbr.rel (!%p27_p1) target bundleno = 14 (0xe), region = 129 }
 0xd3f   :  { %2468 = vsyncpa [#allocation4], 1 }
 0xd40   :  { %2470 = vsyncpa [#allocation4 + $0x1], 1 }
 0xd41   :  { %2471 = vsyncpa [#allocation7], 1 }
 0xd42   :  { %2472 = vsyncpa [#allocation10], 1 }
 0xd43   :  { %2473 = vsyncpa [#allocation13], 1 }
 0xd44   :  { %2474 = vsyncpa [#allocation5], 1 }
 0xd45   :  { %2476 = vsyncpa [#allocation5 + $0x1], 1 }

</bundles_post_ra>
